<compile_context>
chip_gen: v5e
topology: v5e:2x2
jax: 0.10.0
libtpu: 0.0.40
codegen_flags: <defaults>
</compile_context>

<pallas_src>
import math

import jax
import jax.numpy as jnp
from jax.experimental import pallas as pl
from jax.experimental.pallas import tpu as pltpu

# ---------------- config (consistent with the module's asserts) ----------------
B = 2            # batch
C_IN = 3         # channels of x_noisy consumed by the (stand-in) base unet
H = W = 16       # spatial size
BASE_SIZE = 8
STRIDE = 8
MULT = (2, 2)                        # mult_shape
N_WIN = MULT[0] * MULT[1]            # 4 windows
W_CH = 4 * N_WIN                     # 16 == dit_kwargs['in_channels']
OUT_CH = 3                           # == dit_kwargs['out_channels']

PATCH = 2
PP = PATCH * PATCH                   # 4 pixels per patch
TOK_H = H // PATCH                   # 8
TOK_W = W // PATCH                   # 8
N_TOK = TOK_H * TOK_W                # 64 tokens per image
R_TOK = B * N_TOK                    # 128 rows (batch folded into tokens)
P_DIM = W_CH * PP                    # 64 patch features
HIDDEN = 64
MLP_DIM = 4 * HIDDEN
PO = PP * OUT_CH                     # 12 per-patch output features
PO_PAD = 128                         # padded projection width -> unmasked lane-dense store
FREQ = 32                            # sinusoidal timestep embedding dim

# fusion assumptions (hold for this config): windows tile the image and are aligned to
# patch boundaries, so the per-pixel window mask collapses to a per-token mask.
assert STRIDE == BASE_SIZE and BASE_SIZE % PATCH == 0
assert MULT[0] * STRIDE == H and MULT[1] * STRIDE == W


# =========================================================================
# Fused kernel: unet stand-in + windowed assembly (patch layout) + DiT core.
# Single grid step; rows = B*N_TOK = 128 (batch folded into tokens).
# =========================================================================
def fused_kernel(xp_ref, scale_ref, wu_ref, bu_ref, modr_ref,
                 winm_ref, abias_ref,
                 wpe_ref, bpe_ref,
                 wqkv_ref, bqkv_ref, wproj_ref, bproj_ref,
                 wm1_ref, bm1_ref, wm2_ref, bm2_ref,
                 wfin_ref, bfin_ref,
                 out_ref):
    f32 = jnp.float32

    def ln(z):  # LayerNorm without affine (DiT uses elementwise_affine=False)
        mu = jnp.mean(z, axis=-1, keepdims=True)
        var = jnp.mean(jnp.square(z - mu), axis=-1, keepdims=True)
        return (z - mu) * jax.lax.rsqrt(var + 1e-6)

    # ---- stand-in base unet: pointwise conv + tanh, already in patch layout ----
    # xp: (R_TOK, C_IN*PP); wu is kron(w_unet, I_PP) so column r*PP+q is unet channel r
    # at in-patch pixel q -> matches the c*PP+q patchify feature convention.
    up = jnp.tanh(jnp.dot(xp_ref[...], wu_ref[...], preferred_element_type=f32)
                  + bu_ref[...])
    up = up * scale_ref[...]                                     # (R_TOK, 3*PP)

    # ---- windowed dit_input assembly, directly as patch features ----
    # per-window 16-wide feature block = [unet ch0..2 (12 cols), mask channel == 1 (4 cols)],
    # zeroed unless the token lies inside that window (precomputed winm mask).
    base = jnp.concatenate([up, jnp.ones((R_TOK, PP), f32)], axis=1)     # (R_TOK, 16)
    patches = jnp.concatenate([base, base, base, base], axis=1) * winm_ref[...]

    # ---- DiT: patch embedding ----
    x = jnp.dot(patches, wpe_ref[...], preferred_element_type=f32) + bpe_ref[...]

    # precomputed per-token adaLN rows; scale rows already include the (1 + scale)
    sh_msa = modr_ref[0]; sc_msa = modr_ref[1]; g_msa = modr_ref[2]
    sh_mlp = modr_ref[3]; sc_mlp = modr_ref[4]; g_mlp = modr_ref[5]
    sh_fin = modr_ref[6]; sc_fin = modr_ref[7]

    # ---- attention block (single head), block-diagonal over the folded batch ----
    h = ln(x) * sc_msa + sh_msa
    qkv = jnp.dot(h, wqkv_ref[...], preferred_element_type=f32) + bqkv_ref[...]
    q = qkv[:, 0:HIDDEN]
    k = qkv[:, HIDDEN:2 * HIDDEN]
    v = qkv[:, 2 * HIDDEN:3 * HIDDEN]
    s = jax.lax.dot_general(q, k, (((1,), (1,)), ((), ())),
                            preferred_element_type=f32)
    s = s * (1.0 / math.sqrt(HIDDEN)) + abias_ref[...]   # -1e30 off the batch diagonal
    s = s - jnp.max(s, axis=-1, keepdims=True)
    p = jnp.exp(s)
    p = p * pl.reciprocal(jnp.sum(p, axis=-1, keepdims=True), approx=True)
    attn = jnp.dot(p, v, preferred_element_type=f32)
    attn = jnp.dot(attn, wproj_ref[...], preferred_element_type=f32) + bproj_ref[...]
    x = x + g_msa * attn

    # ---- MLP block ----
    h2 = ln(x) * sc_mlp + sh_mlp
    m = jnp.dot(h2, wm1_ref[...], preferred_element_type=f32) + bm1_ref[...]
    m = jax.nn.gelu(m, approximate=True)
    m = jnp.dot(m, wm2_ref[...], preferred_element_type=f32) + bm2_ref[...]
    x = x + g_mlp * m

    # ---- final layer (projection zero-padded to 128 cols -> unmasked store) ----
    hf = ln(x) * sc_fin + sh_fin
    out = jnp.dot(hf, wfin_ref[...], preferred_element_type=f32) + bfin_ref[...]
    out_ref[...] = out.astype(out_ref.dtype)


def _full_spec(shape):
    nd = len(shape)
    return pl.BlockSpec(shape, lambda i, _n=nd: (0,) * _n)


def fused_forward(xp, scale_rows, wu_full, bu_full, mod_rows, win_mask, attn_bias,
                  wpe, bpe, wqkv, bqkv, wproj, bproj,
                  wm1, bm1, wm2, bm2, wfin_p, bfin_p):
    args = (xp, scale_rows, wu_full, bu_full, mod_rows, win_mask, attn_bias,
            wpe, bpe, wqkv, bqkv, wproj, bproj,
            wm1, bm1, wm2, bm2, wfin_p, bfin_p)
    return pl.pallas_call(
        fused_kernel,
        out_shape=jax.ShapeDtypeStruct((R_TOK, PO_PAD), jnp.float32),
        grid=(1,),
        in_specs=[_full_spec(a.shape) for a in args],
        out_specs=_full_spec((R_TOK, PO_PAD)),
        compiler_params=pltpu.CompilerParams(dimension_semantics=("arbitrary",)),
        cost_estimate=pl.CostEstimate(flops=20_000_000, transcendentals=60_000,
                                      bytes_accessed=700_000),
    )(*args)


# ------------------------- plain-JAX glue (all inside one jit) -------------------------
def timestep_embedding(sigmas, dim=FREQ, max_period=10000.0):
    half = dim // 2
    freqs = jnp.exp(-math.log(max_period) *
                    jnp.arange(half, dtype=jnp.float32) / half)
    args = sigmas[:, None].astype(jnp.float32) * freqs[None, :]
    return jnp.concatenate([jnp.cos(args), jnp.sin(args)], axis=-1)


def _window_mask():
    # per-token window assignment -> per-(token, patch-feature) indicator (compile-time const)
    tok = jnp.arange(R_TOK)
    tw = tok % TOK_W
    th = (tok // TOK_W) % TOK_H
    win = (th // (TOK_H // MULT[0])) * MULT[1] + (tw // (TOK_W // MULT[1]))
    col = jnp.arange(P_DIM)
    return (win[:, None] == (col[None, :] // (4 * PP))).astype(jnp.float32)


def _batch_block_bias():
    # additive attention bias: 0 within the same image, -1e30 across images (compile-time const)
    ri = jnp.arange(R_TOK)
    same = (ri[:, None] // N_TOK) == (ri[None, :] // N_TOK)
    return jnp.where(same, 0.0, -1e30).astype(jnp.float32)


def forward(params, x_noisy, sigmas):
    p = params
    xf = x_noisy.astype(jnp.float32)
    sig = sigmas.astype(jnp.float32)

    # patchify the raw input (tiny, fused by XLA): (B,C_IN,H,W) -> (B*N_TOK, C_IN*PP)
    xp = xf.reshape(B, C_IN, TOK_H, PATCH, TOK_W, PATCH)
    xp = xp.transpose(0, 2, 4, 1, 3, 5).reshape(R_TOK, C_IN * PP)

    # per-row unet output scale (stand-in uses 1/sqrt(1+sigma^2))
    scale = 1.0 / jnp.sqrt(1.0 + sig ** 2)                     # (B,)
    scale_rows = jnp.repeat(scale, N_TOK)[:, None]             # (R_TOK, 1)

    # kron-expand the pointwise unet so it acts on the patchified layout in one matmul
    wu_full = jnp.kron(p['w_unet'], jnp.eye(PP, dtype=jnp.float32))   # (C_IN*PP, 3*PP)
    bu_full = jnp.repeat(p['b_unet'], PP)[None, :]                    # (1, 3*PP)

    # DiT conditioning from sigmas (tiny matmuls); fold the "+1" into the scale rows
    temb = timestep_embedding(sig)
    c = jax.nn.silu(temb @ p['wt1'] + p['bt1']) @ p['wt2'] + p['bt2']
    cm = jax.nn.silu(c)
    mod = (cm @ p['wmod'] + p['bmod']).reshape(B, 6, HIDDEN)
    fmod = (cm @ p['wfmod'] + p['bfmod']).reshape(B, 2, HIDDEN)
    allmod = jnp.concatenate([mod, fmod], axis=1)              # (B, 8, HIDDEN)
    plus1 = jnp.array([0., 1., 0., 0., 1., 0., 0., 1.], jnp.float32)[None, :, None]
    allmod = allmod + plus1
    mod_rows = jnp.repeat(allmod.transpose(1, 0, 2), N_TOK, axis=1)   # (8, R_TOK, HIDDEN)

    # compile-time constant masks (XLA constant-folds these under jit)
    win_mask = _window_mask()                                   # (R_TOK, P_DIM)
    attn_bias = _batch_block_bias()                             # (R_TOK, R_TOK)

    # pad the final projection to 128 output columns (unmasked lane-dense store)
    wfin_p = jnp.pad(p['wfin'], ((0, 0), (0, PO_PAD - PO)))
    bfin_p = jnp.pad(p['bfin'], ((0, 0), (0, PO_PAD - PO)))

    out_pad = fused_forward(xp, scale_rows, wu_full, bu_full, mod_rows,
                            win_mask, attn_bias,
                            p['wpe'], p['bpe'], p['wqkv'], p['bqkv'],
                            p['wproj'], p['bproj'], p['wm1'], p['bm1'],
                            p['wm2'], p['bm2'], wfin_p, bfin_p)

    # unpatchify (tiny, fused by XLA): (R_TOK, PO) -> (B, OUT_CH, H, W)
    y = out_pad[:, :PO].reshape(B, TOK_H, TOK_W, PATCH, PATCH, OUT_CH)
    y = jnp.einsum('nhwpqc->nchpwq', y).reshape(B, OUT_CH, H, W)
    return y


class TransformerAlphaPallas:
    """JAX/Pallas equivalent of TransformerAlpha.forward with synthetic weights."""

    def __init__(self, key):
        ks = jax.random.split(key, 12)
        s = 0.05
        zeros = lambda shape: jnp.zeros(shape, jnp.float32)
        init = lambda k, shape: jax.random.normal(k, shape, jnp.float32) * s
        self.params = {
            # base_model.unet stand-in (pointwise conv C_IN -> 3)
            'w_unet': init(ks[0], (C_IN, 3)),
            'b_unet': init(ks[1], (3,)),
            # DiT timestep / modulation (small glue matmuls)
            'wt1': init(ks[2], (FREQ, HIDDEN)), 'bt1': zeros((HIDDEN,)),
            'wt2': init(ks[3], (HIDDEN, HIDDEN)), 'bt2': zeros((HIDDEN,)),
            'wmod': init(ks[4], (HIDDEN, 6 * HIDDEN)), 'bmod': zeros((6 * HIDDEN,)),
            'wfmod': init(ks[5], (HIDDEN, 2 * HIDDEN)), 'bfmod': zeros((2 * HIDDEN,)),
            # DiT core (fused Pallas kernel)
            'wpe': init(ks[6], (P_DIM, HIDDEN)), 'bpe': zeros((1, HIDDEN)),
            'wqkv': init(ks[7], (HIDDEN, 3 * HIDDEN)), 'bqkv': zeros((1, 3 * HIDDEN)),
            'wproj': init(ks[8], (HIDDEN, HIDDEN)), 'bproj': zeros((1, HIDDEN)),
            'wm1': init(ks[9], (HIDDEN, MLP_DIM)), 'bm1': zeros((1, MLP_DIM)),
            'wm2': init(ks[10], (MLP_DIM, HIDDEN)), 'bm2': zeros((1, HIDDEN)),
            'wfin': init(ks[11], (HIDDEN, PO)), 'bfin': zeros((1, PO)),
        }
        self._fwd = jax.jit(forward)

    def __call__(self, x_noisy, sigmas):
        return self._fwd(self.params, x_noisy, sigmas)


if __name__ == "__main__":
    key = jax.random.PRNGKey(0)
    k_x, k_s, k_p = jax.random.split(key, 3)
    x_noisy = jax.random.normal(k_x, (B, C_IN, H, W), jnp.float32)
    sigmas = jnp.abs(jax.random.normal(k_s, (B,), jnp.float32)) + 0.5

    model = TransformerAlphaPallas(k_p)
    out = model(x_noisy, sigmas)
    out = jax.block_until_ready(out)
    assert out.shape == (B, OUT_CH, H, W)
    assert bool(jnp.all(jnp.isfinite(out)))
    print("KERNEL_OK")
</pallas_src>

<mosaic_0001>
module attributes {stable_mosaic.version = 11 : i64} {
  func.func @fused_kernel(%arg0: i32, %arg1: memref<128x12xf32, #tpu.memory_space<vmem>>, %arg2: memref<128x1xf32, #tpu.memory_space<vmem>>, %arg3: memref<12x12xf32, #tpu.memory_space<vmem>>, %arg4: memref<1x12xf32, #tpu.memory_space<vmem>>, %arg5: memref<8x128x64xf32, #tpu.memory_space<vmem>>, %arg6: memref<128x64xf32, #tpu.memory_space<vmem>>, %arg7: memref<128x128xf32, #tpu.memory_space<vmem>>, %arg8: memref<64x64xf32, #tpu.memory_space<vmem>>, %arg9: memref<1x64xf32, #tpu.memory_space<vmem>>, %arg10: memref<64x192xf32, #tpu.memory_space<vmem>>, %arg11: memref<1x192xf32, #tpu.memory_space<vmem>>, %arg12: memref<64x64xf32, #tpu.memory_space<vmem>>, %arg13: memref<1x64xf32, #tpu.memory_space<vmem>>, %arg14: memref<64x256xf32, #tpu.memory_space<vmem>>, %arg15: memref<1x256xf32, #tpu.memory_space<vmem>>, %arg16: memref<256x64xf32, #tpu.memory_space<vmem>>, %arg17: memref<1x64xf32, #tpu.memory_space<vmem>>, %arg18: memref<64x128xf32, #tpu.memory_space<vmem>>, %arg19: memref<1x128xf32, #tpu.memory_space<vmem>>, %arg20: memref<128x128xf32, #tpu.memory_space<vmem>>) attributes {dimension_semantics = [#tpu.dimension_semantics<arbitrary>], iteration_bounds = array<i64: 1>, scalar_prefetch = 0 : i64, scratch_operands = 0 : i64, tpu.core_type = #tpu.core_type<tc>, window_params = [{pipeline_mode = #tpu.pipeline_mode<synchronous>, transform_indices = @transform_0, window_bounds = array<i64: 128, 12>}, {pipeline_mode = #tpu.pipeline_mode<synchronous>, transform_indices = @transform_1, window_bounds = array<i64: 128, 1>}, {pipeline_mode = #tpu.pipeline_mode<synchronous>, transform_indices = @transform_2, window_bounds = array<i64: 12, 12>}, {pipeline_mode = #tpu.pipeline_mode<synchronous>, transform_indices = @transform_3, window_bounds = array<i64: 1, 12>}, {pipeline_mode = #tpu.pipeline_mode<synchronous>, transform_indices = @transform_4, window_bounds = array<i64: 8, 128, 64>}, {pipeline_mode = #tpu.pipeline_mode<synchronous>, transform_indices = @transform_5, window_bounds = array<i64: 128, 64>}, {pipeline_mode = #tpu.pipeline_mode<synchronous>, transform_indices = @transform_6, window_bounds = array<i64: 128, 128>}, {pipeline_mode = #tpu.pipeline_mode<synchronous>, transform_indices = @transform_7, window_bounds = array<i64: 64, 64>}, {pipeline_mode = #tpu.pipeline_mode<synchronous>, transform_indices = @transform_8, window_bounds = array<i64: 1, 64>}, {pipeline_mode = #tpu.pipeline_mode<synchronous>, transform_indices = @transform_9, window_bounds = array<i64: 64, 192>}, {pipeline_mode = #tpu.pipeline_mode<synchronous>, transform_indices = @transform_10, window_bounds = array<i64: 1, 192>}, {pipeline_mode = #tpu.pipeline_mode<synchronous>, transform_indices = @transform_11, window_bounds = array<i64: 64, 64>}, {pipeline_mode = #tpu.pipeline_mode<synchronous>, transform_indices = @transform_12, window_bounds = array<i64: 1, 64>}, {pipeline_mode = #tpu.pipeline_mode<synchronous>, transform_indices = @transform_13, window_bounds = array<i64: 64, 256>}, {pipeline_mode = #tpu.pipeline_mode<synchronous>, transform_indices = @transform_14, window_bounds = array<i64: 1, 256>}, {pipeline_mode = #tpu.pipeline_mode<synchronous>, transform_indices = @transform_15, window_bounds = array<i64: 256, 64>}, {pipeline_mode = #tpu.pipeline_mode<synchronous>, transform_indices = @transform_16, window_bounds = array<i64: 1, 64>}, {pipeline_mode = #tpu.pipeline_mode<synchronous>, transform_indices = @transform_17, window_bounds = array<i64: 64, 128>}, {pipeline_mode = #tpu.pipeline_mode<synchronous>, transform_indices = @transform_18, window_bounds = array<i64: 1, 128>}, {pipeline_mode = #tpu.pipeline_mode<synchronous>, transform_indices = @transform_19, window_bounds = array<i64: 128, 128>}]} {
    %c0 = arith.constant 0 : index
    %c0_0 = arith.constant 0 : index
    %0 = vector.load %arg1[%c0, %c0_0] : memref<128x12xf32, #tpu.memory_space<vmem>>, vector<128x12xf32>
    %c0_1 = arith.constant 0 : index
    %c0_2 = arith.constant 0 : index
    %1 = vector.load %arg3[%c0_1, %c0_2] : memref<12x12xf32, #tpu.memory_space<vmem>>, vector<12x12xf32>
    %cst = arith.constant dense<0.000000e+00> : vector<128x12xf32>
    %2 = tpu.matmul %0, %1, %cst {dimension_numbers = #tpu.dot_dimension_numbers<[1], [0], [0], [1], [0, 0, 1, 1], [], []>} : vector<128x12xf32>, vector<12x12xf32>, vector<128x12xf32> -> vector<128x12xf32>
    %c0_3 = arith.constant 0 : index
    %c0_4 = arith.constant 0 : index
    %3 = vector.load %arg4[%c0_3, %c0_4] : memref<1x12xf32, #tpu.memory_space<vmem>>, vector<1x12xf32>
    %4 = vector.broadcast %3 : vector<1x12xf32> to vector<128x12xf32>
    %5 = arith.addf %2, %4 : vector<128x12xf32>
    %6 = math.tanh %5 : vector<128x12xf32>
    %c0_5 = arith.constant 0 : index
    %c0_6 = arith.constant 0 : index
    %7 = vector.load %arg2[%c0_5, %c0_6] : memref<128x1xf32, #tpu.memory_space<vmem>>, vector<128x1xf32>
    %8 = vector.broadcast %7 : vector<128x1xf32> to vector<128x12xf32>
    %9 = arith.mulf %6, %8 : vector<128x12xf32>
    %cst_7 = arith.constant 1.000000e+00 : f32
    %10 = vector.broadcast %cst_7 : f32 to vector<128x4xf32>
    %11 = tpu.concatenate %9, %10 in 1 : vector<128x12xf32>, vector<128x4xf32> -> vector<128x16xf32>
    %12 = tpu.concatenate %11, %11, %11, %11 in 1 : vector<128x16xf32>, vector<128x16xf32>, vector<128x16xf32>, vector<128x16xf32> -> vector<128x64xf32>
    %c0_8 = arith.constant 0 : index
    %c0_9 = arith.constant 0 : index
    %13 = vector.load %arg6[%c0_8, %c0_9] : memref<128x64xf32, #tpu.memory_space<vmem>>, vector<128x64xf32>
    %14 = arith.mulf %12, %13 : vector<128x64xf32>
    %c0_10 = arith.constant 0 : index
    %c0_11 = arith.constant 0 : index
    %15 = vector.load %arg8[%c0_10, %c0_11] : memref<64x64xf32, #tpu.memory_space<vmem>>, vector<64x64xf32>
    %cst_12 = arith.constant dense<0.000000e+00> : vector<128x64xf32>
    %16 = tpu.matmul %14, %15, %cst_12 {dimension_numbers = #tpu.dot_dimension_numbers<[1], [0], [0], [1], [0, 0, 1, 1], [], []>} : vector<128x64xf32>, vector<64x64xf32>, vector<128x64xf32> -> vector<128x64xf32>
    %c0_13 = arith.constant 0 : index
    %c0_14 = arith.constant 0 : index
    %17 = vector.load %arg9[%c0_13, %c0_14] : memref<1x64xf32, #tpu.memory_space<vmem>>, vector<1x64xf32>
    %18 = vector.broadcast %17 : vector<1x64xf32> to vector<128x64xf32>
    %19 = arith.addf %16, %18 : vector<128x64xf32>
    %c0_15 = arith.constant 0 : index
    %c0_16 = arith.constant 0 : index
    %c0_17 = arith.constant 0 : index
    %20 = vector.load %arg5[%c0_15, %c0_16, %c0_17] : memref<8x128x64xf32, #tpu.memory_space<vmem>>, vector<1x128x64xf32>
    %21 = vector.shape_cast %20 : vector<1x128x64xf32> to vector<128x64xf32>
    %c1 = arith.constant 1 : index
    %c0_18 = arith.constant 0 : index
    %c0_19 = arith.constant 0 : index
    %22 = vector.load %arg5[%c1, %c0_18, %c0_19] : memref<8x128x64xf32, #tpu.memory_space<vmem>>, vector<1x128x64xf32>
    %23 = vector.shape_cast %22 : vector<1x128x64xf32> to vector<128x64xf32>
    %c2 = arith.constant 2 : index
    %c0_20 = arith.constant 0 : index
    %c0_21 = arith.constant 0 : index
    %24 = vector.load %arg5[%c2, %c0_20, %c0_21] : memref<8x128x64xf32, #tpu.memory_space<vmem>>, vector<1x128x64xf32>
    %25 = vector.shape_cast %24 : vector<1x128x64xf32> to vector<128x64xf32>
    %c3 = arith.constant 3 : index
    %c0_22 = arith.constant 0 : index
    %c0_23 = arith.constant 0 : index
    %26 = vector.load %arg5[%c3, %c0_22, %c0_23] : memref<8x128x64xf32, #tpu.memory_space<vmem>>, vector<1x128x64xf32>
    %27 = vector.shape_cast %26 : vector<1x128x64xf32> to vector<128x64xf32>
    %c4 = arith.constant 4 : index
    %c0_24 = arith.constant 0 : index
    %c0_25 = arith.constant 0 : index
    %28 = vector.load %arg5[%c4, %c0_24, %c0_25] : memref<8x128x64xf32, #tpu.memory_space<vmem>>, vector<1x128x64xf32>
    %29 = vector.shape_cast %28 : vector<1x128x64xf32> to vector<128x64xf32>
    %c5 = arith.constant 5 : index
    %c0_26 = arith.constant 0 : index
    %c0_27 = arith.constant 0 : index
    %30 = vector.load %arg5[%c5, %c0_26, %c0_27] : memref<8x128x64xf32, #tpu.memory_space<vmem>>, vector<1x128x64xf32>
    %31 = vector.shape_cast %30 : vector<1x128x64xf32> to vector<128x64xf32>
    %c6 = arith.constant 6 : index
    %c0_28 = arith.constant 0 : index
    %c0_29 = arith.constant 0 : index
    %32 = vector.load %arg5[%c6, %c0_28, %c0_29] : memref<8x128x64xf32, #tpu.memory_space<vmem>>, vector<1x128x64xf32>
    %33 = vector.shape_cast %32 : vector<1x128x64xf32> to vector<128x64xf32>
    %c7 = arith.constant 7 : index
    %c0_30 = arith.constant 0 : index
    %c0_31 = arith.constant 0 : index
    %34 = vector.load %arg5[%c7, %c0_30, %c0_31] : memref<8x128x64xf32, #tpu.memory_space<vmem>>, vector<1x128x64xf32>
    %35 = vector.shape_cast %34 : vector<1x128x64xf32> to vector<128x64xf32>
    %cst_32 = arith.constant dense<0.000000e+00> : vector<128xf32>
    %36 = vector.multi_reduction <add>, %19, %cst_32 [1] : vector<128x64xf32> to vector<128xf32>
    %37 = vector.shape_cast %36 : vector<128xf32> to vector<128x1xf32>
    %cst_33 = arith.constant 6.400000e+01 : f32
    %38 = vector.broadcast %cst_33 : f32 to vector<128x1xf32>
    %39 = arith.divf %37, %38 : vector<128x1xf32>
    %40 = vector.broadcast %39 : vector<128x1xf32> to vector<128x64xf32>
    %41 = arith.subf %19, %40 : vector<128x64xf32>
    %42 = arith.mulf %41, %41 : vector<128x64xf32>
    %cst_34 = arith.constant dense<0.000000e+00> : vector<128xf32>
    %43 = vector.multi_reduction <add>, %42, %cst_34 [1] : vector<128x64xf32> to vector<128xf32>
    %44 = vector.shape_cast %43 : vector<128xf32> to vector<128x1xf32>
    %cst_35 = arith.constant 6.400000e+01 : f32
    %45 = vector.broadcast %cst_35 : f32 to vector<128x1xf32>
    %46 = arith.divf %44, %45 : vector<128x1xf32>
    %47 = vector.broadcast %39 : vector<128x1xf32> to vector<128x64xf32>
    %48 = arith.subf %19, %47 : vector<128x64xf32>
    %cst_36 = arith.constant 9.99999997E-7 : f32
    %49 = vector.broadcast %cst_36 : f32 to vector<128x1xf32>
    %50 = arith.addf %46, %49 : vector<128x1xf32>
    %51 = math.rsqrt %50 : vector<128x1xf32>
    %52 = vector.broadcast %51 : vector<128x1xf32> to vector<128x64xf32>
    %53 = arith.mulf %48, %52 : vector<128x64xf32>
    %54 = arith.mulf %53, %23 : vector<128x64xf32>
    %55 = arith.addf %54, %21 : vector<128x64xf32>
    %c0_37 = arith.constant 0 : index
    %c0_38 = arith.constant 0 : index
    %56 = vector.load %arg10[%c0_37, %c0_38] : memref<64x192xf32, #tpu.memory_space<vmem>>, vector<64x192xf32>
    %cst_39 = arith.constant dense<0.000000e+00> : vector<128x192xf32>
    %57 = tpu.matmul %55, %56, %cst_39 {dimension_numbers = #tpu.dot_dimension_numbers<[1], [0], [0], [1], [0, 0, 1, 1], [], []>} : vector<128x64xf32>, vector<64x192xf32>, vector<128x192xf32> -> vector<128x192xf32>
    %c0_40 = arith.constant 0 : index
    %c0_41 = arith.constant 0 : index
    %58 = vector.load %arg11[%c0_40, %c0_41] : memref<1x192xf32, #tpu.memory_space<vmem>>, vector<1x192xf32>
    %59 = vector.broadcast %58 : vector<1x192xf32> to vector<128x192xf32>
    %60 = arith.addf %57, %59 : vector<128x192xf32>
    %61 = vector.extract_strided_slice %60 {offsets = [0, 0], sizes = [128, 64], strides = [1, 1]} : vector<128x192xf32> to vector<128x64xf32>
    %62 = vector.extract_strided_slice %60 {offsets = [0, 64], sizes = [128, 64], strides = [1, 1]} : vector<128x192xf32> to vector<128x64xf32>
    %63 = vector.extract_strided_slice %60 {offsets = [0, 128], sizes = [128, 64], strides = [1, 1]} : vector<128x192xf32> to vector<128x64xf32>
    %cst_42 = arith.constant dense<0.000000e+00> : vector<128x128xf32>
    %64 = tpu.matmul %61, %62, %cst_42 {dimension_numbers = #tpu.dot_dimension_numbers<[1], [1], [0], [0], [0, 0, 1, 0], [], []>} : vector<128x64xf32>, vector<128x64xf32>, vector<128x128xf32> -> vector<128x128xf32>
    %cst_43 = arith.constant 1.250000e-01 : f32
    %65 = vector.broadcast %cst_43 : f32 to vector<128x128xf32>
    %66 = arith.mulf %64, %65 : vector<128x128xf32>
    %c0_44 = arith.constant 0 : index
    %c0_45 = arith.constant 0 : index
    %67 = vector.load %arg7[%c0_44, %c0_45] : memref<128x128xf32, #tpu.memory_space<vmem>>, vector<128x128xf32>
    %68 = arith.addf %66, %67 : vector<128x128xf32>
    %cst_46 = arith.constant dense<0xFF800000> : vector<128xf32>
    %69 = vector.multi_reduction <maximumf>, %68, %cst_46 [1] : vector<128x128xf32> to vector<128xf32>
    %70 = vector.shape_cast %69 : vector<128xf32> to vector<128x1xf32>
    %71 = vector.broadcast %70 : vector<128x1xf32> to vector<128x128xf32>
    %72 = arith.subf %68, %71 : vector<128x128xf32>
    %73 = math.exp %72 : vector<128x128xf32>
    %cst_47 = arith.constant dense<0.000000e+00> : vector<128xf32>
    %74 = vector.multi_reduction <add>, %73, %cst_47 [1] : vector<128x128xf32> to vector<128xf32>
    %75 = vector.shape_cast %74 : vector<128xf32> to vector<128x1xf32>
    %76 = tpu.reciprocal %75 {approx = true} : vector<128x1xf32> -> vector<128x1xf32>
    %77 = vector.broadcast %76 : vector<128x1xf32> to vector<128x128xf32>
    %78 = arith.mulf %73, %77 : vector<128x128xf32>
    %cst_48 = arith.constant dense<0.000000e+00> : vector<128x64xf32>
    %79 = tpu.matmul %78, %63, %cst_48 {dimension_numbers = #tpu.dot_dimension_numbers<[1], [0], [0], [1], [0, 0, 1, 1], [], []>} : vector<128x128xf32>, vector<128x64xf32>, vector<128x64xf32> -> vector<128x64xf32>
    %c0_49 = arith.constant 0 : index
    %c0_50 = arith.constant 0 : index
    %80 = vector.load %arg12[%c0_49, %c0_50] : memref<64x64xf32, #tpu.memory_space<vmem>>, vector<64x64xf32>
    %cst_51 = arith.constant dense<0.000000e+00> : vector<128x64xf32>
    %81 = tpu.matmul %79, %80, %cst_51 {dimension_numbers = #tpu.dot_dimension_numbers<[1], [0], [0], [1], [0, 0, 1, 1], [], []>} : vector<128x64xf32>, vector<64x64xf32>, vector<128x64xf32> -> vector<128x64xf32>
    %c0_52 = arith.constant 0 : index
    %c0_53 = arith.constant 0 : index
    %82 = vector.load %arg13[%c0_52, %c0_53] : memref<1x64xf32, #tpu.memory_space<vmem>>, vector<1x64xf32>
    %83 = vector.broadcast %82 : vector<1x64xf32> to vector<128x64xf32>
    %84 = arith.addf %81, %83 : vector<128x64xf32>
    %85 = arith.mulf %25, %84 : vector<128x64xf32>
    %86 = arith.addf %19, %85 : vector<128x64xf32>
    %cst_54 = arith.constant dense<0.000000e+00> : vector<128xf32>
    %87 = vector.multi_reduction <add>, %86, %cst_54 [1] : vector<128x64xf32> to vector<128xf32>
    %88 = vector.shape_cast %87 : vector<128xf32> to vector<128x1xf32>
    %cst_55 = arith.constant 6.400000e+01 : f32
    %89 = vector.broadcast %cst_55 : f32 to vector<128x1xf32>
    %90 = arith.divf %88, %89 : vector<128x1xf32>
    %91 = vector.broadcast %90 : vector<128x1xf32> to vector<128x64xf32>
    %92 = arith.subf %86, %91 : vector<128x64xf32>
    %93 = arith.mulf %92, %92 : vector<128x64xf32>
    %cst_56 = arith.constant dense<0.000000e+00> : vector<128xf32>
    %94 = vector.multi_reduction <add>, %93, %cst_56 [1] : vector<128x64xf32> to vector<128xf32>
    %95 = vector.shape_cast %94 : vector<128xf32> to vector<128x1xf32>
    %cst_57 = arith.constant 6.400000e+01 : f32
    %96 = vector.broadcast %cst_57 : f32 to vector<128x1xf32>
    %97 = arith.divf %95, %96 : vector<128x1xf32>
    %98 = vector.broadcast %90 : vector<128x1xf32> to vector<128x64xf32>
    %99 = arith.subf %86, %98 : vector<128x64xf32>
    %cst_58 = arith.constant 9.99999997E-7 : f32
    %100 = vector.broadcast %cst_58 : f32 to vector<128x1xf32>
    %101 = arith.addf %97, %100 : vector<128x1xf32>
    %102 = math.rsqrt %101 : vector<128x1xf32>
    %103 = vector.broadcast %102 : vector<128x1xf32> to vector<128x64xf32>
    %104 = arith.mulf %99, %103 : vector<128x64xf32>
    %105 = arith.mulf %104, %29 : vector<128x64xf32>
    %106 = arith.addf %105, %27 : vector<128x64xf32>
    %c0_59 = arith.constant 0 : index
    %c0_60 = arith.constant 0 : index
    %107 = vector.load %arg14[%c0_59, %c0_60] : memref<64x256xf32, #tpu.memory_space<vmem>>, vector<64x256xf32>
    %cst_61 = arith.constant dense<0.000000e+00> : vector<128x256xf32>
    %108 = tpu.matmul %106, %107, %cst_61 {dimension_numbers = #tpu.dot_dimension_numbers<[1], [0], [0], [1], [0, 0, 1, 1], [], []>} : vector<128x64xf32>, vector<64x256xf32>, vector<128x256xf32> -> vector<128x256xf32>
    %c0_62 = arith.constant 0 : index
    %c0_63 = arith.constant 0 : index
    %109 = vector.load %arg15[%c0_62, %c0_63] : memref<1x256xf32, #tpu.memory_space<vmem>>, vector<1x256xf32>
    %110 = vector.broadcast %109 : vector<1x256xf32> to vector<128x256xf32>
    %111 = arith.addf %108, %110 : vector<128x256xf32>
    %112 = arith.mulf %111, %111 : vector<128x256xf32>
    %113 = arith.mulf %111, %112 : vector<128x256xf32>
    %cst_64 = arith.constant 4.471500e-02 : f32
    %114 = vector.broadcast %cst_64 : f32 to vector<128x256xf32>
    %115 = arith.mulf %114, %113 : vector<128x256xf32>
    %116 = arith.addf %111, %115 : vector<128x256xf32>
    %cst_65 = arith.constant 0.797884583 : f32
    %117 = vector.broadcast %cst_65 : f32 to vector<128x256xf32>
    %118 = arith.mulf %117, %116 : vector<128x256xf32>
    %119 = math.tanh %118 : vector<128x256xf32>
    %cst_66 = arith.constant 1.000000e+00 : f32
    %120 = vector.broadcast %cst_66 : f32 to vector<128x256xf32>
    %121 = arith.addf %120, %119 : vector<128x256xf32>
    %cst_67 = arith.constant 5.000000e-01 : f32
    %122 = vector.broadcast %cst_67 : f32 to vector<128x256xf32>
    %123 = arith.mulf %122, %121 : vector<128x256xf32>
    %124 = arith.mulf %111, %123 : vector<128x256xf32>
    %c0_68 = arith.constant 0 : index
    %c0_69 = arith.constant 0 : index
    %125 = vector.load %arg16[%c0_68, %c0_69] : memref<256x64xf32, #tpu.memory_space<vmem>>, vector<256x64xf32>
    %cst_70 = arith.constant dense<0.000000e+00> : vector<128x64xf32>
    %126 = tpu.matmul %124, %125, %cst_70 {dimension_numbers = #tpu.dot_dimension_numbers<[1], [0], [0], [1], [0, 0, 1, 1], [], []>} : vector<128x256xf32>, vector<256x64xf32>, vector<128x64xf32> -> vector<128x64xf32>
    %c0_71 = arith.constant 0 : index
    %c0_72 = arith.constant 0 : index
    %127 = vector.load %arg17[%c0_71, %c0_72] : memref<1x64xf32, #tpu.memory_space<vmem>>, vector<1x64xf32>
    %128 = vector.broadcast %127 : vector<1x64xf32> to vector<128x64xf32>
    %129 = arith.addf %126, %128 : vector<128x64xf32>
    %130 = arith.mulf %31, %129 : vector<128x64xf32>
    %131 = arith.addf %86, %130 : vector<128x64xf32>
    %cst_73 = arith.constant dense<0.000000e+00> : vector<128xf32>
    %132 = vector.multi_reduction <add>, %131, %cst_73 [1] : vector<128x64xf32> to vector<128xf32>
    %133 = vector.shape_cast %132 : vector<128xf32> to vector<128x1xf32>
    %cst_74 = arith.constant 6.400000e+01 : f32
    %134 = vector.broadcast %cst_74 : f32 to vector<128x1xf32>
    %135 = arith.divf %133, %134 : vector<128x1xf32>
    %136 = vector.broadcast %135 : vector<128x1xf32> to vector<128x64xf32>
    %137 = arith.subf %131, %136 : vector<128x64xf32>
    %138 = arith.mulf %137, %137 : vector<128x64xf32>
    %cst_75 = arith.constant dense<0.000000e+00> : vector<128xf32>
    %139 = vector.multi_reduction <add>, %138, %cst_75 [1] : vector<128x64xf32> to vector<128xf32>
    %140 = vector.shape_cast %139 : vector<128xf32> to vector<128x1xf32>
    %cst_76 = arith.constant 6.400000e+01 : f32
    %141 = vector.broadcast %cst_76 : f32 to vector<128x1xf32>
    %142 = arith.divf %140, %141 : vector<128x1xf32>
    %143 = vector.broadcast %135 : vector<128x1xf32> to vector<128x64xf32>
    %144 = arith.subf %131, %143 : vector<128x64xf32>
    %cst_77 = arith.constant 9.99999997E-7 : f32
    %145 = vector.broadcast %cst_77 : f32 to vector<128x1xf32>
    %146 = arith.addf %142, %145 : vector<128x1xf32>
    %147 = math.rsqrt %146 : vector<128x1xf32>
    %148 = vector.broadcast %147 : vector<128x1xf32> to vector<128x64xf32>
    %149 = arith.mulf %144, %148 : vector<128x64xf32>
    %150 = arith.mulf %149, %35 : vector<128x64xf32>
    %151 = arith.addf %150, %33 : vector<128x64xf32>
    %c0_78 = arith.constant 0 : index
    %c0_79 = arith.constant 0 : index
    %152 = vector.load %arg18[%c0_78, %c0_79] : memref<64x128xf32, #tpu.memory_space<vmem>>, vector<64x128xf32>
    %cst_80 = arith.constant dense<0.000000e+00> : vector<128x128xf32>
    %153 = tpu.matmul %151, %152, %cst_80 {dimension_numbers = #tpu.dot_dimension_numbers<[1], [0], [0], [1], [0, 0, 1, 1], [], []>} : vector<128x64xf32>, vector<64x128xf32>, vector<128x128xf32> -> vector<128x128xf32>
    %c0_81 = arith.constant 0 : index
    %c0_82 = arith.constant 0 : index
    %154 = vector.load %arg19[%c0_81, %c0_82] : memref<1x128xf32, #tpu.memory_space<vmem>>, vector<1x128xf32>
    %155 = vector.broadcast %154 : vector<1x128xf32> to vector<128x128xf32>
    %156 = arith.addf %153, %155 : vector<128x128xf32>
    %c0_83 = arith.constant 0 : index
    %c0_84 = arith.constant 0 : index
    %157 = vector.load %arg20[%c0_83, %c0_84] : memref<128x128xf32, #tpu.memory_space<vmem>>, vector<128x128xf32>
    tpu.vector_store %arg20[%c0_83, %c0_84], %156 {strides = array<i32>} : memref<128x128xf32, #tpu.memory_space<vmem>>, vector<128x128xf32>,
    return
  }
  func.func @transform_0(%arg0: i32) -> (i32, i32) {
    %c0_i32 = arith.constant 0 : i32
    %c0_i32_0 = arith.constant 0 : i32
    %c0_i32_1 = arith.constant 0 : i32
    return %c0_i32, %c0_i32_0 : i32, i32
  }
  func.func @transform_1(%arg0: i32) -> (i32, i32) {
    %c0_i32 = arith.constant 0 : i32
    %c0_i32_0 = arith.constant 0 : i32
    %c0_i32_1 = arith.constant 0 : i32
    return %c0_i32, %c0_i32_0 : i32, i32
  }
  func.func @transform_2(%arg0: i32) -> (i32, i32) {
    %c0_i32 = arith.constant 0 : i32
    %c0_i32_0 = arith.constant 0 : i32
    %c0_i32_1 = arith.constant 0 : i32
    return %c0_i32, %c0_i32_0 : i32, i32
  }
  func.func @transform_3(%arg0: i32) -> (i32, i32) {
    %c0_i32 = arith.constant 0 : i32
    %c0_i32_0 = arith.constant 0 : i32
    %c0_i32_1 = arith.constant 0 : i32
    return %c0_i32, %c0_i32_0 : i32, i32
  }
  func.func @transform_4(%arg0: i32) -> (i32, i32, i32) {
    %c0_i32 = arith.constant 0 : i32
    %c0_i32_0 = arith.constant 0 : i32
    %c0_i32_1 = arith.constant 0 : i32
    %c0_i32_2 = arith.constant 0 : i32
    return %c0_i32, %c0_i32_0, %c0_i32_1 : i32, i32, i32
  }
  func.func @transform_5(%arg0: i32) -> (i32, i32) {
    %c0_i32 = arith.constant 0 : i32
    %c0_i32_0 = arith.constant 0 : i32
    %c0_i32_1 = arith.constant 0 : i32
    return %c0_i32, %c0_i32_0 : i32, i32
  }
  func.func @transform_6(%arg0: i32) -> (i32, i32) {
    %c0_i32 = arith.constant 0 : i32
    %c0_i32_0 = arith.constant 0 : i32
    %c0_i32_1 = arith.constant 0 : i32
    return %c0_i32, %c0_i32_0 : i32, i32
  }
  func.func @transform_7(%arg0: i32) -> (i32, i32) {
    %c0_i32 = arith.constant 0 : i32
    %c0_i32_0 = arith.constant 0 : i32
    %c0_i32_1 = arith.constant 0 : i32
    return %c0_i32, %c0_i32_0 : i32, i32
  }
  func.func @transform_8(%arg0: i32) -> (i32, i32) {
    %c0_i32 = arith.constant 0 : i32
    %c0_i32_0 = arith.constant 0 : i32
    %c0_i32_1 = arith.constant 0 : i32
    return %c0_i32, %c0_i32_0 : i32, i32
  }
  func.func @transform_9(%arg0: i32) -> (i32, i32) {
    %c0_i32 = arith.constant 0 : i32
    %c0_i32_0 = arith.constant 0 : i32
    %c0_i32_1 = arith.constant 0 : i32
    return %c0_i32, %c0_i32_0 : i32, i32
  }
  func.func @transform_10(%arg0: i32) -> (i32, i32) {
    %c0_i32 = arith.constant 0 : i32
    %c0_i32_0 = arith.constant 0 : i32
    %c0_i32_1 = arith.constant 0 : i32
    return %c0_i32, %c0_i32_0 : i32, i32
  }
  func.func @transform_11(%arg0: i32) -> (i32, i32) {
    %c0_i32 = arith.constant 0 : i32
    %c0_i32_0 = arith.constant 0 : i32
    %c0_i32_1 = arith.constant 0 : i32
    return %c0_i32, %c0_i32_0 : i32, i32
  }
  func.func @transform_12(%arg0: i32) -> (i32, i32) {
    %c0_i32 = arith.constant 0 : i32
    %c0_i32_0 = arith.constant 0 : i32
    %c0_i32_1 = arith.constant 0 : i32
    return %c0_i32, %c0_i32_0 : i32, i32
  }
  func.func @transform_13(%arg0: i32) -> (i32, i32) {
    %c0_i32 = arith.constant 0 : i32
    %c0_i32_0 = arith.constant 0 : i32
    %c0_i32_1 = arith.constant 0 : i32
    return %c0_i32, %c0_i32_0 : i32, i32
  }
  func.func @transform_14(%arg0: i32) -> (i32, i32) {
    %c0_i32 = arith.constant 0 : i32
    %c0_i32_0 = arith.constant 0 : i32
    %c0_i32_1 = arith.constant 0 : i32
    return %c0_i32, %c0_i32_0 : i32, i32
  }
  func.func @transform_15(%arg0: i32) -> (i32, i32) {
    %c0_i32 = arith.constant 0 : i32
    %c0_i32_0 = arith.constant 0 : i32
    %c0_i32_1 = arith.constant 0 : i32
    return %c0_i32, %c0_i32_0 : i32, i32
  }
  func.func @transform_16(%arg0: i32) -> (i32, i32) {
    %c0_i32 = arith.constant 0 : i32
    %c0_i32_0 = arith.constant 0 : i32
    %c0_i32_1 = arith.constant 0 : i32
    return %c0_i32, %c0_i32_0 : i32, i32
  }
  func.func @transform_17(%arg0: i32) -> (i32, i32) {
    %c0_i32 = arith.constant 0 : i32
    %c0_i32_0 = arith.constant 0 : i32
    %c0_i32_1 = arith.constant 0 : i32
    return %c0_i32, %c0_i32_0 : i32, i32
  }
  func.func @transform_18(%arg0: i32) -> (i32, i32) {
    %c0_i32 = arith.constant 0 : i32
    %c0_i32_0 = arith.constant 0 : i32
    %c0_i32_1 = arith.constant 0 : i32
    return %c0_i32, %c0_i32_0 : i32, i32
  }
  func.func @transform_19(%arg0: i32) -> (i32, i32) {
    %c0_i32 = arith.constant 0 : i32
    %c0_i32_0 = arith.constant 0 : i32
    %c0_i32_1 = arith.constant 0 : i32
    return %c0_i32, %c0_i32_0 : i32, i32
  }
}

</mosaic_0001>

<bundles_post_ra>
// kernel: forward.1
= control target key start
LH: loop header
LB: loop body
LE: loop exit
PB: predicated region body
PF: predicated region fallthrough
CT: control target
= control target key end

     0   :  { %vm133_vm0 = vcmask 1043456   ;;  %v4176_v0 = vmov 0   ;;  %vm84_vm1 = vcmask 97280   ;;  %s4177_s30 = smov 48   ;;  %s4179_s21 = smov 16   ;;  %vm523_vm2 = vcmask 261120   ;;  %s6835_s2 = inlined_call_operand.vmem [shape: f32[12,12], index: 2, kind: input, shape index: {}]   ;;  %s6836_s1 = inlined_call_operand.vmem [shape: f32[128,1], index: 1, kind: input, shape index: {}]   ;;  %s6837_s0 = inlined_call_operand.vmem [shape: f32[128,12], index: 0, kind: input, shape index: {}]   ;;  %s6838_s3 = inlined_call_operand.vmem [shape: f32[1,12], index: 3, kind: input, shape index: {}]   ;;  %s6839_s7 = inlined_call_operand.vmem [shape: f32[64,64], index: 7, kind: input, shape index: {}]   ;;  %s6840_s8 = inlined_call_operand.vmem [shape: f32[1,64], index: 8, kind: input, shape index: {}]   ;;  %s6841_s5 = inlined_call_operand.vmem [shape: f32[128,64], index: 5, kind: input, shape index: {}]   ;;  %s6842_s9 = inlined_call_operand.vmem [shape: f32[64,192], index: 9, kind: input, shape index: {}]   ;;  %s6843_s4 = inlined_call_operand.vmem [shape: f32[8,128,64], index: 4, kind: input, shape index: {}]   ;;  %s6844_s10 = inlined_call_operand.vmem [shape: f32[1,192], index: 10, kind: input, shape index: {}]   ;;  %s6845_s6 = inlined_call_operand.vmem [shape: f32[128,128], index: 6, kind: input, shape index: {}]   ;;  %s6846_s11 = inlined_call_operand.vmem [shape: f32[64,64], index: 11, kind: input, shape index: {}]   ;;  %s6847_s12 = inlined_call_operand.vmem [shape: f32[1,64], index: 12, kind: input, shape index: {}]   ;;  %s6848_s13 = inlined_call_operand.vmem [shape: f32[64,256], index: 13, kind: input, shape index: {}]   ;;  %s6849_s15 = inlined_call_operand.vmem [shape: f32[256,64], index: 15, kind: input, shape index: {}]   ;;  %s6850_s14 = inlined_call_operand.vmem [shape: f32[1,256], index: 14, kind: input, shape index: {}]   ;;  %s6851_s16 = inlined_call_operand.vmem [shape: f32[1,64], index: 16, kind: input, shape index: {}]   ;;  %s6852_s17 = inlined_call_operand.vmem [shape: f32[64,128], index: 17, kind: input, shape index: {}]   ;;  %s6853_s18 = inlined_call_operand.vmem [shape: f32[1,128], index: 18, kind: input, shape index: {}]   ;;  %s6854_s19 = inlined_call_operand.vmem [shape: f32[128,128], index: 19, kind: output, shape index: {}]  }
   0x1   :  { %6858 = sst [smem:[#allocation2_spill]] %s6835_s2  ;;  %3910 = vset.pattern.permute.xlu0 %v4176_v0  ;;  %3911 = vset.pattern.permute.xlu1 %v4176_v0  ;;  %vm506_vm3 = vcmask 130048   ;;  %vm540_vm4 = vcmask 392192   ;;  %vm601_vm5 = vcmask 523264  }
   0x2   :  { %6859 = sst [smem:[#allocation3_spill]] %s6836_s1  ;;  %3912 = vset.pattern.permute.xlu2 %v4176_v0 }
   0x3   :  { %6860 = sst [smem:[#allocation4_spill]] %s6837_s0 }
   0x4   :  { %6861 = sst [smem:[#allocation5_spill]] %s6838_s3 }
   0x5   :  { %s6862_s20 = sld [smem:[#allocation2_spill]] }
   0x6   :  { %s6863_s22 = sld [smem:[#allocation3_spill]] }
   0x7   :  { %s6864_s3 = sld [smem:[#allocation4_spill]] }
   0x8   :  { %s6865_s28 = sld [smem:[#allocation5_spill]] }
   0xb   :  { %v79_v1 = vld [vmem:[%s6862_s20 + $0x8] sm:$0xf]  ;;  %v78_v3 = vld [vmem:[%s6862_s20] sm:$0xff]  ;;  %s4178_s20 = smov 32  }
   0xc   :  { %v218_v2 = vld [vmem:[%s6863_s22] sm:$0xff]  ;;  %3631 = vmatpush.msk.msra.mxu0 %vm133_vm0, %v79_v1  ;;  %v220_v5 = vld [vmem:[%s6863_s22 + $0x10] sm:$0xff]  ;;  %v219_v6 = vld [vmem:[%s6863_s22 + $0x8] sm:$0xff] }
   0xd   :  { %236 = vperm.xlu0 %3910, %v218_v2   ;;  %v62_v4 = vld [vmem:[%s6864_s3] sm:$0xff]  ;;  %246 = vperm.xlu1 %3911, %v220_v5   ;;  %v221_v7 = vld [vmem:[%s6863_s22 + $0x18] sm:$0xff]  ;;  %v63_v8 = vld [vmem:[%s6864_s3 + $0x8] sm:$0xff] }
   0xe   :  { %152 = vmatpush.msra.mxu0 %v78_v3  ;;  %v224_v9 = vld [vmem:[%s6863_s22 + $0x30] sm:$0xff]  ;;  %v225_v10 = vld [vmem:[%s6863_s22 + $0x38] sm:$0xff]  ;;  %v227_v12 = vld [vmem:[%s6863_s22 + $0x48] sm:$0xff] }
   0xf   :  { %3632 = vmatmul.msk.f32.vlgmr.msra.gmra.mxu0 %vm84_vm1, %v62_v4  ;;  %v64_v11 = vld [vmem:[%s6864_s3 + $0x10] sm:$0xff]  ;;  %v65_v14 = vld [vmem:[%s6864_s3 + $0x18] sm:$0xff]  ;;  %v222_v15 = vld [vmem:[%s6863_s22 + $0x20] sm:$0xff] }
  0x10   :  { %v228_v13 = vld [vmem:[%s6863_s22 + $0x50] sm:$0xff]  ;;  %256 = vperm.xlu2 %3912, %v222_v15   ;;  %v230_v16 = vld [vmem:[%s6863_s22 + $0x60] sm:$0xff]  ;;  %v231_v17 = vld [vmem:[%s6863_s22 + $0x68] sm:$0xff] }
  0x11   :  { %v66_v18 = vld [vmem:[%s6864_s3 + $0x20] sm:$0xff]  ;;  %v223_v19 = vld [vmem:[%s6863_s22 + $0x28] sm:$0xff]  ;;  %v68_v22 = vld [vmem:[%s6864_s3 + $0x30] sm:$0xff] }
  0x12   :  { %v67_v20 = vld [vmem:[%s6864_s3 + $0x28] sm:$0xff]  ;;  %v226_v21 = vld [vmem:[%s6863_s22 + $0x40] sm:$0xff]  ;;  %v229_v23 = vld [vmem:[%s6863_s22 + $0x58] sm:$0xff] }
  0x13   :  { %v69_v24 = vld [vmem:[%s6864_s3 + $0x38] sm:$0xff]  ;;  %v70_v25 = vld [vmem:[%s6864_s3 + $0x40] sm:$0xff]  ;;  %v71_v26 = vld [vmem:[%s6864_s3 + $0x48] sm:$0xff] }
  0x14   :  { %v72_v27 = vld [vmem:[%s6864_s3 + $0x50] sm:$0xff]  ;;  %v73_v28 = vld [vmem:[%s6864_s3 + $0x58] sm:$0xff]  ;;  %v74_v29 = vld [vmem:[%s6864_s3 + $0x60] sm:$0xff] }
  0x15   :  { %241 = vperm.xlu0 %3910, %v219_v6   ;;  %251 = vperm.xlu1 %3911, %v221_v7   ;;  %v75_v30 = vld [vmem:[%s6864_s3 + $0x68] sm:$0xff]  ;;  %v4389_v31 = vld [vmem:[%s6865_s28] ss:$0 sm:$0xff]  ;;  %v76_v38 = vld [vmem:[%s6864_s3 + $0x70] sm:$0xff] }
  0x16   :  { %v77_v63 = vld [vmem:[%s6864_s3 + $0x78] sm:$0xff] }
  0x17   :  { %3633 = vmatmul.msk.f32.gmra.mxu0 %vm84_vm1, %v63_v8 }
  0x18   :  { %261 = vperm.xlu2 %3912, %v223_v19  }
  0x1d   :  { %266 = vperm.xlu0 %3910, %v224_v9   ;;  %271 = vperm.xlu1 %3911, %v225_v10  }
  0x1f   :  { %3634 = vmatmul.msk.f32.gmra.mxu0 %vm84_vm1, %v64_v11 }
  0x20   :  { %276 = vperm.xlu2 %3912, %v226_v21  }
  0x25   :  { %281 = vperm.xlu0 %3910, %v227_v12   ;;  %286 = vperm.xlu1 %3911, %v228_v13  }
  0x27   :  { %3635 = vmatmul.msk.f32.gmra.mxu0 %vm84_vm1, %v65_v14 }
  0x28   :  { %291 = vperm.xlu2 %3912, %v229_v23  }
  0x2d   :  { %296 = vperm.xlu0 %3910, %v230_v16   ;;  %301 = vperm.xlu1 %3911, %v231_v17  }
  0x2f   :  { %3636 = vmatmul.msk.f32.gmra.mxu0 %vm84_vm1, %v66_v18 }
  0x37   :  { %3637 = vmatmul.msk.f32.gmra.mxu0 %vm84_vm1, %v67_v20 }
  0x3f   :  { %3638 = vmatmul.msk.f32.gmra.mxu0 %vm84_vm1, %v68_v22 }
  0x47   :  { %3639 = vmatmul.msk.f32.gmra.mxu0 %vm84_vm1, %v69_v24 }
  0x4f   :  { %3640 = vmatmul.msk.f32.gmra.mxu0 %vm84_vm1, %v70_v25 }
  0x57   :  { %3641 = vmatmul.msk.f32.gmra.mxu0 %vm84_vm1, %v71_v26 }
  0x5f   :  { %3642 = vmatmul.msk.f32.gmra.mxu0 %vm84_vm1, %v72_v27 }
  0x67   :  { %3643 = vmatmul.msk.f32.gmra.mxu0 %vm84_vm1, %v73_v28 }
  0x6a   :  { %v257_v59 = vpop.permute.xlu2 %256 }
  0x6f   :  { %3644 = vmatmul.msk.f32.gmra.mxu0 %vm84_vm1, %v74_v29 }
  0x72   :  { %v262_v4 = vpop.permute.xlu2 %261 }
  0x77   :  { %3645 = vmatmul.msk.f32.gmra.mxu0 %vm84_vm1, %v75_v30  ;;  %v232_v30 = vld [vmem:[%s6863_s22 + $0x70] sm:$0xff] }
  0x7a   :  { %v277_v22 = vpop.permute.xlu2 %276 }
  0x7f   :  { %v237_v34 = vpop.permute.xlu0 %236  ;;  %3646 = vmatmul.msk.f32.gmra.mxu0 %vm84_vm1, %v76_v38  ;;  %v247_v47 = vpop.permute.xlu1 %246 }
  0x87   :  { %v242_v43 = vpop.permute.xlu0 %241  ;;  %v252_v55 = vpop.permute.xlu1 %251  ;;  %3647 = vmatmul.msk.f32.gmra.mxu0 %vm84_vm1, %v77_v63 }
  0x8c   :  { %v154_v32 = vpop.f32.mrf.mxu0 }
  0x8d   :  { %v155_v33 = vadd.f32 %v4389_v31, %v154_v32 }
  0x8f   :  { %3918 = vtanh.f32 %v155_v33  ;;  %v267_v10 = vpop.permute.xlu0 %266  ;;  %v272_v16 = vpop.permute.xlu1 %271 }
  0x94   :  { %v157_v35 = vpop.f32.mrf.mxu0 }
  0x95   :  { %v3919_v36 = vpop.eup %3918  ;;  %v158_v37 = vadd.f32 %v4389_v31, %v157_v35 }
  0x96   :  { %v314_v39 = vmul.f32 %v3919_v36, %v237_v34  ;;  %v596_v34 = vld [vmem:[%s6839_s7 + $0x38] sm:$0xff]  ;;  %v595_v36 = vld [vmem:[%s6839_s7 + $0x30] sm:$0xff] }
  0x97   :  { %3920 = vtanh.f32 %v158_v37  ;;  %v282_v28 = vpop.permute.xlu0 %281  ;;  %658 = vmatpush.msra.mxu1 %v596_v34  ;;  %v594_v37 = vld [vmem:[%s6839_s7 + $0x28] sm:$0xff] }
  0x98   :  { %v4398_v40 = vsel %vm84_vm1, %v314_v39, 1.0  ;;  %v287_v39 = vpop.permute.xlu1 %286 }
  0x99   :  { %458 = vrot.lane.b32.xlu2 %v4398_v40, %s4177_s30  ;;  %410 = vrot.lane.b32.xlu1 %v4398_v40, %s4178_s20 }
  0x9a   :  { %362 = vrot.lane.b32.xlu0 %v4398_v40, %s4179_s21  ;;  %659 = vmatpush.msra.mxu1 %v595_v36 }
  0x9c   :  { %v160_v41 = vpop.f32.mrf.mxu0  ;;  %660 = vmatpush.msra.mxu1 %v594_v37 }
  0x9d   :  { %v3921_v42 = vpop.eup %3920  ;;  %v161_v44 = vadd.f32 %v4389_v31, %v160_v41 }
  0x9e   :  { %v315_v45 = vmul.f32 %v3921_v42, %v242_v43  ;;  %v233_v43 = vld [vmem:[%s6863_s22 + $0x78] sm:$0xff]  ;;  %s4181_s22 = smov 64  }
  0x9f   :  { %3922 = vtanh.f32 %v161_v44  ;;  %v593_v44 = vld [vmem:[%s6839_s7 + $0x20] sm:$0xff] }
  0xa0   :  { %v4408_v46 = vsel %vm84_vm1, %v315_v45, 1.0  ;;  %661 = vmatpush.msra.mxu1 %v593_v44 }
  0xa1   :  { %412 = vrot.lane.b32.xlu2 %v4408_v46, %s4178_s20  ;;  %364 = vrot.lane.b32.xlu1 %v4408_v46, %s4179_s21 }
  0xa2   :  { %460 = vrot.lane.b32.xlu0 %v4408_v46, %s4177_s30 }
  0xa4   :  { %v163_v48 = vpop.f32.mrf.mxu0 }
  0xa5   :  { %v3923_v49 = vpop.eup %3922  ;;  %v164_v50 = vadd.f32 %v4389_v31, %v163_v48  ;;  %v292_v48 = vpop.permute.xlu2 %291 }
  0xa6   :  { %v316_v51 = vmul.f32 %v3923_v49, %v247_v47  ;;  %v592_v47 = vld [vmem:[%s6839_s7 + $0x18] sm:$0xff] }
  0xa7   :  { %3924 = vtanh.f32 %v164_v50  ;;  %662 = vmatpush.msra.mxu1 %v592_v47  ;;  %v591_v50 = vld [vmem:[%s6839_s7 + $0x10] sm:$0xff] }
  0xa8   :  { %v4418_v52 = vsel %vm84_vm1, %v316_v51, 1.0 }
  0xa9   :  { %366 = vrot.lane.b32.xlu2 %v4418_v52, %s4179_s21  ;;  %462 = vrot.lane.b32.xlu1 %v4418_v52, %s4177_s30 }
  0xaa   :  { %414 = vrot.lane.b32.xlu0 %v4418_v52, %s4178_s20  ;;  %663 = vmatpush.msra.mxu1 %v591_v50 }
  0xac   :  { %v166_v53 = vpop.f32.mrf.mxu0 }
  0xad   :  { %v3925_v54 = vpop.eup %3924  ;;  %v167_v56 = vadd.f32 %v4389_v31, %v166_v53 }
  0xae   :  { %v317_v57 = vmul.f32 %v3925_v54, %v252_v55  ;;  %v590_v55 = vld [vmem:[%s6839_s7 + $0x8] sm:$0xff] }
  0xaf   :  { %3926 = vtanh.f32 %v167_v56  ;;  %v589_v56 = vld [vmem:[%s6839_s7] sm:$0xff]  ;;  %664 = vmatpush.msra.mxu1 %v590_v55 }
  0xb0   :  { %v4428_v58 = vsel %vm84_vm1, %v317_v57, 1.0 }
  0xb1   :  { %464 = vrot.lane.b32.xlu2 %v4428_v58, %s4177_s30  ;;  %416 = vrot.lane.b32.xlu1 %v4428_v58, %s4178_s20 }
  0xb2   :  { %368 = vrot.lane.b32.xlu0 %v4428_v58, %s4179_s21  ;;  %665 = vmatpush.msra.mxu1 %v589_v56 }
  0xb4   :  { %v169_v60 = vpop.f32.mrf.mxu0 }
  0xb5   :  { %v3927_v61 = vpop.eup %3926  ;;  %v170_v62 = vadd.f32 %v4389_v31, %v169_v60 }
  0xb6   :  { %v318_v0 = vmul.f32 %v3927_v61, %v257_v59 }
  0xb7   :  { %3928 = vtanh.f32 %v170_v62  ;;  %v297_v62 = vpop.permute.xlu0 %296 }
  0xb8   :  { %v4442_v1 = vsel %vm84_vm1, %v318_v0, 1.0 }
  0xb9   :  { %418 = vrot.lane.b32.xlu2 %v4442_v1, %s4178_s20  ;;  %370 = vrot.lane.b32.xlu1 %v4442_v1, %s4179_s21 }
  0xba   :  { %466 = vrot.lane.b32.xlu0 %v4442_v1, %s4177_s30 }
  0xbc   :  { %v172_v2 = vpop.f32.mrf.mxu0 }
  0xbd   :  { %v3929_v3 = vpop.eup %3928  ;;  %v173_v5 = vadd.f32 %v4389_v31, %v172_v2 }
  0xbe   :  { %v319_v6 = vmul.f32 %v3929_v3, %v262_v4 }
  0xbf   :  { %3930 = vtanh.f32 %v173_v5  ;;  %v302_v5 = vpop.permute.xlu1 %301 }
  0xc0   :  { %v4452_v7 = vsel %vm84_vm1, %v319_v6, 1.0 }
  0xc1   :  { %372 = vrot.lane.b32.xlu2 %v4452_v7, %s4179_s21  ;;  %468 = vrot.lane.b32.xlu1 %v4452_v7, %s4177_s30 }
  0xc2   :  { %420 = vrot.lane.b32.xlu0 %v4452_v7, %s4178_s20 }
  0xc4   :  { %v175_v8 = vpop.f32.mrf.mxu0 }
  0xc5   :  { %v3931_v9 = vpop.eup %3930  ;;  %v176_v11 = vadd.f32 %v4389_v31, %v175_v8 }
  0xc6   :  { %v320_v12 = vmul.f32 %v3931_v9, %v267_v10 }
  0xc7   :  { %3932 = vtanh.f32 %v176_v11 }
  0xc8   :  { %v4462_v13 = vsel %vm84_vm1, %v320_v12, 1.0 }
  0xc9   :  { %470 = vrot.lane.b32.xlu2 %v4462_v13, %s4177_s30  ;;  %422 = vrot.lane.b32.xlu1 %v4462_v13, %s4178_s20 }
  0xca   :  { %374 = vrot.lane.b32.xlu0 %v4462_v13, %s4179_s21 }
  0xcc   :  { %v178_v14 = vpop.f32.mrf.mxu0 }
  0xcd   :  { %v3933_v15 = vpop.eup %3932  ;;  %v179_v17 = vadd.f32 %v4389_v31, %v178_v14 }
  0xce   :  { %v321_v18 = vmul.f32 %v3933_v15, %v272_v16  ;;  %v557_v15 = vld [vmem:[%s6841_s5] sm:$0xff] }
  0xcf   :  { %3934 = vtanh.f32 %v179_v17 }
  0xd0   :  { %v4472_v19 = vsel %vm84_vm1, %v321_v18, 1.0 }
  0xd1   :  { %424 = vrot.lane.b32.xlu2 %v4472_v19, %s4178_s20  ;;  %376 = vrot.lane.b32.xlu1 %v4472_v19, %s4179_s21 }
  0xd2   :  { %472 = vrot.lane.b32.xlu0 %v4472_v19, %s4177_s30 }
  0xd4   :  { %v181_v20 = vpop.f32.mrf.mxu0 }
  0xd5   :  { %v3935_v21 = vpop.eup %3934  ;;  %v182_v23 = vadd.f32 %v4389_v31, %v181_v20 }
  0xd6   :  { %v322_v24 = vmul.f32 %v3935_v21, %v277_v22 }
  0xd7   :  { %3936 = vtanh.f32 %v182_v23 }
  0xd8   :  { %v4482_v25 = vsel %vm84_vm1, %v322_v24, 1.0 }
  0xd9   :  { %378 = vrot.lane.b32.xlu2 %v4482_v25, %s4179_s21  ;;  %474 = vrot.lane.b32.xlu1 %v4482_v25, %s4177_s30 }
  0xda   :  { %426 = vrot.lane.b32.xlu0 %v4482_v25, %s4178_s20 }
  0xdc   :  { %v184_v26 = vpop.f32.mrf.mxu0 }
  0xdd   :  { %v3937_v27 = vpop.eup %3936  ;;  %v185_v29 = vadd.f32 %v4389_v31, %v184_v26 }
  0xde   :  { %v323_v32 = vmul.f32 %v3937_v27, %v282_v28 }
  0xdf   :  { %3938 = vtanh.f32 %v185_v29 }
  0xe0   :  { %v4495_v33 = vsel %vm84_vm1, %v323_v32, 1.0 }
  0xe1   :  { %306 = vperm.xlu2 %3912, %v232_v30   ;;  %428 = vrot.lane.b32.xlu1 %v4495_v33, %s4178_s20 }
  0xe2   :  { %380 = vrot.lane.b32.xlu0 %v4495_v33, %s4179_s21 }
  0xe4   :  { %v187_v35 = vpop.f32.mrf.mxu0 }
  0xe5   :  { %v3939_v38 = vpop.eup %3938  ;;  %v188_v41 = vadd.f32 %v4389_v31, %v187_v35 }
  0xe6   :  { %v324_v42 = vmul.f32 %v3939_v38, %v287_v39 }
  0xe7   :  { %3940 = vtanh.f32 %v188_v41 }
  0xe8   :  { %v4518_v45 = vsel %vm84_vm1, %v324_v42, 1.0 }
  0xe9   :  { %476 = vrot.lane.b32.xlu2 %v4495_v33, %s4177_s30  ;;  %382 = vrot.lane.b32.xlu1 %v4518_v45, %s4179_s21 }
  0xea   :  { %311 = vperm.xlu0 %3910, %v233_v43  }
  0xec   :  { %v190_v49 = vpop.f32.mrf.mxu0 }
  0xed   :  { %v3941_v51 = vpop.eup %3940  ;;  %v191_v53 = vadd.f32 %v4389_v31, %v190_v49 }
  0xee   :  { %v325_v54 = vmul.f32 %v3941_v51, %v292_v48 }
  0xef   :  { %3942 = vtanh.f32 %v191_v53 }
  0xf0   :  { %v4538_v57 = vsel %vm84_vm1, %v325_v54, 1.0 }
  0xf1   :  { %430 = vrot.lane.b32.xlu2 %v4518_v45, %s4178_s20  ;;  %384 = vrot.lane.b32.xlu1 %v4538_v57, %s4179_s21 }
  0xf2   :  { %478 = vrot.lane.b32.xlu0 %v4518_v45, %s4177_s30 }
  0xf3   :  { %v459_v59 = vpop.permute.xlu2 %458 }
  0xf4   :  { %v193_v60 = vpop.f32.mrf.mxu0 }
  0xf5   :  { %v3943_v61 = vpop.eup %3942  ;;  %v194_v63 = vadd.f32 %v4389_v31, %v193_v60 }
  0xf6   :  { %v326_v0 = vmul.f32 %v3943_v61, %v297_v62  ;;  %v562_v62 = vld [vmem:[%s6841_s5 + $0x28] sm:$0xff] }
  0xf7   :  { %3944 = vtanh.f32 %v194_v63 }
  0xf8   :  { %v4548_v2 = vsel %vm84_vm1, %v326_v0, 1.0 }
  0xf9   :  { %432 = vrot.lane.b32.xlu2 %v4538_v57, %s4178_s20  ;;  %386 = vrot.lane.b32.xlu1 %v4548_v2, %s4179_s21 }
  0xfa   :  { %480 = vrot.lane.b32.xlu0 %v4538_v57, %s4177_s30 }
  0xfb   :  { %v413_v3 = vpop.permute.xlu2 %412 }
  0xfc   :  { %v196_v51 = vpop.f32.mrf.mxu0 }
  0xfd   :  { %v3945_v4 = vpop.eup %3944  ;;  %v197_v56 = vadd.f32 %v4389_v31, %v196_v51 }
  0xfe   :  { %v327_v6 = vmul.f32 %v3945_v4, %v302_v5 }
  0xff   :  { %3946 = vtanh.f32 %v197_v56 }
 0x100   :  { %v4557_v8 = vsel %vm84_vm1, %v327_v6, 1.0 }
 0x101   :  { %434 = vrot.lane.b32.xlu2 %v4548_v2, %s4178_s20  ;;  %388 = vrot.lane.b32.xlu1 %v4557_v8, %s4179_s21 }
 0x102   :  { %482 = vrot.lane.b32.xlu0 %v4548_v2, %s4177_s30 }
 0x103   :  { %v367_v9 = vpop.permute.xlu2 %366 }
 0x104   :  { %v509_v30 = vsel %vm506_vm3, %v4418_v52, %v367_v9  ;;  %v560_v52 = vld [vmem:[%s6841_s5 + $0x18] sm:$0xff] }
 0x105   :  { %v3947_v4 = vpop.eup %3946 }
 0x109   :  { %436 = vrot.lane.b32.xlu2 %v4557_v8, %s4178_s20 }
 0x10a   :  { %484 = vrot.lane.b32.xlu0 %v4557_v8, %s4177_s30 }
 0x10b   :  { %v465_v10 = vpop.permute.xlu2 %464  ;;  %v411_v11 = vpop.permute.xlu1 %410 }
 0x10c   :  { %v363_v12 = vpop.permute.xlu0 %362 }
 0x10d   :  { %v507_v14 = vsel %vm506_vm3, %v4398_v40, %v363_v12  ;;  %v558_v40 = vld [vmem:[%s6841_s5 + $0x8] sm:$0xff] }
 0x10e   :  { %v524_v16 = vsel %vm523_vm2, %v507_v14, %v411_v11  ;;  %v563_v11 = vld [vmem:[%s6841_s5 + $0x30] sm:$0xff] }
 0x10f   :  { %v541_v17 = vsel %vm540_vm4, %v524_v16, %v459_v59 }
 0x110   :  { %v573_v18 = vmul.f32 %v557_v15, %v541_v17 }
 0x112   :  { %3648 = vmatmul.msk.f32.vlgmr.msra.gmra.mxu1 %vm601_vm5, %v573_v18  ;;  %v564_v18 = vld [vmem:[%s6841_s5 + $0x38] sm:$0xff] }
 0x113   :  { %v419_v20 = vpop.permute.xlu2 %418  ;;  %v365_v21 = vpop.permute.xlu1 %364 }
 0x114   :  { %v508_v22 = vsel %vm506_vm3, %v4408_v46, %v365_v21  ;;  %v461_v23 = vpop.permute.xlu0 %460  ;;  %v559_v46 = vld [vmem:[%s6841_s5 + $0x10] sm:$0xff] }
 0x115   :  { %v525_v24 = vsel %vm523_vm2, %v508_v22, %v413_v3 }
 0x116   :  { %v542_v26 = vsel %vm540_vm4, %v525_v24, %v461_v23 }
 0x117   :  { %v574_v27 = vmul.f32 %v558_v40, %v542_v26 }
 0x11a   :  { %3649 = vmatmul.msk.f32.gmra.mxu1 %vm601_vm5, %v574_v27 }
 0x11b   :  { %v373_v28 = vpop.permute.xlu2 %372  ;;  %v463_v29 = vpop.permute.xlu1 %462 }
 0x11c   :  { %v415_v32 = vpop.permute.xlu0 %414 }
 0x11d   :  { %v526_v34 = vsel %vm523_vm2, %v509_v30, %v415_v32 }
 0x11e   :  { %v543_v35 = vsel %vm540_vm4, %v526_v34, %v463_v29 }
 0x11f   :  { %v575_v36 = vmul.f32 %v559_v46, %v543_v35 }
 0x122   :  { %3650 = vmatmul.msk.f32.gmra.mxu1 %vm601_vm5, %v575_v36  ;;  %v566_v36 = vld [vmem:[%s6841_s5 + $0x48] sm:$0xff] }
 0x123   :  { %v471_v37 = vpop.permute.xlu2 %470  ;;  %v417_v38 = vpop.permute.xlu1 %416 }
 0x124   :  { %v369_v39 = vpop.permute.xlu0 %368 }
 0x125   :  { %v510_v41 = vsel %vm506_vm3, %v4428_v58, %v369_v39  ;;  %v561_v58 = vld [vmem:[%s6841_s5 + $0x20] sm:$0xff] }
 0x126   :  { %v527_v42 = vsel %vm523_vm2, %v510_v41, %v417_v38 }
 0x127   :  { %v544_v43 = vsel %vm540_vm4, %v527_v42, %v465_v10 }
 0x128   :  { %v576_v44 = vmul.f32 %v560_v52, %v544_v43 }
 0x12a   :  { %3651 = vmatmul.msk.f32.gmra.mxu1 %vm601_vm5, %v576_v44 }
 0x12b   :  { %v425_v47 = vpop.permute.xlu2 %424  ;;  %v371_v48 = vpop.permute.xlu1 %370 }
 0x12c   :  { %v511_v49 = vsel %vm506_vm3, %v4442_v1, %v371_v48  ;;  %v467_v50 = vpop.permute.xlu0 %466  ;;  %v512_v1 = vsel %vm506_vm3, %v4452_v7, %v373_v28  ;;  %v199_v28 = vpop.f32.mrf.mxu0  ;;  %v567_v48 = vld [vmem:[%s6841_s5 + $0x50] sm:$0xff] }
 0x12d   :  { %v528_v53 = vsel %vm523_vm2, %v511_v49, %v419_v20  ;;  %v200_v32 = vadd.f32 %v4389_v31, %v199_v28 }
 0x12e   :  { %v545_v54 = vsel %vm540_vm4, %v528_v53, %v467_v50 }
 0x12f   :  { %v577_v55 = vmul.f32 %v561_v58, %v545_v54  ;;  %3948 = vtanh.f32 %v200_v32  ;;  %v568_v54 = vld [vmem:[%s6841_s5 + $0x58] sm:$0xff]  ;;  %v571_v32 = vld [vmem:[%s6841_s5 + $0x70] sm:$0xff] }
 0x132   :  { %3652 = vmatmul.msk.f32.gmra.mxu1 %vm601_vm5, %v577_v55 }
 0x133   :  { %v379_v59 = vpop.permute.xlu2 %378  ;;  %v469_v60 = vpop.permute.xlu1 %468 }
 0x134   :  { %v421_v61 = vpop.permute.xlu0 %420  ;;  %v515_v24 = vsel %vm506_vm3, %v4482_v25, %v379_v59 }
 0x135   :  { %v529_v63 = vsel %vm523_vm2, %v512_v1, %v421_v61  ;;  %v3949_v41 = vpop.eup %3948 }
 0x136   :  { %v546_v0 = vsel %vm540_vm4, %v529_v63, %v469_v60 }
 0x137   :  { %v578_v3 = vmul.f32 %v562_v62, %v546_v0 }
 0x13a   :  { %3653 = vmatmul.msk.f32.gmra.mxu1 %vm601_vm5, %v578_v3 }
 0x13b   :  { %v307_v5 = vpop.permute.xlu2 %306  ;;  %v423_v6 = vpop.permute.xlu1 %422 }
 0x13c   :  { %v328_v9 = vmul.f32 %v3947_v4, %v307_v5  ;;  %v375_v10 = vpop.permute.xlu0 %374 }
 0x13d   :  { %v513_v7 = vsel %vm506_vm3, %v4462_v13, %v375_v10 }
 0x13e   :  { %v530_v12 = vsel %vm523_vm2, %v513_v7, %v423_v6  ;;  %v4625_v14 = vsel %vm84_vm1, %v328_v9, 1.0 }
 0x13f   :  { %438 = vrot.lane.b32.xlu2 %v4625_v14, %s4178_s20  ;;  %390 = vrot.lane.b32.xlu1 %v4625_v14, %s4179_s21  ;;  %v547_v15 = vsel %vm540_vm4, %v530_v12, %v471_v37 }
 0x140   :  { %486 = vrot.lane.b32.xlu0 %v4625_v14, %s4177_s30  ;;  %v579_v13 = vmul.f32 %v563_v11, %v547_v15  ;;  %v4704_v15 = vld [vmem:[%s6840_s8] ss:$0 sm:$0xff] }
 0x142   :  { %3654 = vmatmul.msk.f32.gmra.mxu1 %vm601_vm5, %v579_v13 }
 0x143   :  { %v377_v16 = vpop.permute.xlu1 %376  ;;  %v477_v46 = vpop.permute.xlu2 %476 }
 0x144   :  { %v514_v17 = vsel %vm506_vm3, %v4472_v19, %v377_v16  ;;  %v473_v20 = vpop.permute.xlu0 %472  ;;  %v565_v19 = vld [vmem:[%s6841_s5 + $0x40] sm:$0xff] }
 0x145   :  { %v531_v21 = vsel %vm523_vm2, %v514_v17, %v425_v47 }
 0x146   :  { %v548_v22 = vsel %vm540_vm4, %v531_v21, %v473_v20 }
 0x147   :  { %v580_v40 = vmul.f32 %v564_v18, %v548_v22 }
 0x14a   :  { %3655 = vmatmul.msk.f32.gmra.mxu1 %vm601_vm5, %v580_v40 }
 0x14b   :  { %v475_v23 = vpop.permute.xlu1 %474  ;;  %v431_v42 = vpop.permute.xlu2 %430 }
 0x14c   :  { %v427_v26 = vpop.permute.xlu0 %426 }
 0x14d   :  { %v532_v27 = vsel %vm523_vm2, %v515_v24, %v427_v26 }
 0x14e   :  { %v549_v29 = vsel %vm540_vm4, %v532_v27, %v475_v23 }
 0x14f   :  { %v581_v30 = vmul.f32 %v565_v19, %v549_v29 }
 0x152   :  { %3656 = vmatmul.msk.f32.gmra.mxu1 %vm601_vm5, %v581_v30 }
 0x153   :  { %v429_v34 = vpop.permute.xlu1 %428  ;;  %v433_v53 = vpop.permute.xlu2 %432 }
 0x154   :  { %v381_v35 = vpop.permute.xlu0 %380 }
 0x155   :  { %v516_v25 = vsel %vm506_vm3, %v4495_v33, %v381_v35 }
 0x156   :  { %v533_v37 = vsel %vm523_vm2, %v516_v25, %v429_v34 }
 0x157   :  { %v550_v38 = vsel %vm540_vm4, %v533_v37, %v477_v46 }
 0x158   :  { %v582_v39 = vmul.f32 %v566_v36, %v550_v38 }
 0x15a   :  { %3657 = vmatmul.msk.f32.gmra.mxu1 %vm601_vm5, %v582_v39 }
 0x15b   :  { %v383_v31 = vpop.permute.xlu1 %382  ;;  %v435_v61 = vpop.permute.xlu2 %434 }
 0x15c   :  { %v312_v52 = vpop.permute.xlu0 %311  ;;  %v517_v33 = vsel %vm506_vm3, %v4518_v45, %v383_v31 }
 0x15d   :  { %v329_v43 = vmul.f32 %v3949_v41, %v312_v52  ;;  %v534_v49 = vsel %vm523_vm2, %v517_v33, %v431_v42  ;;  %v572_v33 = vld [vmem:[%s6841_s5 + $0x78] sm:$0xff] }
 0x15f   :  { %v4661_v44 = vsel %vm84_vm1, %v329_v43, 1.0 }
 0x160   :  { %488 = vrot.lane.b32.xlu0 %v4661_v44, %s4177_s30  ;;  %440 = vrot.lane.b32.xlu2 %v4661_v44, %s4178_s20 }
 0x161   :  { %392 = vrot.lane.b32.xlu1 %v4661_v44, %s4179_s21 }
 0x163   :  { %v385_v47 = vpop.permute.xlu1 %384  ;;  %v437_v9 = vpop.permute.xlu2 %436 }
 0x164   :  { %v479_v58 = vpop.permute.xlu0 %478  ;;  %v518_v45 = vsel %vm506_vm3, %v4538_v57, %v385_v47  ;;  %v569_v57 = vld [vmem:[%s6841_s5 + $0x60] sm:$0xff] }
 0x165   :  { %v551_v50 = vsel %vm540_vm4, %v534_v49, %v479_v58  ;;  %v535_v56 = vsel %vm523_vm2, %v518_v45, %v433_v53 }
 0x166   :  { %v583_v51 = vmul.f32 %v567_v48, %v551_v50  ;;  %v4180_v50 = vmov 64.0  }
 0x167   :  { %3950 = vrcp.f32 %v4180_v50 }
 0x168   :  { %3658 = vmatmul.msk.f32.gmra.mxu1 %vm601_vm5, %v583_v51 }
 0x16b   :  { %v387_v55 = vpop.permute.xlu1 %386 }
 0x16c   :  { %v481_v59 = vpop.permute.xlu0 %480  ;;  %v519_v62 = vsel %vm506_vm3, %v4548_v2, %v387_v55  ;;  %v570_v2 = vld [vmem:[%s6841_s5 + $0x68] sm:$0xff] }
 0x16d   :  { %v552_v60 = vsel %vm540_vm4, %v535_v56, %v481_v59  ;;  %v536_v63 = vsel %vm523_vm2, %v519_v62, %v435_v61  ;;  %v3951_v51 = vpop.eup %3950 }
 0x16e   :  { %v584_v1 = vmul.f32 %v568_v54, %v552_v60  ;;  %v899_v53 = vmul.f32 64.0, %v3951_v51  ;;  %vm903_vm6 = vweird.f32 %v3951_v51 }
 0x170   :  { %3659 = vmatmul.msk.f32.gmra.mxu1 %vm601_vm5, %v584_v1  ;;  %v900_v45 = vsub.f32 1.0, %v899_v53 }
 0x172   :  { %v901_v54 = vmul.f32 %v3951_v51, %v900_v45 }
 0x173   :  { %v389_v4 = vpop.permute.xlu1 %388 }
 0x174   :  { %v483_v0 = vpop.permute.xlu0 %482  ;;  %v520_v6 = vsel %vm506_vm3, %v4557_v8, %v389_v4  ;;  %v902_v55 = vadd.f32 %v3951_v51, %v901_v54 }
 0x175   :  { %v553_v3 = vsel %vm540_vm4, %v536_v63, %v483_v0  ;;  %v537_v10 = vsel %vm523_vm2, %v520_v6, %v437_v9 }
 0x176   :  { %v585_v5 = vmul.f32 %v569_v57, %v553_v3  ;;  %v4757_v56 = vsel %vm903_vm6, %v3951_v51, %v902_v55 }
 0x178   :  { %3660 = vmatmul.msk.f32.gmra.mxu1 %vm601_vm5, %v585_v5 }
 0x17c   :  { %v485_v7 = vpop.permute.xlu0 %484 }
 0x17d   :  { %v554_v11 = vsel %vm540_vm4, %v537_v10, %v485_v7 }
 0x17e   :  { %v586_v12 = vmul.f32 %v570_v2, %v554_v11 }
 0x180   :  { %3661 = vmatmul.msk.f32.gmra.mxu1 %vm601_vm5, %v586_v12 }
 0x18f   :  { %v667_v13 = vpop.f32.mrf.mxu1 }
 0x190   :  { %v4707_v8 = vadd.f32 %v4704_v15, %v667_v13 }
 0x192   :  { %v850_v16 = vsel %vm601_vm5, %v4707_v8, 0.0 }
 0x193   :  { %851 = vadd.xlane.f32.xlu1 %v850_v16 }
 0x197   :  { %v670_v17 = vpop.f32.mrf.mxu1 }
 0x198   :  { %v4712_v18 = vadd.f32 %v4704_v15, %v670_v17 }
 0x199   :  { %v439_v29 = vpop.permute.xlu2 %438 }
 0x19a   :  { %v853_v20 = vsel %vm601_vm5, %v4712_v18, 0.0 }
 0x19b   :  { %854 = vadd.xlane.f32.xlu2 %v853_v20 }
 0x19f   :  { %v673_v21 = vpop.f32.mrf.mxu1 }
 0x1a0   :  { %v4717_v22 = vadd.f32 %v4704_v15, %v673_v21 }
 0x1a2   :  { %v856_v40 = vsel %vm601_vm5, %v4717_v22, 0.0 }
 0x1a3   :  { %857 = vadd.xlane.f32.xlu0 %v856_v40 }
 0x1a7   :  { %v676_v23 = vpop.f32.mrf.mxu1 }
 0x1a8   :  { %v4722_v24 = vadd.f32 %v4704_v15, %v676_v23 }
 0x1aa   :  { %v859_v26 = vsel %vm601_vm5, %v4722_v24, 0.0 }
 0x1ab   :  { %860 = vadd.xlane.f32.xlu2 %v859_v26 }
 0x1af   :  { %v679_v19 = vpop.f32.mrf.mxu1 }
 0x1b0   :  { %v4727_v27 = vadd.f32 %v4704_v15, %v679_v19 }
 0x1b1   :  { %v391_v28 = vpop.permute.xlu1 %390 }
 0x1b2   :  { %v521_v30 = vsel %vm506_vm3, %v4625_v14, %v391_v28  ;;  %v862_v46 = vsel %vm601_vm5, %v4727_v27, 0.0  ;;  %v487_v35 = vpop.permute.xlu0 %486 }
 0x1b3   :  { %v538_v34 = vsel %vm523_vm2, %v521_v30, %v439_v29  ;;  %863 = vadd.xlane.f32.xlu1 %v862_v46 }
 0x1b4   :  { %v555_v25 = vsel %vm540_vm4, %v538_v34, %v487_v35 }
 0x1b5   :  { %v587_v36 = vmul.f32 %v571_v32, %v555_v25 }
 0x1b7   :  { %v682_v37 = vpop.f32.mrf.mxu1  ;;  %3662 = vmatmul.msk.f32.gmra.mxu1 %vm601_vm5, %v587_v36 }
 0x1b8   :  { %v4740_v38 = vadd.f32 %v4704_v15, %v682_v37 }
 0x1ba   :  { %v865_v14 = vsel %vm601_vm5, %v4740_v38, 0.0  ;;  %v441_v42 = vpop.permute.xlu2 %440 }
 0x1bb   :  { %866 = vadd.xlane.f32.xlu2 %v865_v14 }
 0x1bf   :  { %v685_v39 = vpop.f32.mrf.mxu1 }
 0x1c0   :  { %v4745_v41 = vadd.f32 %v4704_v15, %v685_v39 }
 0x1c2   :  { %v868_v31 = vsel %vm601_vm5, %v4745_v41, 0.0 }
 0x1c3   :  { %869 = vadd.xlane.f32.xlu1 %v868_v31 }
 0x1d2   :  { %v489_v48 = vpop.permute.xlu0 %488 }
 0x1d3   :  { %v393_v52 = vpop.permute.xlu1 %392 }
 0x1d4   :  { %v522_v43 = vsel %vm506_vm3, %v4661_v44, %v393_v52  ;;  %v688_v44 = vpop.f32.mrf.mxu1 }
 0x1d5   :  { %v539_v47 = vsel %vm523_vm2, %v522_v43, %v441_v42  ;;  %v4768_v3 = vadd.f32 %v4704_v15, %v688_v44 }
 0x1d6   :  { %v556_v49 = vsel %vm540_vm4, %v539_v47, %v489_v48 }
 0x1d7   :  { %v588_v58 = vmul.f32 %v572_v33, %v556_v49  ;;  %v871_v9 = vsel %vm601_vm5, %v4768_v3, 0.0 }
 0x1d9   :  { %3663 = vmatmul.msk.f32.gmra.mxu1 %vm601_vm5, %v588_v58 }
 0x1dc   :  { %v691_v57 = vpop.f32.mrf.mxu1 }
 0x1dd   :  { %v4780_v11 = vadd.f32 %v4704_v15, %v691_v57  ;;  %v1251_v57 = vld [vmem:[%s6842_s9 + $0x50] sm:$0xff] }
 0x1df   :  { %v874_v16 = vsel %vm601_vm5, %v4780_v11, 0.0 }
 0x1e4   :  { %v694_v7 = vpop.f32.mrf.mxu1 }
 0x1e5   :  { %v4792_v23 = vadd.f32 %v4704_v15, %v694_v7  ;;  %v1243_v7 = vld [vmem:[%s6842_s9 + $0x10] sm:$0xff] }
 0x1e7   :  { %v877_v29 = vsel %vm601_vm5, %v4792_v23, 0.0 }
 0x1ec   :  { %v697_v40 = vpop.f32.mrf.mxu1 }
 0x1ed   :  { %v4804_v46 = vadd.f32 %v4704_v15, %v697_v40 }
 0x1ef   :  { %v880_v37 = vsel %vm601_vm5, %v4804_v46, 0.0 }
 0x1f4   :  { %v700_v35 = vpop.f32.mrf.mxu1 }
 0x1f5   :  { %v4816_v31 = vadd.f32 %v4704_v15, %v700_v35 }
 0x1f7   :  { %v883_v33 = vsel %vm601_vm5, %v4816_v31, 0.0 }
 0x1fc   :  { %v703_v43 = vpop.f32.mrf.mxu1 }
 0x1fd   :  { %v4828_v58 = vadd.f32 %v4704_v15, %v703_v43 }
 0x1ff   :  { %v886_v45 = vsel %vm601_vm5, %v4828_v58, 0.0 }
 0x204   :  { %v706_v54 = vpop.f32.mrf.mxu1 }
 0x205   :  { %v4839_v55 = vadd.f32 %v4704_v15, %v706_v54 }
 0x206   :  { %v852_v59 = vpop.xlane.xlu1 %851 }
 0x207   :  { %v905_v60 = vmul.f32 %v4757_v56, %v852_v59  ;;  %v889_v44 = vsel %vm601_vm5, %v4839_v55, 0.0  ;;  %v1255_v59 = vld [vmem:[%s6842_s9 + $0x70] sm:$0xff] }
 0x208   :  { %1319 = vmatpush.msra.mxu2 %v1255_v59 }
 0x209   :  { %v4761_v1 = vsub.f32 %v4707_v8, %v905_v60  ;;  %v1256_v60 = vld [vmem:[%s6842_s9 + $0x78] sm:$0xff] }
 0x20a   :  { %1384 = vmatpush.msra.mxu3 %v1256_v60 }
 0x20b   :  { %v937_v61 = vmul.f32 %v4761_v1, %v4761_v1 }
 0x20d   :  { %v953_v62 = vsel %vm601_vm5, %v937_v61, 0.0  ;;  %v1253_v61 = vld [vmem:[%s6842_s9 + $0x60] sm:$0xff] }
 0x20e   :  { %v855_v63 = vpop.xlane.xlu2 %854  ;;  %954 = vadd.xlane.f32.xlu0 %v953_v62  ;;  %v1254_v62 = vld [vmem:[%s6842_s9 + $0x68] sm:$0xff]  ;;  %1320 = vmatpush.msra.mxu2 %v1253_v61 }
 0x20f   :  { %v906_v0 = vmul.f32 %v4757_v56, %v855_v63  ;;  %1385 = vmatpush.msra.mxu3 %v1254_v62  ;;  %v1252_v63 = vld [vmem:[%s6842_s9 + $0x58] sm:$0xff] }
 0x210   :  { %1321 = vmatpush.msra.mxu2 %v1251_v57 }
 0x211   :  { %v4771_v4 = vsub.f32 %v4712_v18, %v906_v0  ;;  %1386 = vmatpush.msra.mxu3 %v1252_v63  ;;  %v1249_v0 = vld [vmem:[%s6842_s9 + $0x40] sm:$0xff] }
 0x212   :  { %1322 = vmatpush.msra.mxu2 %v1249_v0  ;;  %v3664_v63 = vld [vmem:[%s6843_s4 + $0x80] sm:$0xff] }
 0x213   :  { %v938_v5 = vmul.f32 %v4771_v4, %v4771_v4 }
 0x215   :  { %v956_v6 = vsel %vm601_vm5, %v938_v5, 0.0  ;;  %v1250_v5 = vld [vmem:[%s6842_s9 + $0x48] sm:$0xff] }
 0x216   :  { %957 = vadd.xlane.f32.xlu2 %v956_v6  ;;  %872 = vadd.xlane.f32.xlu0 %v871_v9  ;;  %v858_v2 = vpop.xlane.xlu0 %857  ;;  %v1247_v6 = vld [vmem:[%s6842_s9 + $0x30] sm:$0xff]  ;;  %v1248_v9 = vld [vmem:[%s6842_s9 + $0x38] sm:$0xff] }
 0x217   :  { %v907_v10 = vmul.f32 %v4757_v56, %v858_v2  ;;  %1387 = vmatpush.msra.mxu3 %v1250_v5  ;;  %1323 = vmatpush.msra.mxu2 %v1247_v6  ;;  %v1245_v2 = vld [vmem:[%s6842_s9 + $0x20] sm:$0xff] }
 0x219   :  { %v4783_v12 = vsub.f32 %v4717_v22, %v907_v10  ;;  %1388 = vmatpush.msra.mxu3 %v1248_v9  ;;  %v1246_v10 = vld [vmem:[%s6842_s9 + $0x28] sm:$0xff]  ;;  %1324 = vmatpush.msra.mxu2 %v1245_v2 }
 0x21b   :  { %v939_v13 = vmul.f32 %v4783_v12, %v4783_v12  ;;  %1389 = vmatpush.msra.mxu3 %v1246_v10  ;;  %1325 = vmatpush.msra.mxu2 %v1243_v7 }
 0x21d   :  { %v959_v17 = vsel %vm601_vm5, %v939_v13, 0.0  ;;  %v1244_v13 = vld [vmem:[%s6842_s9 + $0x18] sm:$0xff] }
 0x21e   :  { %875 = vadd.xlane.f32.xlu2 %v874_v16  ;;  %v861_v20 = vpop.xlane.xlu2 %860  ;;  %960 = vadd.xlane.f32.xlu1 %v959_v17  ;;  %v1241_v16 = vld [vmem:[%s6842_s9] sm:$0xff]  ;;  %v1242_v17 = vld [vmem:[%s6842_s9 + $0x8] sm:$0xff] }
 0x21f   :  { %v908_v21 = vmul.f32 %v4757_v56, %v861_v20  ;;  %1390 = vmatpush.msra.mxu3 %v1244_v13  ;;  %1326 = vmatpush.msra.mxu2 %v1241_v16  ;;  %v715_v13 = vld [vmem:[%s6843_s4] sm:$0xff] }
 0x221   :  { %v4795_v26 = vsub.f32 %v4722_v24, %v908_v21  ;;  %1391 = vmatpush.msra.mxu3 %v1242_v17 }
 0x223   :  { %v940_v19 = vmul.f32 %v4795_v26, %v4795_v26 }
 0x225   :  { %v962_v28 = vsel %vm601_vm5, %v940_v19, 0.0 }
 0x226   :  { %963 = vadd.xlane.f32.xlu0 %v962_v28  ;;  %v864_v30 = vpop.xlane.xlu1 %863  ;;  %878 = vadd.xlane.f32.xlu1 %v877_v29 }
 0x227   :  { %v909_v32 = vmul.f32 %v4757_v56, %v864_v30 }
 0x229   :  { %v4807_v34 = vsub.f32 %v4727_v27, %v909_v32 }
 0x22b   :  { %v941_v25 = vmul.f32 %v4807_v34, %v4807_v34 }
 0x22d   :  { %v965_v36 = vsel %vm601_vm5, %v941_v25, 0.0 }
 0x22e   :  { %v867_v14 = vpop.xlane.xlu2 %866  ;;  %966 = vadd.xlane.f32.xlu2 %v965_v36  ;;  %881 = vadd.xlane.f32.xlu0 %v880_v37 }
 0x22f   :  { %v910_v39 = vmul.f32 %v4757_v56, %v867_v14 }
 0x231   :  { %v4819_v52 = vsub.f32 %v4740_v38, %v910_v39 }
 0x233   :  { %v942_v42 = vmul.f32 %v4819_v52, %v4819_v52 }
 0x234   :  { %v709_v39 = vpop.f32.mrf.mxu1 }
 0x235   :  { %v968_v47 = vsel %vm601_vm5, %v942_v42, 0.0 }
 0x236   :  { %v870_v48 = vpop.xlane.xlu1 %869  ;;  %884 = vadd.xlane.f32.xlu2 %v883_v33  ;;  %969 = vadd.xlane.f32.xlu1 %v968_v47 }
 0x237   :  { %v911_v49 = vmul.f32 %v4757_v56, %v870_v48 }
 0x239   :  { %v4831_v50 = vsub.f32 %v4745_v41, %v911_v49 }
 0x23b   :  { %v943_v51 = vmul.f32 %v4831_v50, %v4831_v50 }
 0x23d   :  { %v971_v53 = vsel %vm601_vm5, %v943_v51, 0.0 }
 0x23e   :  { %972 = vadd.xlane.f32.xlu0 %v971_v53  ;;  %887 = vadd.xlane.f32.xlu1 %v886_v45  ;;  %v4903_v45 = vadd.f32 %v4704_v15, %v709_v39 }
 0x240   :  { %v892_v6 = vsel %vm601_vm5, %v4903_v45, 0.0 }
 0x246   :  { %890 = vadd.xlane.f32.xlu0 %v889_v44 }
 0x256   :  { %v712_v0 = vpop.f32.mrf.mxu1 }
 0x281   :  { %v955_v20 = vpop.xlane.xlu0 %954 }
 0x282   :  { %v1001_v21 = vmul.f32 %v955_v20, %v4757_v56 }
 0x284   :  { %v1017_v40 = vadd.f32 1e-06, %v1001_v21 }
 0x286   :  { %3952 = vrsqrt.f32 %v1017_v40  ;;  %vm1039_vm8 = vweird.f32 %v1017_v40 }
 0x289   :  { %v958_v19 = vpop.xlane.xlu2 %957  ;;  %v873_v28 = vpop.xlane.xlu0 %872 }
 0x28a   :  { %v1002_v29 = vmul.f32 %v958_v19, %v4757_v56  ;;  %v912_v30 = vmul.f32 %v4757_v56, %v873_v28  ;;  %v4926_v19 = vadd.f32 %v4704_v15, %v712_v0 }
 0x28c   :  { %v3953_v32 = vpop.eup %3952  ;;  %v1018_v35 = vadd.f32 1e-06, %v1002_v29  ;;  %v4895_v25 = vsub.f32 %v4768_v3, %v912_v30 }
 0x28d   :  { %v1034_v36 = vmul.f32 %v3953_v32, %v1017_v40  ;;  %vm1040_vm7 = vweird.f32 %v3953_v32 }
 0x28e   :  { %3954 = vrsqrt.f32 %v1018_v35  ;;  %v944_v37 = vmul.f32 %v4895_v25, %v4895_v25  ;;  %vm1041_vm9 = vmor %vm1039_vm8, %vm1040_vm7  ;;  %vm1049_vm11 = vweird.f32 %v1018_v35 }
 0x28f   :  { %v1035_v14 = vmul.f32 %v3953_v32, %v1034_v36 }
 0x290   :  { %v974_v42 = vsel %vm601_vm5, %v944_v37, 0.0 }
 0x291   :  { %v1036_v43 = vmul.f32 0.5, %v1035_v14  ;;  %v876_v33 = vpop.xlane.xlu2 %875  ;;  %v961_v47 = vpop.xlane.xlu1 %960  ;;  %975 = vadd.xlane.f32.xlu2 %v974_v42  ;;  %v3665_v14 = vld [vmem:[%s6843_s4 + $0x88] sm:$0xff] }
 0x292   :  { %v913_v48 = vmul.f32 %v4757_v56, %v876_v33  ;;  %v1003_v49 = vmul.f32 %v961_v47, %v4757_v56 }
 0x293   :  { %v1037_v51 = vsub.f32 1.5, %v1036_v43 }
 0x294   :  { %v3955_v53 = vpop.eup %3954  ;;  %v4906_v54 = vsub.f32 %v4780_v11, %v913_v48  ;;  %v4908_v44 = vadd.f32 1e-06, %v1003_v49  ;;  %v716_v48 = vld [vmem:[%s6843_s4 + $0x8] sm:$0xff] }
 0x295   :  { %v1038_v59 = vmul.f32 %v3953_v32, %v1037_v51  ;;  %v1044_v60 = vmul.f32 %v3955_v53, %v1018_v35  ;;  %vm1050_vm10 = vweird.f32 %v3955_v53  ;;  %v895_v35 = vsel %vm601_vm5, %v4926_v19, 0.0 }
 0x296   :  { %3956 = vrsqrt.f32 %v4908_v44  ;;  %v945_v61 = vmul.f32 %v4906_v54, %v4906_v54  ;;  %vm1051_vm12 = vmor %vm1049_vm11, %vm1050_vm10  ;;  %vm1059_vm14 = vweird.f32 %v4908_v44 }
 0x297   :  { %v1042_v62 = vsel %vm1041_vm9, %v3953_v32, %v1038_v59  ;;  %v1045_v57 = vmul.f32 %v3955_v53, %v1044_v60 }
 0x298   :  { %v977_v5 = vsel %vm601_vm5, %v945_v61, 0.0  ;;  %v1193_v9 = vmul.f32 %v1042_v62, %v4761_v1 }
 0x299   :  { %v1046_v2 = vmul.f32 0.5, %v1045_v57  ;;  %978 = vadd.xlane.f32.xlu1 %v977_v5  ;;  %v879_v10 = vpop.xlane.xlu1 %878  ;;  %893 = vadd.xlane.f32.xlu2 %v892_v6  ;;  %v964_v7 = vpop.xlane.xlu0 %963 }
 0x29a   :  { %v914_v16 = vmul.f32 %v4757_v56, %v879_v10  ;;  %v1004_v17 = vmul.f32 %v964_v7, %v4757_v56  ;;  %v1209_v20 = vmul.f32 %v3664_v63, %v1193_v9  ;;  %v3666_v9 = vld [vmem:[%s6843_s4 + $0x90] sm:$0xff] }
 0x29b   :  { %v1047_v21 = vsub.f32 1.5, %v1046_v2 }
 0x29c   :  { %v3957_v40 = vpop.eup %3956  ;;  %v4929_v1 = vsub.f32 %v4792_v23, %v914_v16  ;;  %v1020_v28 = vadd.f32 1e-06, %v1004_v17  ;;  %v1225_v29 = vadd.f32 %v1209_v20, %v715_v13  ;;  %v717_v16 = vld [vmem:[%s6843_s4 + $0x10] sm:$0xff] }
 0x29d   :  { %v1048_v30 = vmul.f32 %v3955_v53, %v1047_v21  ;;  %v1054_v32 = vmul.f32 %v3957_v40, %v4908_v44  ;;  %vm1060_vm13 = vweird.f32 %v3957_v40 }
 0x29e   :  { %3958 = vrsqrt.f32 %v1020_v28  ;;  %3776 = vmatmul.msk.f32.vlgmr.msra.gmra.mxu2 %vm601_vm5, %v1225_v29  ;;  %3792 = vmatmul.msk.f32.vlgmr.msra.gmra.mxu3 %vm601_vm5, %v1225_v29  ;;  %v946_v36 = vmul.f32 %v4929_v1, %v4929_v1  ;;  %vm1061_vm15 = vmor %vm1059_vm14, %vm1060_vm13  ;;  %vm1069_vm1 = vweird.f32 %v1020_v28 }
 0x29f   :  { %v1052_v15 = vsel %vm1051_vm12, %v3955_v53, %v1048_v30  ;;  %v1055_v37 = vmul.f32 %v3957_v40, %v1054_v32 }
 0x2a0   :  { %v980_v39 = vsel %vm601_vm5, %v946_v36, 0.0  ;;  %v1194_v42 = vmul.f32 %v1052_v15, %v4771_v4 }
 0x2a1   :  { %v1056_v43 = vmul.f32 0.5, %v1055_v37  ;;  %v967_v33 = vpop.xlane.xlu2 %966  ;;  %896 = vadd.xlane.f32.xlu1 %v895_v35  ;;  %981 = vadd.xlane.f32.xlu0 %v980_v39  ;;  %v882_v47 = vpop.xlane.xlu0 %881  ;;  %v3667_v39 = vld [vmem:[%s6843_s4 + $0x98] sm:$0xff] }
 0x2a2   :  { %v1005_v49 = vmul.f32 %v967_v33, %v4757_v56  ;;  %v915_v51 = vmul.f32 %v4757_v56, %v882_v47  ;;  %v1210_v53 = vmul.f32 %v3665_v14, %v1194_v42 }
 0x2a3   :  { %v1057_v59 = vsub.f32 1.5, %v1056_v43 }
 0x2a4   :  { %v3959_v60 = vpop.eup %3958  ;;  %v1021_v61 = vadd.f32 1e-06, %v1005_v49  ;;  %v4949_v4 = vsub.f32 %v4804_v46, %v915_v51  ;;  %v1226_v62 = vadd.f32 %v1210_v53, %v716_v48  ;;  %v718_v48 = vld [vmem:[%s6843_s4 + $0x18] sm:$0xff] }
 0x2a5   :  { %v1058_v57 = vmul.f32 %v3957_v40, %v1057_v59  ;;  %v1064_v63 = vmul.f32 %v3959_v60, %v1020_v28  ;;  %vm1070_vm0 = vweird.f32 %v3959_v60 }
 0x2a6   :  { %3960 = vrsqrt.f32 %v1021_v61  ;;  %3777 = vmatmul.msk.f32.gmra.mxu2 %vm601_vm5, %v1226_v62  ;;  %3793 = vmatmul.msk.f32.gmra.mxu3 %vm601_vm5, %v1226_v62  ;;  %v947_v0 = vmul.f32 %v4949_v4, %v4949_v4  ;;  %vm1071_vm2 = vmor %vm1069_vm1, %vm1070_vm0  ;;  %vm1079_vm4 = vweird.f32 %v1021_v61 }
 0x2a7   :  { %v1062_v5 = vsel %vm1061_vm15, %v3957_v40, %v1058_v57  ;;  %v1065_v6 = vmul.f32 %v3959_v60, %v1064_v63 }
 0x2a8   :  { %v983_v2 = vsel %vm601_vm5, %v947_v0, 0.0  ;;  %v1195_v44 = vmul.f32 %v1062_v5, %v4783_v12 }
 0x2a9   :  { %v1066_v10 = vmul.f32 0.5, %v1065_v6  ;;  %v885_v7 = vpop.xlane.xlu2 %884  ;;  %v970_v13 = vpop.xlane.xlu1 %969  ;;  %984 = vadd.xlane.f32.xlu2 %v983_v2  ;;  %v3668_v2 = vld [vmem:[%s6843_s4 + $0xa0] sm:$0xff] }
 0x2aa   :  { %v916_v17 = vmul.f32 %v4757_v56, %v885_v7  ;;  %v1006_v20 = vmul.f32 %v970_v13, %v4757_v56  ;;  %v1211_v21 = vmul.f32 %v3666_v9, %v1195_v44  ;;  %v719_v13 = vld [vmem:[%s6843_s4 + $0x20] sm:$0xff] }
 0x2ab   :  { %v1067_v40 = vsub.f32 1.5, %v1066_v10 }
 0x2ac   :  { %v3961_v29 = vpop.eup %3960  ;;  %v4967_v30 = vsub.f32 %v4816_v31, %v916_v17  ;;  %v1022_v12 = vadd.f32 1e-06, %v1006_v20  ;;  %v1227_v32 = vadd.f32 %v1211_v21, %v717_v16 }
 0x2ad   :  { %v1068_v36 = vmul.f32 %v3959_v60, %v1067_v40  ;;  %v1074_v15 = vmul.f32 %v3961_v29, %v1021_v61  ;;  %vm1080_vm3 = vweird.f32 %v3961_v29 }
 0x2ae   :  { %3962 = vrsqrt.f32 %v1022_v12  ;;  %3778 = vmatmul.msk.f32.gmra.mxu2 %vm601_vm5, %v1227_v32  ;;  %3794 = vmatmul.msk.f32.gmra.mxu3 %vm601_vm5, %v1227_v32  ;;  %v948_v37 = vmul.f32 %v4967_v30, %v4967_v30  ;;  %vm1081_vm6 = vmor %vm1079_vm4, %vm1080_vm3  ;;  %vm1089_vm8 = vweird.f32 %v1022_v12 }
 0x2af   :  { %v1072_v14 = vsel %vm1071_vm2, %v3959_v60, %v1068_v36  ;;  %v1075_v35 = vmul.f32 %v3961_v29, %v1074_v15 }
 0x2b0   :  { %v986_v42 = vsel %vm601_vm5, %v948_v37, 0.0  ;;  %v1196_v28 = vmul.f32 %v1072_v14, %v4795_v26  ;;  %v3669_v14 = vld [vmem:[%s6843_s4 + $0xa8] sm:$0xff] }
 0x2b1   :  { %v1076_v43 = vmul.f32 0.5, %v1075_v35  ;;  %987 = vadd.xlane.f32.xlu0 %v986_v42  ;;  %v888_v33 = vpop.xlane.xlu1 %887  ;;  %v973_v47 = vpop.xlane.xlu0 %972  ;;  %v720_v42 = vld [vmem:[%s6843_s4 + $0x28] sm:$0xff] }
 0x2b2   :  { %v917_v49 = vmul.f32 %v4757_v56, %v888_v33  ;;  %v1007_v51 = vmul.f32 %v973_v47, %v4757_v56  ;;  %v1212_v53 = vmul.f32 %v3667_v39, %v1196_v28 }
 0x2b3   :  { %v1077_v59 = vsub.f32 1.5, %v1076_v43 }
 0x2b4   :  { %v3963_v60 = vpop.eup %3962  ;;  %v4984_v62 = vsub.f32 %v4828_v58, %v917_v49  ;;  %v1023_v26 = vadd.f32 1e-06, %v1007_v51  ;;  %v1228_v57 = vadd.f32 %v1212_v53, %v718_v48  ;;  %v721_v51 = vld [vmem:[%s6843_s4 + $0x30] sm:$0xff] }
 0x2b5   :  { %v1078_v63 = vmul.f32 %v3961_v29, %v1077_v59  ;;  %v1084_v0 = vmul.f32 %v3963_v60, %v1022_v12  ;;  %vm1090_vm7 = vweird.f32 %v3963_v60 }
 0x2b6   :  { %3964 = vrsqrt.f32 %v1023_v26  ;;  %3779 = vmatmul.msk.f32.gmra.mxu2 %vm601_vm5, %v1228_v57  ;;  %3795 = vmatmul.msk.f32.gmra.mxu3 %vm601_vm5, %v1228_v57  ;;  %v949_v5 = vmul.f32 %v4984_v62, %v4984_v62  ;;  %vm1091_vm9 = vmor %vm1089_vm8, %vm1090_vm7  ;;  %vm1099_vm11 = vweird.f32 %v1023_v26 }
 0x2b7   :  { %v1082_v6 = vsel %vm1081_vm6, %v3961_v29, %v1078_v63  ;;  %v1085_v9 = vmul.f32 %v3963_v60, %v1084_v0 }
 0x2b8   :  { %v989_v44 = vsel %vm601_vm5, %v949_v5, 0.0  ;;  %v1197_v61 = vmul.f32 %v1082_v6, %v4807_v34 }
 0x2b9   :  { %v1086_v10 = vmul.f32 0.5, %v1085_v9  ;;  %990 = vadd.xlane.f32.xlu1 %v989_v44  ;;  %v891_v7 = vpop.xlane.xlu0 %890 }
 0x2ba   :  { %v918_v16 = vmul.f32 %v4757_v56, %v891_v7  ;;  %v1213_v17 = vmul.f32 %v3668_v2, %v1197_v61 }
 0x2bb   :  { %v1087_v20 = vsub.f32 1.5, %v1086_v10 }
 0x2bc   :  { %v3965_v21 = vpop.eup %3964  ;;  %v5000_v40 = vsub.f32 %v4839_v55, %v918_v16  ;;  %v1229_v29 = vadd.f32 %v1213_v17, %v719_v13 }
 0x2bd   :  { %v1088_v32 = vmul.f32 %v3963_v60, %v1087_v20  ;;  %v1094_v34 = vmul.f32 %v3965_v21, %v1023_v26  ;;  %vm1100_vm10 = vweird.f32 %v3965_v21 }
 0x2be   :  { %3780 = vmatmul.msk.f32.gmra.mxu2 %vm601_vm5, %v1229_v29  ;;  %3796 = vmatmul.msk.f32.gmra.mxu3 %vm601_vm5, %v1229_v29  ;;  %v950_v36 = vmul.f32 %v5000_v40, %v5000_v40  ;;  %vm1101_vm12 = vmor %vm1099_vm11, %vm1100_vm10 }
 0x2bf   :  { %v1092_v15 = vsel %vm1091_vm9, %v3963_v60, %v1088_v32  ;;  %v1095_v37 = vmul.f32 %v3965_v21, %v1094_v34 }
 0x2c0   :  { %v992_v35 = vsel %vm601_vm5, %v950_v36, 0.0  ;;  %v1198_v39 = vmul.f32 %v1092_v15, %v4819_v52  ;;  %v3670_v52 = vld [vmem:[%s6843_s4 + $0xb0] sm:$0xff] }
 0x2c1   :  { %v1096_v12 = vmul.f32 0.5, %v1095_v37  ;;  %993 = vadd.xlane.f32.xlu2 %v992_v35 }
 0x2c2   :  { %v1214_v28 = vmul.f32 %v3669_v14, %v1198_v39 }
 0x2c3   :  { %v1097_v43 = vsub.f32 1.5, %v1096_v12  ;;  %v3671_v12 = vld [vmem:[%s6843_s4 + $0xb8] sm:$0xff] }
 0x2c4   :  { %v1230_v33 = vadd.f32 %v1214_v28, %v720_v42 }
 0x2c5   :  { %v1098_v47 = vmul.f32 %v3965_v21, %v1097_v43 }
 0x2c6   :  { %3781 = vmatmul.msk.f32.gmra.mxu2 %vm601_vm5, %v1230_v33  ;;  %3797 = vmatmul.msk.f32.gmra.mxu3 %vm601_vm5, %v1230_v33 }
 0x2c7   :  { %v1102_v48 = vsel %vm1101_vm12, %v3965_v21, %v1098_v47  ;;  %v722_v47 = vld [vmem:[%s6843_s4 + $0x38] sm:$0xff] }
 0x2c8   :  { %v1199_v49 = vmul.f32 %v1102_v48, %v4831_v50 }
 0x2ca   :  { %v1215_v53 = vmul.f32 %v3670_v52, %v1199_v49 }
 0x2cc   :  { %v1231_v59 = vadd.f32 %v1215_v53, %v721_v51 }
 0x2ce   :  { %3782 = vmatmul.msk.f32.gmra.mxu2 %vm601_vm5, %v1231_v59  ;;  %3798 = vmatmul.msk.f32.gmra.mxu3 %vm601_vm5, %v1231_v59 }
 0x304   :  { %v976_v60 = vpop.xlane.xlu2 %975 }
 0x305   :  { %v1008_v26 = vmul.f32 %v976_v60, %v4757_v56 }
 0x307   :  { %v1024_v57 = vadd.f32 1e-06, %v1008_v26 }
 0x309   :  { %3966 = vrsqrt.f32 %v1024_v57  ;;  %vm1109_vm14 = vweird.f32 %v1024_v57 }
 0x30c   :  { %v979_v63 = vpop.xlane.xlu1 %978  ;;  %v894_v0 = vpop.xlane.xlu2 %893 }
 0x30d   :  { %v1009_v5 = vmul.f32 %v979_v63, %v4757_v56  ;;  %v919_v50 = vmul.f32 %v4757_v56, %v894_v0  ;;  %v3672_v63 = vld [vmem:[%s6843_s4 + $0xc0] sm:$0xff] }
 0x30f   :  { %v3967_v6 = vpop.eup %3966  ;;  %v1025_v9 = vadd.f32 1e-06, %v1009_v5  ;;  %v5029_v2 = vsub.f32 %v4903_v45, %v919_v50 }
 0x310   :  { %v1104_v44 = vmul.f32 %v3967_v6, %v1024_v57  ;;  %vm1110_vm13 = vweird.f32 %v3967_v6 }
 0x311   :  { %3968 = vrsqrt.f32 %v1025_v9  ;;  %v951_v61 = vmul.f32 %v5029_v2, %v5029_v2  ;;  %vm1111_vm15 = vmor %vm1109_vm14, %vm1110_vm13  ;;  %vm1119_vm1 = vweird.f32 %v1025_v9 }
 0x312   :  { %v1105_v10 = vmul.f32 %v3967_v6, %v1104_v44 }
 0x313   :  { %v995_v7 = vsel %vm601_vm5, %v951_v61, 0.0 }
 0x314   :  { %v1106_v13 = vmul.f32 0.5, %v1105_v10  ;;  %v897_v16 = vpop.xlane.xlu1 %896  ;;  %996 = vadd.xlane.f32.xlu0 %v995_v7  ;;  %v982_v17 = vpop.xlane.xlu0 %981 }
 0x315   :  { %v920_v20 = vmul.f32 %v4757_v56, %v897_v16  ;;  %v1010_v21 = vmul.f32 %v982_v17, %v4757_v56 }
 0x316   :  { %v1107_v29 = vsub.f32 1.5, %v1106_v13 }
 0x317   :  { %v3969_v32 = vpop.eup %3968  ;;  %v5037_v34 = vsub.f32 %v4926_v19, %v920_v20  ;;  %v1026_v36 = vadd.f32 1e-06, %v1010_v21  ;;  %v3673_v21 = vld [vmem:[%s6843_s4 + $0xc8] sm:$0xff] }
 0x318   :  { %v1108_v15 = vmul.f32 %v3967_v6, %v1107_v29  ;;  %v1114_v37 = vmul.f32 %v3969_v32, %v1025_v9  ;;  %vm1120_vm0 = vweird.f32 %v3969_v32 }
 0x319   :  { %3970 = vrsqrt.f32 %v1026_v36  ;;  %v952_v14 = vmul.f32 %v5037_v34, %v5037_v34  ;;  %vm1121_vm2 = vmor %vm1119_vm1, %vm1120_vm0  ;;  %vm1129_vm4 = vweird.f32 %v1026_v36 }
 0x31a   :  { %v1112_v35 = vsel %vm1111_vm15, %v3967_v6, %v1108_v15  ;;  %v1115_v39 = vmul.f32 %v3969_v32, %v1114_v37  ;;  %v723_v6 = vld [vmem:[%s6843_s4 + $0x40] sm:$0xff] }
 0x31b   :  { %v998_v42 = vsel %vm601_vm5, %v952_v14, 0.0  ;;  %v1200_v28 = vmul.f32 %v1112_v35, %v4895_v25 }
 0x31c   :  { %v1116_v43 = vmul.f32 0.5, %v1115_v39  ;;  %999 = vadd.xlane.f32.xlu1 %v998_v42  ;;  %v985_v33 = vpop.xlane.xlu2 %984 }
 0x31d   :  { %v1011_v48 = vmul.f32 %v985_v33, %v4757_v56  ;;  %v1216_v52 = vmul.f32 %v3671_v12, %v1200_v28 }
 0x31e   :  { %v1117_v49 = vsub.f32 1.5, %v1116_v43 }
 0x31f   :  { %v3971_v51 = vpop.eup %3970  ;;  %v1027_v53 = vadd.f32 1e-06, %v1011_v48  ;;  %v1232_v59 = vadd.f32 %v1216_v52, %v722_v47  ;;  %v3674_v47 = vld [vmem:[%s6843_s4 + $0xd0] sm:$0xff] }
 0x320   :  { %v1118_v60 = vmul.f32 %v3969_v32, %v1117_v49  ;;  %v1124_v26 = vmul.f32 %v3971_v51, %v1026_v36  ;;  %vm1130_vm3 = vweird.f32 %v3971_v51  ;;  %v724_v36 = vld [vmem:[%s6843_s4 + $0x48] sm:$0xff] }
 0x321   :  { %3972 = vrsqrt.f32 %v1027_v53  ;;  %3783 = vmatmul.msk.f32.gmra.mxu2 %vm601_vm5, %v1232_v59  ;;  %3799 = vmatmul.msk.f32.gmra.mxu3 %vm601_vm5, %v1232_v59  ;;  %vm1131_vm6 = vmor %vm1129_vm4, %vm1130_vm3  ;;  %vm1139_vm8 = vweird.f32 %v1027_v53 }
 0x322   :  { %v1122_v25 = vsel %vm1121_vm2, %v3969_v32, %v1118_v60  ;;  %v1125_v57 = vmul.f32 %v3971_v51, %v1124_v26 }
 0x323   :  { %v1201_v0 = vmul.f32 %v1122_v25, %v4906_v54 }
 0x324   :  { %v1126_v5 = vmul.f32 0.5, %v1125_v57  ;;  %v988_v50 = vpop.xlane.xlu0 %987 }
 0x325   :  { %v1012_v9 = vmul.f32 %v988_v50, %v4757_v56  ;;  %v1217_v44 = vmul.f32 %v3672_v63, %v1201_v0  ;;  %v3675_v50 = vld [vmem:[%s6843_s4 + $0xd8] sm:$0xff] }
 0x326   :  { %v1127_v61 = vsub.f32 1.5, %v1126_v5 }
 0x327   :  { %v3973_v10 = vpop.eup %3972  ;;  %v1028_v7 = vadd.f32 1e-06, %v1012_v9  ;;  %v1233_v13 = vadd.f32 %v1217_v44, %v723_v6  ;;  %v726_v44 = vld [vmem:[%s6843_s4 + $0x58] sm:$0xff] }
 0x328   :  { %v1128_v16 = vmul.f32 %v3971_v51, %v1127_v61  ;;  %v1134_v17 = vmul.f32 %v3973_v10, %v1027_v53  ;;  %vm1140_vm7 = vweird.f32 %v3973_v10 }
 0x329   :  { %3974 = vrsqrt.f32 %v1028_v7  ;;  %3784 = vmatmul.msk.f32.gmra.mxu2 %vm601_vm5, %v1233_v13  ;;  %3800 = vmatmul.msk.f32.gmra.mxu3 %vm601_vm5, %v1233_v13  ;;  %vm1141_vm9 = vmor %vm1139_vm8, %vm1140_vm7  ;;  %vm1149_vm11 = vweird.f32 %v1028_v7 }
 0x32a   :  { %v1132_v54 = vsel %vm1131_vm6, %v3971_v51, %v1128_v16  ;;  %v1135_v20 = vmul.f32 %v3973_v10, %v1134_v17  ;;  %v725_v51 = vld [vmem:[%s6843_s4 + $0x50] sm:$0xff] }
 0x32b   :  { %v1202_v29 = vmul.f32 %v1132_v54, %v4929_v1 }
 0x32c   :  { %v1136_v32 = vmul.f32 0.5, %v1135_v20  ;;  %v991_v15 = vpop.xlane.xlu1 %990  ;;  %v3676_v20 = vld [vmem:[%s6843_s4 + $0xe0] sm:$0xff] }
 0x32d   :  { %v1013_v37 = vmul.f32 %v991_v15, %v4757_v56  ;;  %v1218_v14 = vmul.f32 %v3673_v21, %v1202_v29 }
 0x32e   :  { %v1137_v35 = vsub.f32 1.5, %v1136_v32  ;;  %v727_v32 = vld [vmem:[%s6843_s4 + $0x60] sm:$0xff] }
 0x32f   :  { %v3975_v39 = vpop.eup %3974  ;;  %v1029_v12 = vadd.f32 1e-06, %v1013_v37  ;;  %v1234_v42 = vadd.f32 %v1218_v14, %v724_v36 }
 0x330   :  { %v1138_v28 = vmul.f32 %v3973_v10, %v1137_v35  ;;  %v1144_v43 = vmul.f32 %v3975_v39, %v1028_v7  ;;  %vm1150_vm10 = vweird.f32 %v3975_v39 }
 0x331   :  { %3976 = vrsqrt.f32 %v1029_v12  ;;  %3785 = vmatmul.msk.f32.gmra.mxu2 %vm601_vm5, %v1234_v42  ;;  %3801 = vmatmul.msk.f32.gmra.mxu3 %vm601_vm5, %v1234_v42  ;;  %vm1151_vm12 = vmor %vm1149_vm11, %vm1150_vm10  ;;  %vm1159_vm14 = vweird.f32 %v1029_v12 }
 0x332   :  { %v1142_v1 = vsel %vm1141_vm9, %v3973_v10, %v1138_v28  ;;  %v1145_v33 = vmul.f32 %v3975_v39, %v1144_v43  ;;  %v5109_v43 = vpop.f32.mrf.mxu2 }
 0x333   :  { %v1203_v48 = vmul.f32 %v1142_v1, %v4949_v4 }
 0x334   :  { %v1146_v52 = vmul.f32 0.5, %v1145_v33  ;;  %v994_v49 = vpop.xlane.xlu2 %993 }
 0x335   :  { %v1014_v53 = vmul.f32 %v994_v49, %v4757_v56  ;;  %v1219_v59 = vmul.f32 %v3674_v47, %v1203_v48 }
 0x336   :  { %v1147_v60 = vsub.f32 1.5, %v1146_v52 }
 0x337   :  { %v3977_v26 = vpop.eup %3976  ;;  %v1030_v25 = vadd.f32 1e-06, %v1014_v53  ;;  %v1235_v57 = vadd.f32 %v1219_v59, %v725_v51 }
 0x338   :  { %v1148_v63 = vmul.f32 %v3975_v39, %v1147_v60  ;;  %v1154_v0 = vmul.f32 %v3977_v26, %v1029_v12  ;;  %vm1160_vm13 = vweird.f32 %v3977_v26  ;;  %v728_v12 = vld [vmem:[%s6843_s4 + $0x68] sm:$0xff] }
 0x339   :  { %3978 = vrsqrt.f32 %v1030_v25  ;;  %3786 = vmatmul.msk.f32.gmra.mxu2 %vm601_vm5, %v1235_v57  ;;  %3802 = vmatmul.msk.f32.gmra.mxu3 %vm601_vm5, %v1235_v57  ;;  %vm1161_vm15 = vmor %vm1159_vm14, %vm1160_vm13  ;;  %vm1169_vm1 = vweird.f32 %v1030_v25 }
 0x33a   :  { %v1152_v4 = vsel %vm1151_vm12, %v3975_v39, %v1148_v63  ;;  %v1155_v5 = vmul.f32 %v3977_v26, %v1154_v0  ;;  %v5111_v1 = vpop.f32.mrf.mxu2 }
 0x33b   :  { %v1204_v6 = vmul.f32 %v1152_v4, %v4967_v30 }
 0x33c   :  { %v1156_v9 = vmul.f32 0.5, %v1155_v5 }
 0x33d   :  { %v1220_v61 = vmul.f32 %v3675_v50, %v1204_v6 }
 0x33e   :  { %v1157_v10 = vsub.f32 1.5, %v1156_v9 }
 0x33f   :  { %v3979_v7 = vpop.eup %3978  ;;  %v1236_v13 = vadd.f32 %v1220_v61, %v726_v44  ;;  %v3678_v61 = vld [vmem:[%s6843_s4 + $0xf0] sm:$0xff] }
 0x340   :  { %v1158_v16 = vmul.f32 %v3977_v26, %v1157_v10  ;;  %v1164_v17 = vmul.f32 %v3979_v7, %v1030_v25  ;;  %vm1170_vm0 = vweird.f32 %v3979_v7 }
 0x341   :  { %3787 = vmatmul.msk.f32.gmra.mxu2 %vm601_vm5, %v1236_v13  ;;  %3803 = vmatmul.msk.f32.gmra.mxu3 %vm601_vm5, %v1236_v13  ;;  %vm1171_vm2 = vmor %vm1169_vm1, %vm1170_vm0 }
 0x342   :  { %v1162_v54 = vsel %vm1161_vm15, %v3977_v26, %v1158_v16  ;;  %v1165_v30 = vmul.f32 %v3979_v7, %v1164_v17  ;;  %v5113_v33 = vpop.f32.mrf.mxu2  ;;  %v729_v16 = vld [vmem:[%s6843_s4 + $0x70] sm:$0xff] }
 0x343   :  { %v1205_v21 = vmul.f32 %v1162_v54, %v4984_v62  ;;  %v3677_v62 = vld [vmem:[%s6843_s4 + $0xe8] sm:$0xff] }
 0x344   :  { %v1166_v29 = vmul.f32 0.5, %v1165_v30 }
 0x345   :  { %v1221_v15 = vmul.f32 %v3676_v20, %v1205_v21 }
 0x346   :  { %v1167_v36 = vsub.f32 1.5, %v1166_v29  ;;  %v3679_v29 = vld [vmem:[%s6843_s4 + $0xf8] sm:$0xff] }
 0x347   :  { %v1237_v37 = vadd.f32 %v1221_v15, %v727_v32  ;;  %v730_v15 = vld [vmem:[%s6843_s4 + $0x78] sm:$0xff] }
 0x348   :  { %v1168_v14 = vmul.f32 %v3979_v7, %v1167_v36 }
 0x349   :  { %3788 = vmatmul.msk.f32.gmra.mxu2 %vm601_vm5, %v1237_v37  ;;  %3804 = vmatmul.msk.f32.gmra.mxu3 %vm601_vm5, %v1237_v37 }
 0x34a   :  { %v1172_v35 = vsel %vm1171_vm2, %v3979_v7, %v1168_v14  ;;  %v5115_v47 = vpop.f32.mrf.mxu2  ;;  %v5129_v7 = vpop.f32.mrf.mxu3 }
 0x34b   :  { %v1206_v39 = vmul.f32 %v1172_v35, %v5000_v40 }
 0x34d   :  { %v1222_v42 = vmul.f32 %v3677_v62, %v1206_v39 }
 0x34f   :  { %v1238_v28 = vadd.f32 %v1222_v42, %v728_v12 }
 0x351   :  { %3789 = vmatmul.msk.f32.gmra.mxu2 %vm601_vm5, %v1238_v28  ;;  %3805 = vmatmul.msk.f32.gmra.mxu3 %vm601_vm5, %v1238_v28 }
 0x352   :  { %v5117_v40 = vpop.f32.mrf.mxu2  ;;  %v5143_v37 = vpop.f32.mrf.mxu3 }
 0x35a   :  { %v5121_v60 = vpop.f32.mrf.mxu2  ;;  %v5149_v62 = vpop.f32.mrf.mxu3 }
 0x362   :  { %v5123_v6 = vpop.f32.mrf.mxu2  ;;  %v5151_v42 = vpop.f32.mrf.mxu3 }
 0x36a   :  { %v5153_v28 = vpop.f32.mrf.mxu3 }
 0x387   :  { %v997_v48 = vpop.xlane.xlu0 %996 }
 0x388   :  { %v1015_v52 = vmul.f32 %v997_v48, %v4757_v56 }
 0x38a   :  { %v1031_v49 = vadd.f32 1e-06, %v1015_v52  ;;  %v1257_v52 = vld [vmem:[%s6844_s10] sm:$0x3] }
 0x38c   :  { %3980 = vrsqrt.f32 %v1031_v49  ;;  %vm1179_vm4 = vweird.f32 %v1031_v49 }
 0x38f   :  { %v1000_v51 = vpop.xlane.xlu1 %999 }
 0x390   :  { %v1016_v53 = vmul.f32 %v1000_v51, %v4757_v56  ;;  %v5158_v51 = vperm.slane %v1257_v52, 0 }
 0x392   :  { %v3981_v59 = vpop.eup %3980  ;;  %v1032_v26 = vadd.f32 1e-06, %v1016_v53 }
 0x393   :  { %v1174_v25 = vmul.f32 %v3981_v59, %v1031_v49  ;;  %vm1180_vm3 = vweird.f32 %v3981_v59  ;;  %v1408_v49 = vpop.f32.mrf.mxu3 }
 0x394   :  { %3982 = vrsqrt.f32 %v1032_v26  ;;  %vm1181_vm6 = vmor %vm1179_vm4, %vm1180_vm3  ;;  %vm1189_vm8 = vweird.f32 %v1032_v26 }
 0x395   :  { %v1175_v57 = vmul.f32 %v3981_v59, %v1174_v25 }
 0x397   :  { %v1176_v63 = vmul.f32 0.5, %v1175_v57 }
 0x399   :  { %v1177_v0 = vsub.f32 1.5, %v1176_v63 }
 0x39a   :  { %v3983_v4 = vpop.eup %3982 }
 0x39b   :  { %v1178_v5 = vmul.f32 %v3981_v59, %v1177_v0  ;;  %v1184_v50 = vmul.f32 %v3983_v4, %v1032_v26  ;;  %vm1190_vm7 = vweird.f32 %v3983_v4  ;;  %v1411_v26 = vpop.f32.mrf.mxu3  ;;  %v5177_v0 = vadd.f32 %v5117_v40, %v5158_v51 }
 0x39c   :  { %vm1191_vm9 = vmor %vm1189_vm8, %vm1190_vm7 }
 0x39d   :  { %v1182_v9 = vsel %vm1181_vm6, %v3981_v59, %v1178_v5  ;;  %v1185_v44 = vmul.f32 %v3983_v4, %v1184_v50  ;;  %v5183_v5 = vadd.f32 %v5111_v1, %v5158_v51 }
 0x39e   :  { %v1207_v10 = vmul.f32 %v1182_v9, %v5029_v2 }
 0x39f   :  { %v1186_v13 = vmul.f32 0.5, %v1185_v44 }
 0x3a0   :  { %v1223_v17 = vmul.f32 %v3678_v61, %v1207_v10 }
 0x3a1   :  { %v1187_v54 = vsub.f32 1.5, %v1186_v13 }
 0x3a2   :  { %v1239_v30 = vadd.f32 %v1223_v17, %v729_v16  ;;  %v1260_v17 = vperm.slane %v1257_v52, 1 }
 0x3a3   :  { %v1188_v20 = vmul.f32 %v3983_v4, %v1187_v54 }
 0x3a4   :  { %v1349_v21 = vpop.f32.mrf.mxu2  ;;  %3790 = vmatmul.msk.f32.gmra.mxu2 %vm601_vm5, %v1239_v30  ;;  %3806 = vmatmul.msk.f32.gmra.mxu3 %vm601_vm5, %v1239_v30  ;;  %v1414_v57 = vpop.f32.mrf.mxu3 }
 0x3a5   :  { %v1192_v2 = vsel %vm1191_vm9, %v3983_v4, %v1188_v20  ;;  %v5171_v63 = vadd.f32 %v1349_v21, %v5158_v51 }
 0x3a6   :  { %v1208_v32 = vmul.f32 %v1192_v2, %v5037_v34 }
 0x3a8   :  { %v1224_v36 = vmul.f32 %v3679_v29, %v1208_v32 }
 0x3aa   :  { %v1240_v14 = vadd.f32 %v1224_v36, %v730_v15 }
 0x3ac   :  { %v5145_v35 = vpop.f32.mrf.mxu2  ;;  %3791 = vmatmul.msk.f32.gmra.mxu2 %vm601_vm5, %v1240_v14  ;;  %3807 = vmatmul.msk.f32.gmra.mxu3 %vm601_vm5, %v1240_v14  ;;  %v1417_v4 = vpop.f32.mrf.mxu3 }
 0x3ad   :  { %v1418_v52 = vadd.f32 %v1417_v4, %v1260_v17  ;;  %v1409_v4 = vadd.f32 %v1408_v49, %v1260_v17  ;;  %v1397_v49 = vadd.f32 %v5143_v37, %v1260_v17 }
 0x3b4   :  { %v1355_v39 = vpop.f32.mrf.mxu2  ;;  %v1420_v50 = vpop.f32.mrf.mxu3 }
 0x3b5   :  { %v5206_v14 = vadd.f32 %v1355_v39, %v5158_v51  ;;  %v5218_v39 = vadd.f32 %v5123_v6, %v5158_v51  ;;  %v1403_v6 = vadd.f32 %v5151_v42, %v1260_v17 }
 0x3bc   :  { %v1358_v12 = vpop.f32.mrf.mxu2  ;;  %v1423_v9 = vpop.f32.mrf.mxu3 }
 0x3bd   :  { %v5166_v25 = vadd.f32 %v1358_v12, %v5158_v51  ;;  %v1424_v12 = vadd.f32 %v1423_v9, %v1260_v17  ;;  %v1412_v9 = vadd.f32 %v1411_v26, %v1260_v17  ;;  %v1400_v26 = vadd.f32 %v5149_v62, %v1260_v17 }
 0x3c4   :  { %v1361_v34 = vpop.f32.mrf.mxu2  ;;  %v1426_v44 = vpop.f32.mrf.mxu3 }
 0x3c5   :  { %v5203_v15 = vadd.f32 %v1361_v34, %v5158_v51  ;;  %v1427_v36 = vadd.f32 %v1426_v44, %v1260_v17  ;;  %v5214_v34 = vadd.f32 %v5145_v35, %v5158_v51  ;;  %v1406_v35 = vadd.f32 %v5153_v28, %v1260_v17 }
 0x3c6   :  { %v1394_v28 = vadd.f32 %v5129_v7, %v1260_v17 }
 0x3cc   :  { %v1364_v48 = vpop.f32.mrf.mxu2  ;;  %v1429_v61 = vpop.f32.mrf.mxu3 }
 0x3cd   :  { %v5196_v21 = vadd.f32 %v1364_v48, %v5158_v51  ;;  %v1430_v32 = vadd.f32 %v1429_v61, %v1260_v17  ;;  %v1421_v48 = vadd.f32 %v1420_v50, %v1260_v17  ;;  %v1338_v50 = vadd.f32 %v5115_v47, %v5158_v51 }
 0x3ce   :  { %v1329_v47 = vadd.f32 %v5109_v43, %v5158_v51 }
 0x3d4   :  { %v1367_v53 = vpop.f32.mrf.mxu2  ;;  %v1432_v10 = vpop.f32.mrf.mxu3 }
 0x3d5   :  { %v5161_v59 = vadd.f32 %v1367_v53, %v5158_v51  ;;  %v1433_v29 = vadd.f32 %v1432_v10, %v1260_v17  ;;  %v1415_v53 = vadd.f32 %v1414_v57, %v1260_v17  ;;  %v1344_v57 = vadd.f32 %v5121_v60, %v5158_v51 }
 0x3d6   :  { %v1335_v60 = vadd.f32 %v5113_v33, %v5158_v51 }
 0x3d7   :  { %1483 = vrot.lane.b32.xlu1 %v5161_v59, %s4181_s22 }
 0x3df   :  { %1477 = vrot.lane.b32.xlu1 %v5166_v25, %s4181_s22 }
 0x3e7   :  { %1471 = vrot.lane.b32.xlu1 %v5171_v63, %s4181_s22 }
 0x3ef   :  { %1465 = vrot.lane.b32.xlu1 %v5177_v0, %s4181_s22 }
 0x3f7   :  { %1459 = vrot.lane.b32.xlu1 %v5183_v5, %s4181_s22 }
 0x427   :  { %v1370_v13 = vpop.f32.mrf.mxu2  ;;  %v1435_v16 = vpop.f32.mrf.mxu3 }
 0x428   :  { %v5188_v40 = vadd.f32 %v1370_v13, %v5158_v51  ;;  %v1436_v2 = vadd.f32 %v1435_v16, %v1260_v17 }
 0x42a   :  { %1485 = vrot.lane.b32.xlu0 %v5188_v40, %s4181_s22 }
 0x42f   :  { %v1373_v54 = vpop.f32.mrf.mxu2  ;;  %v1438_v1 = vpop.f32.mrf.mxu3 }
 0x430   :  { %v5193_v30 = vadd.f32 %v1373_v54, %v5158_v51  ;;  %v1439_v20 = vadd.f32 %v1438_v1, %v1260_v17 }
 0x432   :  { %1810 = vmatpush.msrb.mxu1 %v1439_v20  ;;  %1487 = vrot.lane.b32.xlu2 %v5193_v30, %s4181_s22 }
 0x433   :  { %1481 = vrot.lane.b32.xlu0 %v5196_v21, %s4181_s22 }
 0x434   :  { %1811 = vmatpush.msrb.mxu1 %v1436_v2 }
 0x436   :  { %1812 = vmatpush.msrb.mxu1 %v1433_v29 }
 0x438   :  { %1813 = vmatpush.msrb.mxu1 %v1430_v32 }
 0x43a   :  { %1814 = vmatpush.msrb.mxu1 %v1427_v36  ;;  %1479 = vrot.lane.b32.xlu2 %v5203_v15, %s4181_s22 }
 0x43b   :  { %1475 = vrot.lane.b32.xlu0 %v5206_v14, %s4181_s22 }
 0x43c   :  { %1815 = vmatpush.msrb.mxu1 %v1424_v12 }
 0x43e   :  { %1816 = vmatpush.msrb.mxu1 %v1421_v48 }
 0x440   :  { %1817 = vmatpush.msrb.mxu1 %v1418_v52 }
 0x442   :  { %1818 = vmatpush.msrb.mxu1 %v1415_v53  ;;  %1473 = vrot.lane.b32.xlu2 %v5214_v34, %s4181_s22 }
 0x443   :  { %1469 = vrot.lane.b32.xlu0 %v5218_v39, %s4181_s22 }
 0x444   :  { %1819 = vmatpush.msrb.mxu1 %v1412_v9 }
 0x446   :  { %1820 = vmatpush.msrb.mxu1 %v1409_v4  ;;  %v1639_v4 = vld [vmem:[%s6845_s6 + $0x28] sm:$0xff] }
 0x448   :  { %1821 = vmatpush.msrb.mxu1 %v1406_v35 }
 0x449   :  { %v1484_v37 = vpop.permute.xlu1 %1483 }
 0x44a   :  { %1822 = vmatpush.msrb.mxu1 %v1403_v6  ;;  %1467 = vrot.lane.b32.xlu2 %v1344_v57, %s4181_s22 }
 0x44b   :  { %1463 = vrot.lane.b32.xlu0 %v1338_v50, %s4181_s22 }
 0x44c   :  { %1823 = vmatpush.msrb.mxu1 %v1400_v26 }
 0x44e   :  { %1824 = vmatpush.msrb.mxu1 %v1397_v49 }
 0x450   :  { %1825 = vmatpush.msrb.mxu1 %v1394_v28 }
 0x451   :  { %v1478_v43 = vpop.permute.xlu1 %1477 }
 0x452   :  { %1461 = vrot.lane.b32.xlu2 %v1335_v60, %s4181_s22 }
 0x453   :  { %1457 = vrot.lane.b32.xlu0 %v1329_v47, %s4181_s22 }
 0x459   :  { %v1472_v61 = vpop.permute.xlu1 %1471 }
 0x461   :  { %v1466_v16 = vpop.permute.xlu1 %1465 }
 0x469   :  { %v1460_v1 = vpop.permute.xlu1 %1459 }
 0x48c   :  { %v1488_v62 = vpop.permute.xlu2 %1487 }
 0x48d   :  { %3808 = vmatpush.xpose.msk.msrb.mxu0 %vm601_vm5, %v1488_v62 }
 0x494   :  { %v1480_v33 = vpop.permute.xlu2 %1479 }
 0x49c   :  { %v1486_v42 = vpop.permute.xlu0 %1485  ;;  %v1474_v44 = vpop.permute.xlu2 %1473 }
 0x49d   :  { %3809 = vmatpush.xpose.msk.msrb.mxu0 %vm601_vm5, %v1486_v42 }
 0x4a1   :  { %3810 = vmatpush.xpose.msk.msrb.mxu0 %vm601_vm5, %v1484_v37 }
 0x4a4   :  { %v1468_v13 = vpop.permute.xlu2 %1467 }
 0x4a5   :  { %v1482_v7 = vpop.permute.xlu0 %1481 }
 0x4a6   :  { %3811 = vmatpush.xpose.msk.msrb.mxu0 %vm601_vm5, %v1482_v7 }
 0x4aa   :  { %3812 = vmatpush.xpose.msk.msrb.mxu0 %vm601_vm5, %v1480_v33 }
 0x4ac   :  { %v1462_v54 = vpop.permute.xlu2 %1461 }
 0x4ad   :  { %v1476_v51 = vpop.permute.xlu0 %1475 }
 0x4ae   :  { %3813 = vmatpush.xpose.msk.msrb.mxu0 %vm601_vm5, %v1478_v43 }
 0x4b2   :  { %3814 = vmatpush.xpose.msk.msrb.mxu0 %vm601_vm5, %v1476_v51 }
 0x4b5   :  { %v1470_v10 = vpop.permute.xlu0 %1469 }
 0x4b6   :  { %3815 = vmatpush.xpose.msk.msrb.mxu0 %vm601_vm5, %v1474_v44 }
 0x4ba   :  { %3816 = vmatpush.xpose.msk.msrb.mxu0 %vm601_vm5, %v1472_v61 }
 0x4bd   :  { %v1464_v17 = vpop.permute.xlu0 %1463 }
 0x4be   :  { %3817 = vmatpush.xpose.msk.msrb.mxu0 %vm601_vm5, %v1470_v10 }
 0x4c2   :  { %3818 = vmatpush.xpose.msk.msrb.mxu0 %vm601_vm5, %v1468_v13 }
 0x4c5   :  { %v1458_v20 = vpop.permute.xlu0 %1457 }
 0x4c6   :  { %3819 = vmatpush.xpose.msk.msrb.mxu0 %vm601_vm5, %v1466_v16  ;;  %v1642_v16 = vld [vmem:[%s6845_s6 + $0x40] sm:$0xff] }
 0x4ca   :  { %3820 = vmatpush.xpose.msk.msrb.mxu0 %vm601_vm5, %v1464_v17 }
 0x4ce   :  { %3821 = vmatpush.xpose.msk.msrb.mxu0 %vm601_vm5, %v1462_v54 }
 0x4d2   :  { %3822 = vmatpush.xpose.msk.msrb.mxu0 %vm601_vm5, %v1460_v1 }
 0x4d6   :  { %3823 = vmatpush.xpose.msk.msrb.mxu0 %vm601_vm5, %v1458_v20 }
 0x4d9   :  { %3824 = vmatmul.msk.f32.vlgmr.msrb.gmra.mxu0 %vm601_vm5, %v1329_v47 }
 0x4e1   :  { %3825 = vmatmul.msk.f32.gmra.mxu0 %vm601_vm5, %v5183_v5 }
 0x4e9   :  { %3826 = vmatmul.msk.f32.gmra.mxu0 %vm601_vm5, %v1335_v60  ;;  %v1641_v60 = vld [vmem:[%s6845_s6 + $0x38] sm:$0xff] }
 0x4f1   :  { %3827 = vmatmul.msk.f32.gmra.mxu0 %vm601_vm5, %v1338_v50  ;;  %v1640_v50 = vld [vmem:[%s6845_s6 + $0x30] sm:$0xff] }
 0x4f9   :  { %3828 = vmatmul.msk.f32.gmra.mxu0 %vm601_vm5, %v5177_v0 }
 0x501   :  { %3829 = vmatmul.msk.f32.gmra.mxu0 %vm601_vm5, %v1344_v57 }
 0x509   :  { %3830 = vmatmul.msk.f32.gmra.mxu0 %vm601_vm5, %v5218_v39 }
 0x511   :  { %3831 = vmatmul.msk.f32.gmra.mxu0 %vm601_vm5, %v5171_v63 }
 0x519   :  { %3832 = vmatmul.msk.f32.gmra.mxu0 %vm601_vm5, %v5214_v34  ;;  %v1638_v34 = vld [vmem:[%s6845_s6 + $0x20] sm:$0xff] }
 0x521   :  { %3833 = vmatmul.msk.f32.gmra.mxu0 %vm601_vm5, %v5206_v14  ;;  %v1637_v14 = vld [vmem:[%s6845_s6 + $0x18] sm:$0xff] }
 0x529   :  { %3834 = vmatmul.msk.f32.gmra.mxu0 %vm601_vm5, %v5166_v25  ;;  %v1634_v25 = vld [vmem:[%s6845_s6] sm:$0xff] }
 0x531   :  { %3835 = vmatmul.msk.f32.gmra.mxu0 %vm601_vm5, %v5203_v15 }
 0x539   :  { %3836 = vmatmul.msk.f32.gmra.mxu0 %vm601_vm5, %v5196_v21  ;;  %v1635_v21 = vld [vmem:[%s6845_s6 + $0x8] sm:$0xff] }
 0x541   :  { %3837 = vmatmul.msk.f32.gmra.mxu0 %vm601_vm5, %v5161_v59 }
 0x549   :  { %3838 = vmatmul.msk.f32.gmra.mxu0 %vm601_vm5, %v5188_v40 }
 0x551   :  { %3839 = vmatmul.msk.f32.gmra.mxu0 %vm601_vm5, %v5193_v30  ;;  %v1636_v30 = vld [vmem:[%s6845_s6 + $0x10] sm:$0xff] }
 0x556   :  { %v1570_v63 = vpop.f32.mrf.mxu0 }
 0x557   :  { %v1618_v0 = vmul.f32 0.125, %v1570_v63 }
 0x559   :  { %v1650_v5 = vadd.f32 %v1634_v25, %v1618_v0 }
 0x55b   :  { %1666 = vmax.xlane.f32.xlu2 %v1650_v5 }
 0x55e   :  { %v1573_v2 = vpop.f32.mrf.mxu0 }
 0x55f   :  { %v1619_v59 = vmul.f32 0.125, %v1573_v2 }
 0x561   :  { %v1651_v29 = vadd.f32 %v1635_v21, %v1619_v59 }
 0x563   :  { %1668 = vmax.xlane.f32.xlu1 %v1651_v29 }
 0x566   :  { %v1576_v40 = vpop.f32.mrf.mxu0 }
 0x567   :  { %v1620_v32 = vmul.f32 0.125, %v1576_v40 }
 0x569   :  { %v1652_v15 = vadd.f32 %v1636_v30, %v1620_v32 }
 0x56b   :  { %1670 = vmax.xlane.f32.xlu0 %v1652_v15 }
 0x56e   :  { %v1579_v36 = vpop.f32.mrf.mxu0 }
 0x56f   :  { %v1621_v12 = vmul.f32 0.125, %v1579_v36 }
 0x571   :  { %v1653_v48 = vadd.f32 %v1637_v14, %v1621_v12 }
 0x573   :  { %1672 = vmax.xlane.f32.xlu2 %v1653_v48 }
 0x576   :  { %v1582_v52 = vpop.f32.mrf.mxu0 }
 0x577   :  { %v1622_v53 = vmul.f32 0.125, %v1582_v52 }
 0x579   :  { %v1654_v39 = vadd.f32 %v1638_v34, %v1622_v53 }
 0x57b   :  { %1674 = vmax.xlane.f32.xlu1 %v1654_v39 }
 0x57e   :  { %v1585_v9 = vpop.f32.mrf.mxu0 }
 0x57f   :  { %v1623_v35 = vmul.f32 0.125, %v1585_v9  ;;  %v1645_v9 = vld [vmem:[%s6845_s6 + $0x58] sm:$0xff] }
 0x581   :  { %v5303_v57 = vadd.f32 %v1639_v4, %v1623_v35 }
 0x583   :  { %1676 = vmax.xlane.f32.xlu0 %v5303_v57 }
 0x586   :  { %v1588_v6 = vpop.f32.mrf.mxu0 }
 0x587   :  { %v1624_v26 = vmul.f32 0.125, %v1588_v6 }
 0x589   :  { %v5309_v49 = vadd.f32 %v1640_v50, %v1624_v26 }
 0x58b   :  { %1678 = vmax.xlane.f32.xlu2 %v5309_v49 }
 0x58e   :  { %v1591_v28 = vpop.f32.mrf.mxu0 }
 0x58f   :  { %v1625_v47 = vmul.f32 0.125, %v1591_v28 }
 0x591   :  { %v5315_v62 = vadd.f32 %v1641_v60, %v1625_v47  ;;  %v1646_v60 = vld [vmem:[%s6845_s6 + $0x60] sm:$0xff] }
 0x593   :  { %1680 = vmax.xlane.f32.xlu0 %v5315_v62 }
 0x596   :  { %v1594_v42 = vpop.f32.mrf.mxu0 }
 0x597   :  { %v1626_v13 = vmul.f32 0.125, %v1594_v42 }
 0x599   :  { %v5324_v20 = vadd.f32 %v1642_v16, %v1626_v13 }
 0x59e   :  { %v1597_v43 = vpop.f32.mrf.mxu0 }
 0x59f   :  { %v1627_v0 = vmul.f32 0.125, %v1597_v43  ;;  %v1647_v43 = vld [vmem:[%s6845_s6 + $0x68] sm:$0xff] }
 0x5a6   :  { %v1600_v54 = vpop.f32.mrf.mxu0 }
 0x5a7   :  { %v1628_v32 = vmul.f32 0.125, %v1600_v54  ;;  %v1648_v54 = vld [vmem:[%s6845_s6 + $0x70] sm:$0xff] }
 0x5ae   :  { %v1603_v40 = vpop.f32.mrf.mxu0 }
 0x5af   :  { %v1629_v53 = vmul.f32 0.125, %v1603_v40 }
 0x5b6   :  { %v1606_v34 = vpop.f32.mrf.mxu0 }
 0x5b7   :  { %v1630_v26 = vmul.f32 0.125, %v1606_v34 }
 0x5be   :  { %v1609_v28 = vpop.f32.mrf.mxu0 }
 0x5ce   :  { %v1667_v37 = vpop.xlane.xlu2 %1666 }
 0x5cf   :  { %v1698_v7 = vsub.f32 %v1650_v5, %v1667_v37  ;;  %v1643_v5 = vld [vmem:[%s6845_s6 + $0x48] sm:$0xff] }
 0x5d0   :  { %v5333_v59 = vadd.f32 %v1643_v5, %v1627_v0  ;;  %v1649_v5 = vld [vmem:[%s6845_s6 + $0x78] sm:$0xff] }
 0x5d1   :  { %v1714_v33 = vmul.f32 1.442695, %v1698_v7 }
 0x5d3   :  { %3984 = vpow2.f32 %v1714_v33  ;;  %v1631_v33 = vmul.f32 0.125, %v1609_v28 }
 0x5d6   :  { %v1669_v51 = vpop.xlane.xlu1 %1668 }
 0x5d7   :  { %v1699_v44 = vsub.f32 %v1651_v29, %v1669_v51 }
 0x5d9   :  { %v5318_v61 = vpop.eup %3984  ;;  %v1716_v10 = vmul.f32 1.442695, %v1699_v44  ;;  %v1612_v44 = vpop.f32.mrf.mxu0 }
 0x5da   :  { %1746 = vadd.xlane.f32.xlu1 %v5318_v61 }
 0x5db   :  { %3986 = vpow2.f32 %v1716_v10 }
 0x5de   :  { %v1671_v17 = vpop.xlane.xlu0 %1670 }
 0x5df   :  { %v1700_v1 = vsub.f32 %v1652_v15, %v1671_v17  ;;  %v1644_v15 = vld [vmem:[%s6845_s6 + $0x50] sm:$0xff]  ;;  %v1632_v17 = vmul.f32 0.125, %v1612_v44 }
 0x5e0   :  { %v5342_v12 = vadd.f32 %v1644_v15, %v1628_v32 }
 0x5e1   :  { %v5326_v63 = vpop.eup %3986  ;;  %v1718_v25 = vmul.f32 1.442695, %v1700_v1  ;;  %v5381_v1 = vadd.f32 %v1648_v54, %v1632_v17 }
 0x5e2   :  { %1748 = vadd.xlane.f32.xlu2 %v5326_v63  ;;  %1682 = vmax.xlane.f32.xlu1 %v5324_v20 }
 0x5e3   :  { %3988 = vpow2.f32 %v1718_v25 }
 0x5e6   :  { %v1673_v2 = vpop.xlane.xlu2 %1672 }
 0x5e7   :  { %v1701_v21 = vsub.f32 %v1653_v48, %v1673_v2 }
 0x5e9   :  { %v5335_v29 = vpop.eup %3988  ;;  %v1720_v30 = vmul.f32 1.442695, %v1701_v21 }
 0x5ea   :  { %1750 = vadd.xlane.f32.xlu0 %v5335_v29  ;;  %1684 = vmax.xlane.f32.xlu2 %v5333_v59 }
 0x5eb   :  { %3990 = vpow2.f32 %v1720_v30 }
 0x5ee   :  { %v1675_v36 = vpop.xlane.xlu1 %1674 }
 0x5ef   :  { %v1702_v14 = vsub.f32 %v1654_v39, %v1675_v36  ;;  %v5352_v39 = vadd.f32 %v1645_v9, %v1629_v53 }
 0x5f1   :  { %v5344_v48 = vpop.eup %3990  ;;  %v1722_v52 = vmul.f32 1.442695, %v1702_v14 }
 0x5f2   :  { %1752 = vadd.xlane.f32.xlu1 %v5344_v48  ;;  %1686 = vmax.xlane.f32.xlu0 %v5342_v12 }
 0x5f3   :  { %3992 = vpow2.f32 %v1722_v52 }
 0x5f6   :  { %v1677_v4 = vpop.xlane.xlu0 %1676 }
 0x5f7   :  { %v1703_v35 = vsub.f32 %v5303_v57, %v1677_v4  ;;  %v5362_v57 = vadd.f32 %v1646_v60, %v1630_v26 }
 0x5f9   :  { %v5354_v6 = vpop.eup %3992  ;;  %v1724_v50 = vmul.f32 1.442695, %v1703_v35 }
 0x5fa   :  { %1754 = vadd.xlane.f32.xlu2 %v5354_v6  ;;  %1688 = vmax.xlane.f32.xlu1 %v5352_v39 }
 0x5fb   :  { %3994 = vpow2.f32 %v1724_v50 }
 0x5fe   :  { %v1679_v47 = vpop.xlane.xlu2 %1678 }
 0x5ff   :  { %v1704_v42 = vsub.f32 %v5309_v49, %v1679_v47  ;;  %v5372_v49 = vadd.f32 %v1647_v43, %v1631_v33 }
 0x601   :  { %v5364_v37 = vpop.eup %3994  ;;  %v1726_v7 = vmul.f32 1.442695, %v1704_v42 }
 0x602   :  { %1756 = vadd.xlane.f32.xlu0 %v5364_v37  ;;  %1690 = vmax.xlane.f32.xlu2 %v5362_v57 }
 0x603   :  { %3996 = vpow2.f32 %v1726_v7 }
 0x606   :  { %v1681_v51 = vpop.xlane.xlu0 %1680 }
 0x607   :  { %v1705_v10 = vsub.f32 %v5315_v62, %v1681_v51  ;;  %v1615_v62 = vpop.f32.mrf.mxu0 }
 0x608   :  { %v1633_v0 = vmul.f32 0.125, %v1615_v62  ;;  %v1881_v62 = vld [vmem:[%s6846_s11 + $0x30] sm:$0xff] }
 0x609   :  { %v5374_v13 = vpop.eup %3996  ;;  %v1728_v16 = vmul.f32 1.442695, %v1705_v10 }
 0x60a   :  { %1758 = vadd.xlane.f32.xlu1 %v5374_v13  ;;  %1692 = vmax.xlane.f32.xlu0 %v5372_v49  ;;  %v5390_v2 = vadd.f32 %v1649_v5, %v1633_v0  ;;  %v1880_v0 = vld [vmem:[%s6846_s11 + $0x28] sm:$0xff] }
 0x60b   :  { %3998 = vpow2.f32 %v1728_v16 }
 0x611   :  { %v5383_v25 = vpop.eup %3998 }
 0x612   :  { %1760 = vadd.xlane.f32.xlu2 %v5383_v25  ;;  %1694 = vmax.xlane.f32.xlu1 %v5381_v1 }
 0x61a   :  { %1696 = vmax.xlane.f32.xlu2 %v5390_v2 }
 0x64d   :  { %v1747_v21 = vpop.xlane.xlu1 %1746 }
 0x64e   :  { %4000 = vrcp.f32 %v1747_v21 }
 0x654   :  { %v4001_v40 = vpop.eup %4000 }
 0x655   :  { %v1749_v30 = vpop.xlane.xlu2 %1748  ;;  %v1683_v32 = vpop.xlane.xlu1 %1682  ;;  %v1794_v15 = vmul.f32 %v4001_v40, %v5318_v61 }
 0x656   :  { %4002 = vrcp.f32 %v1749_v30  ;;  %v1706_v36 = vsub.f32 %v5324_v20, %v1683_v32  ;;  %v1878_v30 = vld [vmem:[%s6846_s11 + $0x18] sm:$0xff] }
 0x657   :  { %1826 = vmatmul.f32.vlgmr.msrb.gmra.mxu1 %v1794_v15  ;;  %v1877_v15 = vld [vmem:[%s6846_s11 + $0x10] sm:$0xff] }
 0x658   :  { %v1730_v14 = vmul.f32 1.442695, %v1706_v36 }
 0x65a   :  { %4004 = vpow2.f32 %v1730_v14 }
 0x65c   :  { %v4003_v52 = vpop.eup %4002 }
 0x65d   :  { %v1751_v34 = vpop.xlane.xlu0 %1750  ;;  %v1685_v53 = vpop.xlane.xlu2 %1684  ;;  %v1795_v9 = vmul.f32 %v4003_v52, %v5326_v63 }
 0x65e   :  { %4006 = vrcp.f32 %v1751_v34  ;;  %v1707_v4 = vsub.f32 %v5333_v59, %v1685_v53 }
 0x65f   :  { %1829 = vmatmul.f32.gmra.mxu1 %v1795_v9 }
 0x660   :  { %v5397_v35 = vpop.eup %4004  ;;  %v1732_v50 = vmul.f32 1.442695, %v1707_v4 }
 0x661   :  { %1762 = vadd.xlane.f32.xlu0 %v5397_v35 }
 0x662   :  { %4008 = vpow2.f32 %v1732_v50 }
 0x664   :  { %v4007_v61 = vpop.eup %4006 }
 0x665   :  { %v1753_v20 = vpop.xlane.xlu1 %1752  ;;  %v1687_v26 = vpop.xlane.xlu0 %1686  ;;  %v1796_v28 = vmul.f32 %v4007_v61, %v5335_v29 }
 0x666   :  { %4010 = vrcp.f32 %v1753_v20  ;;  %v1708_v60 = vsub.f32 %v5342_v12, %v1687_v26  ;;  %v1882_v12 = vld [vmem:[%s6846_s11 + $0x38] sm:$0xff] }
 0x667   :  { %1832 = vmatmul.f32.gmra.mxu1 %v1796_v28  ;;  %1943 = vmatpush.msrb.mxu2 %v1882_v12 }
 0x668   :  { %v5402_v63 = vpop.eup %4008  ;;  %v1734_v47 = vmul.f32 1.442695, %v1708_v60 }
 0x669   :  { %1764 = vadd.xlane.f32.xlu1 %v5402_v63  ;;  %1944 = vmatpush.msrb.mxu2 %v1881_v62 }
 0x66a   :  { %4012 = vpow2.f32 %v1734_v47 }
 0x66b   :  { %1945 = vmatpush.msrb.mxu2 %v1880_v0 }
 0x66c   :  { %v4011_v59 = vpop.eup %4010 }
 0x66d   :  { %v1755_v42 = vpop.xlane.xlu2 %1754  ;;  %v1689_v7 = vpop.xlane.xlu1 %1688  ;;  %v1797_v33 = vmul.f32 %v4011_v59, %v5344_v48 }
 0x66e   :  { %4014 = vrcp.f32 %v1755_v42  ;;  %v1709_v43 = vsub.f32 %v5352_v39, %v1689_v7 }
 0x66f   :  { %1835 = vmatmul.f32.gmra.mxu1 %v1797_v33 }
 0x670   :  { %v5407_v29 = vpop.eup %4012  ;;  %v1736_v51 = vmul.f32 1.442695, %v1709_v43 }
 0x671   :  { %1766 = vadd.xlane.f32.xlu0 %v5407_v29 }
 0x672   :  { %4016 = vpow2.f32 %v1736_v51 }
 0x674   :  { %v4015_v44 = vpop.eup %4014 }
 0x675   :  { %v1757_v10 = vpop.xlane.xlu0 %1756  ;;  %v1691_v16 = vpop.xlane.xlu2 %1690  ;;  %v1798_v48 = vmul.f32 %v4015_v44, %v5354_v6  ;;  %v1879_v6 = vld [vmem:[%s6846_s11 + $0x20] sm:$0xff] }
 0x676   :  { %4018 = vrcp.f32 %v1757_v10  ;;  %v1710_v39 = vsub.f32 %v5362_v57, %v1691_v16  ;;  %1946 = vmatpush.msrb.mxu2 %v1879_v6 }
 0x677   :  { %1838 = vmatmul.f32.gmra.mxu1 %v1798_v48 }
 0x678   :  { %v5415_v17 = vpop.eup %4016  ;;  %v1738_v54 = vmul.f32 1.442695, %v1710_v39  ;;  %1947 = vmatpush.msrb.mxu2 %v1878_v30 }
 0x679   :  { %1768 = vadd.xlane.f32.xlu2 %v5415_v17 }
 0x67a   :  { %4020 = vpow2.f32 %v1738_v54  ;;  %1948 = vmatpush.msrb.mxu2 %v1877_v15 }
 0x67c   :  { %v4019_v57 = vpop.eup %4018 }
 0x67d   :  { %v1759_v5 = vpop.xlane.xlu1 %1758  ;;  %v1693_v21 = vpop.xlane.xlu0 %1692  ;;  %v1799_v40 = vmul.f32 %v4019_v57, %v5364_v37  ;;  %v1876_v37 = vld [vmem:[%s6846_s11 + $0x8] sm:$0xff] }
 0x67e   :  { %4022 = vrcp.f32 %v1759_v5  ;;  %v1711_v32 = vsub.f32 %v5372_v49, %v1693_v21  ;;  %1949 = vmatpush.msrb.mxu2 %v1876_v37 }
 0x67f   :  { %1841 = vmatmul.f32.gmra.mxu1 %v1799_v40 }
 0x680   :  { %v5435_v36 = vpop.eup %4020  ;;  %v1740_v14 = vmul.f32 1.442695, %v1711_v32 }
 0x681   :  { %1770 = vadd.xlane.f32.xlu1 %v5435_v36 }
 0x682   :  { %4024 = vpow2.f32 %v1740_v14 }
 0x684   :  { %v4023_v52 = vpop.eup %4022 }
 0x685   :  { %v1761_v49 = vpop.xlane.xlu2 %1760  ;;  %v1695_v34 = vpop.xlane.xlu1 %1694  ;;  %v1800_v53 = vmul.f32 %v4023_v52, %v5374_v13  ;;  %v5464_v52 = vld [vmem:[%s6847_s12] ss:$0 sm:$0xff] }
 0x686   :  { %4026 = vrcp.f32 %v1761_v49  ;;  %v1712_v9 = vsub.f32 %v5381_v1, %v1695_v34  ;;  %v1875_v1 = vld [vmem:[%s6846_s11] sm:$0xff] }
 0x687   :  { %1844 = vmatmul.f32.gmra.mxu1 %v1800_v53  ;;  %1950 = vmatpush.msrb.mxu2 %v1875_v1  ;;  %v3680_v49 = vld [vmem:[%s6843_s4 + $0x100] sm:$0xff]  ;;  %v3682_v1 = vld [vmem:[%s6843_s4 + $0x110] sm:$0xff] }
 0x688   :  { %v4025_v4 = vpop.eup %4024  ;;  %v1742_v50 = vmul.f32 1.442695, %v1712_v9 }
 0x689   :  { %1772 = vadd.xlane.f32.xlu0 %v4025_v4 }
 0x68a   :  { %4028 = vpow2.f32 %v1742_v50 }
 0x68c   :  { %v4027_v61 = vpop.eup %4026 }
 0x68d   :  { %v1697_v20 = vpop.xlane.xlu2 %1696  ;;  %v1801_v26 = vmul.f32 %v4027_v61, %v5383_v25 }
 0x68e   :  { %v1713_v28 = vsub.f32 %v5390_v2, %v1697_v20  ;;  %v3681_v20 = vld [vmem:[%s6843_s4 + $0x108] sm:$0xff] }
 0x68f   :  { %1847 = vmatmul.f32.gmra.mxu1 %v1801_v26 }
 0x690   :  { %v4029_v60 = vpop.eup %4028  ;;  %v1744_v47 = vmul.f32 1.442695, %v1713_v28 }
 0x691   :  { %1774 = vadd.xlane.f32.xlu2 %v4029_v60 }
 0x692   :  { %4030 = vpow2.f32 %v1744_v47 }
 0x698   :  { %v4031_v13 = vpop.eup %4030 }
 0x699   :  { %1776 = vadd.xlane.f32.xlu1 %v4031_v13 }
 0x6d4   :  { %v1827_v59 = vpop.f32.mrf.mxu1  ;;  %v1763_v42 = vpop.xlane.xlu0 %1762 }
 0x6d5   :  { %4032 = vrcp.f32 %v1763_v42  ;;  %3840 = vmatmul.msk.f32.vlgmr.msrb.gmra.mxu2 %vm601_vm5, %v1827_v59 }
 0x6db   :  { %v4033_v25 = vpop.eup %4032 }
 0x6dc   :  { %v1830_v7 = vpop.f32.mrf.mxu1  ;;  %v1765_v2 = vpop.xlane.xlu1 %1764  ;;  %v1802_v33 = vmul.f32 %v4033_v25, %v5397_v35 }
 0x6dd   :  { %4034 = vrcp.f32 %v1765_v2  ;;  %3841 = vmatmul.msk.f32.gmra.mxu2 %vm601_vm5, %v1830_v7 }
 0x6de   :  { %1850 = vmatmul.f32.gmra.mxu1 %v1802_v33  ;;  %v3683_v33 = vld [vmem:[%s6843_s4 + $0x118] sm:$0xff] }
 0x6e3   :  { %v4035_v43 = vpop.eup %4034 }
 0x6e4   :  { %v1833_v51 = vpop.f32.mrf.mxu1  ;;  %v1767_v12 = vpop.xlane.xlu0 %1766  ;;  %v1803_v44 = vmul.f32 %v4035_v43, %v5402_v63 }
 0x6e5   :  { %4036 = vrcp.f32 %v1767_v12  ;;  %3842 = vmatmul.msk.f32.gmra.mxu2 %vm601_vm5, %v1833_v51 }
 0x6e6   :  { %1853 = vmatmul.f32.gmra.mxu1 %v1803_v44 }
 0x6eb   :  { %v4037_v10 = vpop.eup %4036 }
 0x6ec   :  { %v1836_v16 = vpop.f32.mrf.mxu1  ;;  %v1769_v48 = vpop.xlane.xlu2 %1768  ;;  %v1804_v39 = vmul.f32 %v4037_v10, %v5407_v29 }
 0x6ed   :  { %4038 = vrcp.f32 %v1769_v48  ;;  %3843 = vmatmul.msk.f32.gmra.mxu2 %vm601_vm5, %v1836_v16  ;;  %v3684_v16 = vld [vmem:[%s6843_s4 + $0x120] sm:$0xff] }
 0x6ee   :  { %1856 = vmatmul.f32.gmra.mxu1 %v1804_v39 }
 0x6f3   :  { %v4039_v35 = vpop.eup %4038 }
 0x6f4   :  { %v1839_v54 = vpop.f32.mrf.mxu1  ;;  %v1771_v62 = vpop.xlane.xlu1 %1770  ;;  %v1805_v0 = vmul.f32 %v4039_v35, %v5415_v17 }
 0x6f5   :  { %4040 = vrcp.f32 %v1771_v62  ;;  %3844 = vmatmul.msk.f32.gmra.mxu2 %vm601_vm5, %v1839_v54 }
 0x6f6   :  { %1859 = vmatmul.f32.gmra.mxu1 %v1805_v0  ;;  %v3685_v0 = vld [vmem:[%s6843_s4 + $0x128] sm:$0xff] }
 0x6fb   :  { %v4041_v63 = vpop.eup %4040 }
 0x6fc   :  { %v1842_v6 = vpop.f32.mrf.mxu1  ;;  %v1773_v57 = vpop.xlane.xlu0 %1772  ;;  %v1806_v5 = vmul.f32 %v4041_v63, %v5435_v36 }
 0x6fd   :  { %4042 = vrcp.f32 %v1773_v57  ;;  %3845 = vmatmul.msk.f32.gmra.mxu2 %vm601_vm5, %v1842_v6 }
 0x6fe   :  { %1862 = vmatmul.f32.gmra.mxu1 %v1806_v5 }
 0x703   :  { %v4043_v29 = vpop.eup %4042 }
 0x704   :  { %v1845_v21 = vpop.f32.mrf.mxu1  ;;  %v1775_v40 = vpop.xlane.xlu2 %1774  ;;  %v1807_v30 = vmul.f32 %v4043_v29, %v4025_v4 }
 0x705   :  { %4044 = vrcp.f32 %v1775_v40  ;;  %3846 = vmatmul.msk.f32.gmra.mxu2 %vm601_vm5, %v1845_v21  ;;  %v3686_v21 = vld [vmem:[%s6843_s4 + $0x130] sm:$0xff] }
 0x706   :  { %1865 = vmatmul.f32.gmra.mxu1 %v1807_v30 }
 0x70b   :  { %v4045_v17 = vpop.eup %4044 }
 0x70c   :  { %v1848_v32 = vpop.f32.mrf.mxu1  ;;  %v1777_v15 = vpop.xlane.xlu1 %1776  ;;  %v1808_v14 = vmul.f32 %v4045_v17, %v4029_v60 }
 0x70d   :  { %4046 = vrcp.f32 %v1777_v15  ;;  %3847 = vmatmul.msk.f32.gmra.mxu2 %vm601_vm5, %v1848_v32 }
 0x70e   :  { %1868 = vmatmul.f32.gmra.mxu1 %v1808_v14 }
 0x713   :  { %v4047_v36 = vpop.eup %4046 }
 0x714   :  { %v1809_v37 = vmul.f32 %v4047_v36, %v4031_v13 }
 0x716   :  { %1871 = vmatmul.f32.gmra.mxu1 %v1809_v37 }
 0x758   :  { %v1952_v34 = vpop.f32.mrf.mxu2 }
 0x759   :  { %v1953_v53 = vadd.f32 %v5464_v52, %v1952_v34 }
 0x75b   :  { %v2000_v9 = vmul.f32 %v3680_v49, %v1953_v53  ;;  %v1851_v4 = vpop.f32.mrf.mxu1 }
 0x75c   :  { %3848 = vmatmul.msk.f32.gmra.mxu2 %vm601_vm5, %v1851_v4 }
 0x75d   :  { %v5472_v50 = vadd.f32 %v2000_v9, %v4707_v8 }
 0x75f   :  { %v2032_v61 = vsel %vm601_vm5, %v5472_v50, 0.0 }
 0x760   :  { %v1955_v26 = vpop.f32.mrf.mxu2  ;;  %2033 = vadd.xlane.f32.xlu0 %v2032_v61 }
 0x761   :  { %v1956_v28 = vadd.f32 %v5464_v52, %v1955_v26 }
 0x763   :  { %v2001_v60 = vmul.f32 %v3681_v20, %v1956_v28  ;;  %v1854_v47 = vpop.f32.mrf.mxu1 }
 0x764   :  { %3849 = vmatmul.msk.f32.gmra.mxu2 %vm601_vm5, %v1854_v47  ;;  %v3688_v47 = vld [vmem:[%s6843_s4 + $0x140] sm:$0xff] }
 0x765   :  { %v5482_v13 = vadd.f32 %v2001_v60, %v4712_v18 }
 0x767   :  { %v2035_v8 = vsel %vm601_vm5, %v5482_v13, 0.0 }
 0x768   :  { %v1958_v59 = vpop.f32.mrf.mxu2  ;;  %2036 = vadd.xlane.f32.xlu2 %v2035_v8 }
 0x769   :  { %v1959_v42 = vadd.f32 %v5464_v52, %v1958_v59 }
 0x76b   :  { %v2002_v25 = vmul.f32 %v3682_v1, %v1959_v42  ;;  %v1857_v7 = vpop.f32.mrf.mxu1 }
 0x76c   :  { %3850 = vmatmul.msk.f32.gmra.mxu2 %vm601_vm5, %v1857_v7 }
 0x76d   :  { %v5492_v2 = vadd.f32 %v2002_v25, %v4717_v22 }
 0x76f   :  { %v2038_v18 = vsel %vm601_vm5, %v5492_v2, 0.0 }
 0x770   :  { %v1961_v43 = vpop.f32.mrf.mxu2  ;;  %2039 = vadd.xlane.f32.xlu1 %v2038_v18 }
 0x771   :  { %v1962_v51 = vadd.f32 %v5464_v52, %v1961_v43 }
 0x773   :  { %v2003_v12 = vmul.f32 %v3683_v33, %v1962_v51  ;;  %v1860_v44 = vpop.f32.mrf.mxu1  ;;  %v3689_v51 = vld [vmem:[%s6843_s4 + $0x148] sm:$0xff] }
 0x774   :  { %3851 = vmatmul.msk.f32.gmra.mxu2 %vm601_vm5, %v1860_v44 }
 0x775   :  { %v5502_v10 = vadd.f32 %v2003_v12, %v4722_v24 }
 0x777   :  { %v2041_v22 = vsel %vm601_vm5, %v5502_v10, 0.0 }
 0x778   :  { %v1964_v48 = vpop.f32.mrf.mxu2  ;;  %2042 = vadd.xlane.f32.xlu0 %v2041_v22 }
 0x779   :  { %v1965_v39 = vadd.f32 %v5464_v52, %v1964_v48 }
 0x77b   :  { %v2004_v35 = vmul.f32 %v3684_v16, %v1965_v39  ;;  %v1863_v54 = vpop.f32.mrf.mxu1 }
 0x77c   :  { %3852 = vmatmul.msk.f32.gmra.mxu2 %vm601_vm5, %v1863_v54 }
 0x77d   :  { %v5512_v62 = vadd.f32 %v2004_v35, %v4727_v27 }
 0x77f   :  { %v2044_v24 = vsel %vm601_vm5, %v5512_v62, 0.0 }
 0x780   :  { %v1967_v63 = vpop.f32.mrf.mxu2  ;;  %2045 = vadd.xlane.f32.xlu2 %v2044_v24 }
 0x781   :  { %v1968_v6 = vadd.f32 %v5464_v52, %v1967_v63 }
 0x783   :  { %v2005_v57 = vmul.f32 %v3685_v0, %v1968_v6  ;;  %v1866_v5 = vpop.f32.mrf.mxu1  ;;  %v3690_v0 = vld [vmem:[%s6843_s4 + $0x150] sm:$0xff] }
 0x784   :  { %3853 = vmatmul.msk.f32.gmra.mxu2 %vm601_vm5, %v1866_v5 }
 0x785   :  { %v5522_v29 = vadd.f32 %v2005_v57, %v4740_v38 }
 0x787   :  { %v2047_v27 = vsel %vm601_vm5, %v5522_v29, 0.0 }
 0x788   :  { %v1970_v40 = vpop.f32.mrf.mxu2  ;;  %2048 = vadd.xlane.f32.xlu1 %v2047_v27 }
 0x789   :  { %v1971_v30 = vadd.f32 %v5464_v52, %v1970_v40 }
 0x78b   :  { %v2006_v17 = vmul.f32 %v3686_v21, %v1971_v30  ;;  %v1869_v32 = vpop.f32.mrf.mxu1 }
 0x78c   :  { %3854 = vmatmul.msk.f32.gmra.mxu2 %vm601_vm5, %v1869_v32  ;;  %v3691_v32 = vld [vmem:[%s6843_s4 + $0x158] sm:$0xff] }
 0x78d   :  { %v5532_v15 = vadd.f32 %v2006_v17, %v4745_v41  ;;  %v3687_v41 = vld [vmem:[%s6843_s4 + $0x138] sm:$0xff] }
 0x78f   :  { %v2050_v38 = vsel %vm601_vm5, %v5532_v15, 0.0 }
 0x790   :  { %2051 = vadd.xlane.f32.xlu2 %v2050_v38  ;;  %v1973_v36 = vpop.f32.mrf.mxu2 }
 0x791   :  { %v1974_v34 = vadd.f32 %v5464_v52, %v1973_v36 }
 0x793   :  { %v1872_v14 = vpop.f32.mrf.mxu1  ;;  %v2007_v4 = vmul.f32 %v3687_v41, %v1974_v34 }
 0x794   :  { %3855 = vmatmul.msk.f32.gmra.mxu2 %vm601_vm5, %v1872_v14 }
 0x795   :  { %v5550_v28 = vadd.f32 %v2007_v4, %v4768_v3  ;;  %v2431_v4 = vld [vmem:[%s6848_s13 + $0x78] sm:$0xff] }
 0x796   :  { %2559 = vmatpush.msra.mxu0 %v2431_v4 }
 0x797   :  { %v2053_v25 = vsel %vm601_vm5, %v5550_v28, 0.0 }
 0x7d3   :  { %v2034_v37 = vpop.xlane.xlu0 %2033 }
 0x7d4   :  { %v2080_v49 = vmul.f32 %v2034_v37, %v4757_v56 }
 0x7d6   :  { %v5540_v53 = vsub.f32 %v5472_v50, %v2080_v49 }
 0x7d8   :  { %v2112_v9 = vmul.f32 %v5540_v53, %v5540_v53 }
 0x7da   :  { %v2128_v61 = vsel %vm601_vm5, %v2112_v9, 0.0  ;;  %v2430_v9 = vld [vmem:[%s6848_s13 + $0x70] sm:$0xff] }
 0x7db   :  { %2129 = vadd.xlane.f32.xlu0 %v2128_v61  ;;  %v2037_v20 = vpop.xlane.xlu2 %2036  ;;  %v2428_v61 = vld [vmem:[%s6848_s13 + $0x60] sm:$0xff]  ;;  %2494 = vmatpush.msrb.mxu3 %v2430_v9 }
 0x7dc   :  { %v2081_v26 = vmul.f32 %v2037_v20, %v4757_v56  ;;  %v2429_v20 = vld [vmem:[%s6848_s13 + $0x68] sm:$0xff] }
 0x7dd   :  { %2495 = vmatpush.msrb.mxu3 %v2428_v61  ;;  %2560 = vmatpush.msra.mxu0 %v2429_v20 }
 0x7de   :  { %v5553_v60 = vsub.f32 %v5482_v13, %v2081_v26 }
 0x7df   :  { %v1976_v8 = vpop.f32.mrf.mxu2 }
 0x7e0   :  { %v1977_v1 = vadd.f32 %v5464_v52, %v1976_v8  ;;  %v2113_v59 = vmul.f32 %v5553_v60, %v5553_v60  ;;  %v2426_v8 = vld [vmem:[%s6848_s13 + $0x50] sm:$0xff] }
 0x7e1   :  { %2496 = vmatpush.msrb.mxu3 %v2426_v8 }
 0x7e2   :  { %v2008_v42 = vmul.f32 %v3688_v47, %v1977_v1  ;;  %v2131_v3 = vsel %vm601_vm5, %v2113_v59, 0.0  ;;  %v2427_v1 = vld [vmem:[%s6848_s13 + $0x58] sm:$0xff]  ;;  %v3692_v59 = vld [vmem:[%s6843_s4 + $0x160] sm:$0xff] }
 0x7e3   :  { %2054 = vadd.xlane.f32.xlu0 %v2053_v25  ;;  %v2040_v7 = vpop.xlane.xlu1 %2039  ;;  %2132 = vadd.xlane.f32.xlu1 %v2131_v3 }
 0x7e4   :  { %v2082_v18 = vmul.f32 %v2040_v7, %v4757_v56  ;;  %v5566_v33 = vadd.f32 %v2008_v42, %v4780_v11  ;;  %2561 = vmatpush.msra.mxu0 %v2427_v1 }
 0x7e6   :  { %v5569_v43 = vsub.f32 %v5492_v2, %v2082_v18  ;;  %v2056_v11 = vsel %vm601_vm5, %v5566_v33, 0.0 }
 0x7e7   :  { %v1979_v12 = vpop.f32.mrf.mxu2 }
 0x7e8   :  { %v1980_v44 = vadd.f32 %v5464_v52, %v1979_v12  ;;  %v2114_v22 = vmul.f32 %v5569_v43, %v5569_v43 }
 0x7ea   :  { %v2009_v16 = vmul.f32 %v3689_v51, %v1980_v44  ;;  %v2134_v48 = vsel %vm601_vm5, %v2114_v22, 0.0 }
 0x7eb   :  { %v2043_v39 = vpop.xlane.xlu0 %2042  ;;  %2135 = vadd.xlane.f32.xlu2 %v2134_v48  ;;  %2057 = vadd.xlane.f32.xlu1 %v2056_v11 }
 0x7ec   :  { %v2083_v35 = vmul.f32 %v2043_v39, %v4757_v56  ;;  %v5582_v54 = vadd.f32 %v2009_v16, %v4792_v23  ;;  %v3693_v16 = vld [vmem:[%s6843_s4 + $0x168] sm:$0xff] }
 0x7ee   :  { %v5585_v24 = vsub.f32 %v5502_v10, %v2083_v35  ;;  %v2059_v23 = vsel %vm601_vm5, %v5582_v54, 0.0 }
 0x7ef   :  { %v1982_v63 = vpop.f32.mrf.mxu2 }
 0x7f0   :  { %v1983_v6 = vadd.f32 %v5464_v52, %v1982_v63  ;;  %v2115_v57 = vmul.f32 %v5585_v24, %v5585_v24 }
 0x7f2   :  { %v2010_v5 = vmul.f32 %v3690_v0, %v1983_v6  ;;  %v2137_v27 = vsel %vm601_vm5, %v2115_v57, 0.0  ;;  %v2424_v57 = vld [vmem:[%s6848_s13 + $0x40] sm:$0xff] }
 0x7f3   :  { %2138 = vadd.xlane.f32.xlu0 %v2137_v27  ;;  %2060 = vadd.xlane.f32.xlu2 %v2059_v23  ;;  %v2046_v21 = vpop.xlane.xlu2 %2045  ;;  %v2422_v27 = vld [vmem:[%s6848_s13 + $0x30] sm:$0xff]  ;;  %v2420_v23 = vld [vmem:[%s6848_s13 + $0x20] sm:$0xff] }
 0x7f4   :  { %v2084_v40 = vmul.f32 %v2046_v21, %v4757_v56  ;;  %v5598_v30 = vadd.f32 %v2010_v5, %v4804_v46  ;;  %v2425_v5 = vld [vmem:[%s6848_s13 + $0x48] sm:$0xff]  ;;  %2497 = vmatpush.msrb.mxu3 %v2424_v57 }
 0x7f5   :  { %2562 = vmatpush.msra.mxu0 %v2425_v5  ;;  %v2421_v21 = vld [vmem:[%s6848_s13 + $0x28] sm:$0xff]  ;;  %v3695_v5 = vld [vmem:[%s6843_s4 + $0x178] sm:$0xff] }
 0x7f6   :  { %v5601_v17 = vsub.f32 %v5512_v62, %v2084_v40  ;;  %v2062_v49 = vsel %vm601_vm5, %v5598_v30, 0.0  ;;  %2498 = vmatpush.msrb.mxu3 %v2422_v27  ;;  %v2418_v40 = vld [vmem:[%s6848_s13 + $0x10] sm:$0xff] }
 0x7f7   :  { %v1985_v38 = vpop.f32.mrf.mxu2 }
 0x7f8   :  { %v1986_v14 = vadd.f32 %v5464_v52, %v1985_v38  ;;  %v2116_v36 = vmul.f32 %v5601_v17, %v5601_v17  ;;  %2499 = vmatpush.msrb.mxu3 %v2420_v23  ;;  %v2416_v38 = vld [vmem:[%s6848_s13] sm:$0xff] }
 0x7fa   :  { %v2011_v37 = vmul.f32 %v3691_v32, %v1986_v14  ;;  %v2140_v46 = vsel %vm601_vm5, %v2116_v36, 0.0  ;;  %v2419_v32 = vld [vmem:[%s6848_s13 + $0x18] sm:$0xff]  ;;  %2500 = vmatpush.msrb.mxu3 %v2418_v40  ;;  %v2417_v14 = vld [vmem:[%s6848_s13 + $0x8] sm:$0xff] }
 0x7fb   :  { %2063 = vadd.xlane.f32.xlu0 %v2062_v49  ;;  %v2049_v34 = vpop.xlane.xlu1 %2048  ;;  %2141 = vadd.xlane.f32.xlu1 %v2140_v46 }
 0x7fc   :  { %v2085_v41 = vmul.f32 %v2049_v34, %v4757_v56  ;;  %v5626_v26 = vadd.f32 %v2011_v37, %v4816_v31  ;;  %2501 = vmatpush.msrb.mxu3 %v2416_v38 }
 0x7fe   :  { %v5629_v47 = vsub.f32 %v5522_v29, %v2085_v41  ;;  %v2065_v18 = vsel %vm601_vm5, %v5626_v26, 0.0 }
 0x7ff   :  { %v1988_v42 = vpop.f32.mrf.mxu2 }
 0x800   :  { %v1989_v31 = vadd.f32 %v5464_v52, %v1988_v42  ;;  %v2117_v25 = vmul.f32 %v5629_v47, %v5629_v47 }
 0x802   :  { %v2012_v3 = vmul.f32 %v3692_v59, %v1989_v31  ;;  %v2143_v7 = vsel %vm601_vm5, %v2117_v25, 0.0  ;;  %v3694_v59 = vld [vmem:[%s6843_s4 + $0x170] sm:$0xff] }
 0x803   :  { %2144 = vadd.xlane.f32.xlu2 %v2143_v7  ;;  %2066 = vadd.xlane.f32.xlu1 %v2065_v18  ;;  %v2052_v51 = vpop.xlane.xlu2 %2051 }
 0x804   :  { %v2086_v12 = vmul.f32 %v2052_v51, %v4757_v56  ;;  %v5648_v44 = vadd.f32 %v2012_v3, %v4828_v58 }
 0x806   :  { %v5651_v22 = vsub.f32 %v5532_v15, %v2086_v12  ;;  %v2068_v0 = vsel %vm601_vm5, %v5648_v44, 0.0 }
 0x807   :  { %v1991_v48 = vpop.f32.mrf.mxu2 }
 0x808   :  { %v1992_v11 = vadd.f32 %v5464_v52, %v1991_v48  ;;  %v2118_v39 = vmul.f32 %v5651_v22, %v5651_v22 }
 0x80a   :  { %v2013_v35 = vmul.f32 %v3693_v16, %v1992_v11  ;;  %v2146_v58 = vsel %vm601_vm5, %v2118_v39, 0.0 }
 0x80b   :  { %2069 = vadd.xlane.f32.xlu2 %v2068_v0  ;;  %2147 = vadd.xlane.f32.xlu0 %v2146_v58 }
 0x80c   :  { %v5663_v63 = vadd.f32 %v2013_v35, %v4839_v55  ;;  %v2423_v55 = vld [vmem:[%s6848_s13 + $0x38] sm:$0xff] }
 0x80d   :  { %2563 = vmatpush.msra.mxu0 %v2423_v55 }
 0x80e   :  { %v2071_v6 = vsel %vm601_vm5, %v5663_v63, 0.0 }
 0x80f   :  { %2564 = vmatpush.msra.mxu0 %v2421_v21  ;;  %v1994_v46 = vpop.f32.mrf.mxu2  ;;  %v3712_v21 = vld [vmem:[%s6843_s4 + $0x200] sm:$0xff] }
 0x810   :  { %v1995_v20 = vadd.f32 %v5464_v52, %v1994_v46  ;;  %v3696_v46 = vld [vmem:[%s6843_s4 + $0x180] sm:$0xff] }
 0x811   :  { %2565 = vmatpush.msra.mxu0 %v2419_v32 }
 0x812   :  { %v2014_v3 = vmul.f32 %v3694_v59, %v1995_v20 }
 0x813   :  { %2072 = vadd.xlane.f32.xlu0 %v2071_v6  ;;  %2566 = vmatpush.msra.mxu0 %v2417_v14 }
 0x814   :  { %v5713_v0 = vadd.f32 %v2014_v3, %v4903_v45 }
 0x816   :  { %v2074_v14 = vsel %vm601_vm5, %v5713_v0, 0.0 }
 0x817   :  { %v1997_v7 = vpop.f32.mrf.mxu2 }
 0x818   :  { %v1998_v58 = vadd.f32 %v5464_v52, %v1997_v7 }
 0x81a   :  { %v2015_v40 = vmul.f32 %v3695_v5, %v1998_v58 }
 0x84e   :  { %v2130_v36 = vpop.xlane.xlu0 %2129 }
 0x84f   :  { %v2176_v37 = vmul.f32 %v2130_v36, %v4757_v56 }
 0x851   :  { %v2192_v49 = vadd.f32 1e-06, %v2176_v37 }
 0x853   :  { %4048 = vrsqrt.f32 %v2192_v49  ;;  %vm2214_vm11 = vweird.f32 %v2192_v49 }
 0x856   :  { %v2055_v34 = vpop.xlane.xlu0 %2054  ;;  %v2133_v41 = vpop.xlane.xlu1 %2132 }
 0x857   :  { %v2087_v9 = vmul.f32 %v2055_v34, %v4757_v56  ;;  %v2177_v4 = vmul.f32 %v2133_v41, %v4757_v56 }
 0x859   :  { %v4049_v61 = vpop.eup %4048  ;;  %v5702_v8 = vsub.f32 %v5550_v28, %v2087_v9  ;;  %v2193_v1 = vadd.f32 1e-06, %v2177_v4 }
 0x85a   :  { %v2209_v42 = vmul.f32 %v4049_v61, %v2192_v49  ;;  %vm2215_vm10 = vweird.f32 %v4049_v61 }
 0x85b   :  { %4050 = vrsqrt.f32 %v2193_v1  ;;  %v2119_v31 = vmul.f32 %v5702_v8, %v5702_v8  ;;  %vm2216_vm12 = vmor %vm2214_vm11, %vm2215_vm10  ;;  %vm2224_vm14 = vweird.f32 %v2193_v1 }
 0x85c   :  { %v2210_v25 = vmul.f32 %v4049_v61, %v2209_v42 }
 0x85d   :  { %v2149_v18 = vsel %vm601_vm5, %v2119_v31, 0.0 }
 0x85e   :  { %v2211_v51 = vmul.f32 0.5, %v2210_v25  ;;  %v2058_v12 = vpop.xlane.xlu1 %2057  ;;  %2150 = vadd.xlane.f32.xlu1 %v2149_v18  ;;  %v2136_v16 = vpop.xlane.xlu2 %2135  ;;  %v3713_v18 = vld [vmem:[%s6843_s4 + $0x208] sm:$0xff] }
 0x85f   :  { %v2088_v48 = vmul.f32 %v2058_v12, %v4757_v56  ;;  %v2178_v11 = vmul.f32 %v2136_v16, %v4757_v56 }
 0x860   :  { %v2212_v39 = vsub.f32 1.5, %v2211_v51 }
 0x861   :  { %v4051_v35 = vpop.eup %4050  ;;  %v5717_v6 = vsub.f32 %v5566_v33, %v2088_v48  ;;  %v5719_v57 = vadd.f32 1e-06, %v2178_v11 }
 0x862   :  { %v2213_v27 = vmul.f32 %v4049_v61, %v2212_v39  ;;  %v2219_v55 = vmul.f32 %v4051_v35, %v2193_v1  ;;  %vm2225_vm13 = vweird.f32 %v4051_v35  ;;  %v3697_v39 = vld [vmem:[%s6843_s4 + $0x188] sm:$0xff] }
 0x863   :  { %4052 = vrsqrt.f32 %v5719_v57  ;;  %v2120_v45 = vmul.f32 %v5717_v6, %v5717_v6  ;;  %vm2226_vm15 = vmor %vm2224_vm14, %vm2225_vm13  ;;  %vm2234_vm1 = vweird.f32 %v5719_v57 }
 0x864   :  { %v2217_v23 = vsel %vm2216_vm12, %v4049_v61, %v2213_v27  ;;  %v2220_v52 = vmul.f32 %v4051_v35, %v2219_v55  ;;  %v5740_v61 = vadd.f32 %v2015_v40, %v4926_v19 }
 0x865   :  { %v2368_v32 = vmul.f32 %v2217_v23, %v5540_v53  ;;  %v2152_v38 = vsel %vm601_vm5, %v2120_v45, 0.0 }
 0x866   :  { %v2221_v36 = vmul.f32 0.5, %v2220_v52  ;;  %v2139_v37 = vpop.xlane.xlu0 %2138  ;;  %2153 = vadd.xlane.f32.xlu2 %v2152_v38  ;;  %2075 = vadd.xlane.f32.xlu1 %v2074_v14  ;;  %v2061_v49 = vpop.xlane.xlu2 %2060  ;;  %v2077_v1 = vsel %vm601_vm5, %v5740_v61, 0.0  ;;  %v3714_v14 = vld [vmem:[%s6843_s4 + $0x210] sm:$0xff] }
 0x867   :  { %v2179_v34 = vmul.f32 %v2139_v37, %v4757_v56  ;;  %v2089_v41 = vmul.f32 %v2061_v49, %v4757_v56  ;;  %v2384_v9 = vmul.f32 %v3712_v21, %v2368_v32 }
 0x868   :  { %v2222_v53 = vsub.f32 1.5, %v2221_v36 }
 0x869   :  { %v4053_v4 = vpop.eup %4052  ;;  %v5742_v20 = vadd.f32 1e-06, %v2179_v34  ;;  %v5745_v59 = vsub.f32 %v5582_v54, %v2089_v41  ;;  %v2400_v42 = vadd.f32 %v3696_v46, %v2384_v9  ;;  %v3698_v34 = vld [vmem:[%s6843_s4 + $0x190] sm:$0xff] }
 0x86a   :  { %v2223_v31 = vmul.f32 %v4051_v35, %v2222_v53  ;;  %v2229_v25 = vmul.f32 %v4053_v4, %v5719_v57  ;;  %vm2235_vm0 = vweird.f32 %v4053_v4 }
 0x86b   :  { %4054 = vrsqrt.f32 %v5742_v20  ;;  %3856 = vmatmul.msk.f32.vlgmr.msrb.gmra.mxu3 %vm601_vm5, %v2400_v42  ;;  %3872 = vmatmul.msk.f32.vlgmr.msra.gmra.mxu0 %vm601_vm5, %v2400_v42  ;;  %v2121_v19 = vmul.f32 %v5745_v59, %v5745_v59  ;;  %vm2236_vm2 = vmor %vm2234_vm1, %vm2235_vm0  ;;  %vm2244_vm4 = vweird.f32 %v5742_v20 }
 0x86c   :  { %v2227_v3 = vsel %vm2226_vm15, %v4051_v35, %v2223_v31  ;;  %v2230_v7 = vmul.f32 %v4053_v4, %v2229_v25 }
 0x86d   :  { %v2155_v51 = vsel %vm601_vm5, %v2121_v19, 0.0  ;;  %v2369_v12 = vmul.f32 %v2227_v3, %v5553_v60 }
 0x86e   :  { %v2231_v16 = vmul.f32 0.5, %v2230_v7  ;;  %v2064_v48 = vpop.xlane.xlu0 %2063  ;;  %2078 = vadd.xlane.f32.xlu2 %v2077_v1  ;;  %v2142_v11 = vpop.xlane.xlu1 %2141  ;;  %2156 = vadd.xlane.f32.xlu0 %v2155_v51 }
 0x86f   :  { %v2090_v35 = vmul.f32 %v2064_v48, %v4757_v56  ;;  %v2180_v58 = vmul.f32 %v2142_v11, %v4757_v56  ;;  %v2385_v5 = vmul.f32 %v3713_v18, %v2369_v12  ;;  %v2935_v18 = vld [vmem:[%s6849_s15 + $0xf8] sm:$0xff]  ;;  %v2918_v48 = vld [vmem:[%s6849_s15 + $0x70] sm:$0xff] }
 0x870   :  { %v2232_v27 = vsub.f32 1.5, %v2231_v16  ;;  %v3715_v12 = vld [vmem:[%s6843_s4 + $0x218] sm:$0xff]  ;;  %3005 = vmatpush.msra.mxu2 %v2935_v18  ;;  %v2934_v16 = vld [vmem:[%s6849_s15 + $0xf0] sm:$0xff] }
 0x871   :  { %v4055_v55 = vpop.eup %4054  ;;  %v5766_v45 = vsub.f32 %v5598_v30, %v2090_v35  ;;  %v5768_v60 = vadd.f32 1e-06, %v2180_v58  ;;  %v2401_v23 = vadd.f32 %v3697_v39, %v2385_v5  ;;  %v2933_v35 = vld [vmem:[%s6849_s15 + $0xe8] sm:$0xff] }
 0x872   :  { %v2233_v52 = vmul.f32 %v4053_v4, %v2232_v27  ;;  %v2239_v21 = vmul.f32 %v4055_v55, %v5742_v20  ;;  %vm2245_vm3 = vweird.f32 %v4055_v55  ;;  %v2919_v20 = vld [vmem:[%s6849_s15 + $0x78] sm:$0xff]  ;;  %3006 = vmatpush.msra.mxu2 %v2934_v16  ;;  %v3717_v16 = vld [vmem:[%s6843_s4 + $0x228] sm:$0xff] }
 0x873   :  { %4056 = vrsqrt.f32 %v5768_v60  ;;  %3857 = vmatmul.msk.f32.gmra.mxu3 %vm601_vm5, %v2401_v23  ;;  %3873 = vmatmul.msk.f32.gmra.mxu0 %vm601_vm5, %v2401_v23  ;;  %v2122_v40 = vmul.f32 %v5766_v45, %v5766_v45  ;;  %vm2246_vm6 = vmor %vm2244_vm4, %vm2245_vm3  ;;  %vm2254_vm8 = vweird.f32 %v5768_v60 }
 0x874   :  { %v2237_v32 = vsel %vm2236_vm2, %v4053_v4, %v2233_v52  ;;  %v2240_v38 = vmul.f32 %v4055_v55, %v2239_v21  ;;  %2940 = vmatpush.msra.mxu1 %v2919_v20  ;;  %3007 = vmatpush.msra.mxu2 %v2933_v35 }
 0x875   :  { %v2158_v57 = vsel %vm601_vm5, %v2122_v40, 0.0  ;;  %v2370_v36 = vmul.f32 %v2237_v32, %v5569_v43 }
 0x876   :  { %v2241_v37 = vmul.f32 0.5, %v2240_v38  ;;  %2159 = vadd.xlane.f32.xlu1 %v2158_v57  ;;  %v2067_v49 = vpop.xlane.xlu1 %2066  ;;  %v2145_v46 = vpop.xlane.xlu2 %2144  ;;  %2941 = vmatpush.msra.mxu1 %v2918_v48 }
 0x877   :  { %v2091_v41 = vmul.f32 %v2067_v49, %v4757_v56  ;;  %v2181_v9 = vmul.f32 %v2145_v46, %v4757_v56  ;;  %v2386_v53 = vmul.f32 %v3714_v14, %v2370_v36 }
 0x878   :  { %v2242_v4 = vsub.f32 1.5, %v2241_v37 }
 0x879   :  { %v4057_v42 = vpop.eup %4056  ;;  %v5788_v31 = vsub.f32 %v5626_v26, %v2091_v41  ;;  %v5790_v43 = vadd.f32 1e-06, %v2181_v9  ;;  %v2402_v25 = vadd.f32 %v3698_v34, %v2386_v53  ;;  %v3716_v34 = vld [vmem:[%s6843_s4 + $0x220] sm:$0xff] }
 0x87a   :  { %v2243_v19 = vmul.f32 %v4055_v55, %v2242_v4  ;;  %v2249_v3 = vmul.f32 %v4057_v42, %v5768_v60  ;;  %vm2255_vm7 = vweird.f32 %v4057_v42  ;;  %v3700_v4 = vld [vmem:[%s6843_s4 + $0x1a0] sm:$0xff] }
 0x87b   :  { %4058 = vrsqrt.f32 %v5790_v43  ;;  %3858 = vmatmul.msk.f32.gmra.mxu3 %vm601_vm5, %v2402_v25  ;;  %3874 = vmatmul.msk.f32.gmra.mxu0 %vm601_vm5, %v2402_v25  ;;  %v2123_v7 = vmul.f32 %v5788_v31, %v5788_v31  ;;  %vm2256_vm9 = vmor %vm2254_vm8, %vm2255_vm7  ;;  %vm2264_vm11 = vweird.f32 %v5790_v43 }
 0x87c   :  { %v2247_v1 = vsel %vm2246_vm6, %v4055_v55, %v2243_v19  ;;  %v2250_v51 = vmul.f32 %v4057_v42, %v2249_v3  ;;  %v3699_v55 = vld [vmem:[%s6843_s4 + $0x198] sm:$0xff] }
 0x87d   :  { %v2161_v11 = vsel %vm601_vm5, %v2123_v7, 0.0  ;;  %v2371_v39 = vmul.f32 %v2247_v1, %v5585_v24 }
 0x87e   :  { %v2251_v58 = vmul.f32 0.5, %v2250_v51  ;;  %v2148_v5 = vpop.xlane.xlu0 %2147  ;;  %2162 = vadd.xlane.f32.xlu0 %v2161_v11  ;;  %v2070_v27 = vpop.xlane.xlu2 %2069 }
 0x87f   :  { %v2182_v23 = vmul.f32 %v2148_v5, %v4757_v56  ;;  %v2092_v52 = vmul.f32 %v2070_v27, %v4757_v56  ;;  %v2387_v21 = vmul.f32 %v3715_v12, %v2371_v39  ;;  %v3701_v39 = vld [vmem:[%s6843_s4 + $0x1a8] sm:$0xff] }
 0x880   :  { %v2252_v24 = vsub.f32 1.5, %v2251_v58 }
 0x881   :  { %v4059_v40 = vpop.eup %4058  ;;  %v2198_v32 = vadd.f32 1e-06, %v2182_v23  ;;  %v5825_v38 = vsub.f32 %v5648_v44, %v2092_v52  ;;  %v2403_v14 = vadd.f32 %v3699_v55, %v2387_v21  ;;  %v3702_v52 = vld [vmem:[%s6843_s4 + $0x1b0] sm:$0xff] }
 0x882   :  { %v2253_v57 = vmul.f32 %v4057_v42, %v2252_v24  ;;  %v2259_v36 = vmul.f32 %v4059_v40, %v5790_v43  ;;  %vm2265_vm10 = vweird.f32 %v4059_v40 }
 0x883   :  { %4060 = vrsqrt.f32 %v2198_v32  ;;  %3859 = vmatmul.msk.f32.gmra.mxu3 %vm601_vm5, %v2403_v14  ;;  %3875 = vmatmul.msk.f32.gmra.mxu0 %vm601_vm5, %v2403_v14  ;;  %v2124_v37 = vmul.f32 %v5825_v38, %v5825_v38  ;;  %vm2266_vm12 = vmor %vm2264_vm11, %vm2265_vm10  ;;  %vm2274_vm14 = vweird.f32 %v2198_v32  ;;  %v2930_v14 = vld [vmem:[%s6849_s15 + $0xd0] sm:$0xff] }
 0x884   :  { %v2257_v49 = vsel %vm2256_vm9, %v4057_v42, %v2253_v57  ;;  %v2260_v46 = vmul.f32 %v4059_v40, %v2259_v36  ;;  %v2916_v57 = vld [vmem:[%s6849_s15 + $0x60] sm:$0xff]  ;;  %v2929_v36 = vld [vmem:[%s6849_s15 + $0xc8] sm:$0xff] }
 0x885   :  { %v2164_v41 = vsel %vm601_vm5, %v2124_v37, 0.0  ;;  %v2372_v60 = vmul.f32 %v2257_v49, %v5601_v17  ;;  %v2915_v37 = vld [vmem:[%s6849_s15 + $0x58] sm:$0xff] }
 0x886   :  { %v2261_v9 = vmul.f32 0.5, %v2260_v46  ;;  %v2073_v53 = vpop.xlane.xlu0 %2072  ;;  %2165 = vadd.xlane.f32.xlu2 %v2164_v41  ;;  %v2928_v46 = vld [vmem:[%s6849_s15 + $0xc0] sm:$0xff]  ;;  %v2914_v41 = vld [vmem:[%s6849_s15 + $0x50] sm:$0xff] }
 0x887   :  { %v2093_v25 = vmul.f32 %v2073_v53, %v4757_v56  ;;  %v2388_v19 = vmul.f32 %v3716_v34, %v2372_v60  ;;  %v2927_v60 = vld [vmem:[%s6849_s15 + $0xb8] sm:$0xff]  ;;  %v2913_v53 = vld [vmem:[%s6849_s15 + $0x48] sm:$0xff] }
 0x888   :  { %v2262_v42 = vsub.f32 1.5, %v2261_v9 }
 0x889   :  { %v4061_v3 = vpop.eup %4060  ;;  %v5843_v7 = vsub.f32 %v5663_v63, %v2093_v25  ;;  %v2404_v18 = vadd.f32 %v3700_v4, %v2388_v19  ;;  %v2926_v4 = vld [vmem:[%s6849_s15 + $0xb0] sm:$0xff]  ;;  %v2912_v25 = vld [vmem:[%s6849_s15 + $0x40] sm:$0xff]  ;;  %v2925_v19 = vld [vmem:[%s6849_s15 + $0xa8] sm:$0xff] }
 0x88a   :  { %v2263_v20 = vmul.f32 %v4059_v40, %v2262_v42  ;;  %v2269_v17 = vmul.f32 %v4061_v3, %v2198_v32  ;;  %vm2275_vm13 = vweird.f32 %v4061_v3  ;;  %v2932_v32 = vld [vmem:[%s6849_s15 + $0xe0] sm:$0xff] }
 0x88b   :  { %3860 = vmatmul.msk.f32.gmra.mxu3 %vm601_vm5, %v2404_v18  ;;  %3876 = vmatmul.msk.f32.gmra.mxu0 %vm601_vm5, %v2404_v18  ;;  %v2125_v1 = vmul.f32 %v5843_v7, %v5843_v7  ;;  %vm2276_vm15 = vmor %vm2274_vm14, %vm2275_vm13  ;;  %v2911_v18 = vld [vmem:[%s6849_s15 + $0x38] sm:$0xff] }
 0x88c   :  { %v2267_v51 = vsel %vm2266_vm12, %v4059_v40, %v2263_v20  ;;  %v2270_v12 = vmul.f32 %v4061_v3, %v2269_v17  ;;  %v2917_v40 = vld [vmem:[%s6849_s15 + $0x68] sm:$0xff]  ;;  %3008 = vmatpush.msra.mxu2 %v2932_v32  ;;  %v2924_v20 = vld [vmem:[%s6849_s15 + $0xa0] sm:$0xff] }
 0x88d   :  { %v2167_v48 = vsel %vm601_vm5, %v2125_v1, 0.0  ;;  %v2373_v11 = vmul.f32 %v2267_v51, %v5629_v47  ;;  %v3718_v47 = vld [vmem:[%s6843_s4 + $0x230] sm:$0xff]  ;;  %2942 = vmatpush.msra.mxu1 %v2917_v40  ;;  %v2920_v40 = vld [vmem:[%s6849_s15 + $0x80] sm:$0xff] }
 0x88e   :  { %v2271_v43 = vmul.f32 0.5, %v2270_v12  ;;  %2168 = vadd.xlane.f32.xlu1 %v2167_v48  ;;  %v2910_v51 = vld [vmem:[%s6849_s15 + $0x30] sm:$0xff]  ;;  %v2923_v12 = vld [vmem:[%s6849_s15 + $0x98] sm:$0xff] }
 0x88f   :  { %v2389_v35 = vmul.f32 %v3717_v16, %v2373_v11  ;;  %2943 = vmatpush.msra.mxu1 %v2916_v57 }
 0x890   :  { %v2272_v58 = vsub.f32 1.5, %v2271_v43 }
 0x891   :  { %v2405_v5 = vadd.f32 %v3701_v39, %v2389_v35  ;;  %2944 = vmatpush.msra.mxu1 %v2915_v37  ;;  %v2909_v39 = vld [vmem:[%s6849_s15 + $0x28] sm:$0xff]  ;;  %v2922_v35 = vld [vmem:[%s6849_s15 + $0x90] sm:$0xff] }
 0x892   :  { %v2273_v27 = vmul.f32 %v4061_v3, %v2272_v58 }
 0x893   :  { %3861 = vmatmul.msk.f32.gmra.mxu3 %vm601_vm5, %v2405_v5  ;;  %3877 = vmatmul.msk.f32.gmra.mxu0 %vm601_vm5, %v2405_v5 }
 0x894   :  { %v2277_v55 = vsel %vm2276_vm15, %v4061_v3, %v2273_v27  ;;  %2945 = vmatpush.msra.mxu1 %v2914_v41  ;;  %v2908_v27 = vld [vmem:[%s6849_s15 + $0x20] sm:$0xff] }
 0x895   :  { %v2374_v23 = vmul.f32 %v2277_v55, %v5651_v22  ;;  %v2931_v22 = vld [vmem:[%s6849_s15 + $0xd8] sm:$0xff]  ;;  %v2921_v55 = vld [vmem:[%s6849_s15 + $0x88] sm:$0xff] }
 0x896   :  { %3009 = vmatpush.msra.mxu2 %v2931_v22  ;;  %2946 = vmatpush.msra.mxu1 %v2913_v53  ;;  %v2905_v53 = vld [vmem:[%s6849_s15 + $0x8] sm:$0xff] }
 0x897   :  { %v2390_v21 = vmul.f32 %v3718_v47, %v2374_v23 }
 0x898   :  { %3010 = vmatpush.msra.mxu2 %v2930_v14  ;;  %2947 = vmatpush.msra.mxu1 %v2912_v25  ;;  %v2432_v14 = vld [vmem:[%s6850_s14] sm:$0x3] }
 0x899   :  { %v2406_v24 = vadd.f32 %v3702_v52, %v2390_v21 }
 0x89a   :  { %3011 = vmatpush.msra.mxu2 %v2929_v36  ;;  %2948 = vmatpush.msra.mxu1 %v2911_v18  ;;  %v2906_v36 = vld [vmem:[%s6849_s15 + $0x10] sm:$0xff] }
 0x89b   :  { %3862 = vmatmul.msk.f32.gmra.mxu3 %vm601_vm5, %v2406_v24  ;;  %3878 = vmatmul.msk.f32.gmra.mxu0 %vm601_vm5, %v2406_v24  ;;  %v2907_v24 = vld [vmem:[%s6849_s15 + $0x18] sm:$0xff] }
 0x89c   :  { %3012 = vmatpush.msra.mxu2 %v2928_v46  ;;  %2949 = vmatpush.msra.mxu1 %v2910_v51 }
 0x89e   :  { %3013 = vmatpush.msra.mxu2 %v2927_v60  ;;  %2950 = vmatpush.msra.mxu1 %v2909_v39  ;;  %v5972_v60 = vperm.slane %v2432_v14, 1 }
 0x8a0   :  { %3014 = vmatpush.msra.mxu2 %v2926_v4  ;;  %2951 = vmatpush.msra.mxu1 %v2908_v27 }
 0x8a2   :  { %3015 = vmatpush.msra.mxu2 %v2925_v19  ;;  %2952 = vmatpush.msra.mxu1 %v2907_v24 }
 0x8a4   :  { %3016 = vmatpush.msra.mxu2 %v2924_v20  ;;  %2953 = vmatpush.msra.mxu1 %v2906_v36 }
 0x8a6   :  { %3017 = vmatpush.msra.mxu2 %v2923_v12  ;;  %2954 = vmatpush.msra.mxu1 %v2905_v53  ;;  %v3703_v12 = vld [vmem:[%s6843_s4 + $0x1b8] sm:$0xff]  ;;  %v3704_v53 = vld [vmem:[%s6843_s4 + $0x1c0] sm:$0xff] }
 0x8a8   :  { %3018 = vmatpush.msra.mxu2 %v2922_v35 }
 0x8aa   :  { %3019 = vmatpush.msra.mxu2 %v2921_v55 }
 0x8ac   :  { %3020 = vmatpush.msra.mxu2 %v2920_v40 }
 0x8d1   :  { %v2151_v49 = vpop.xlane.xlu1 %2150 }
 0x8d2   :  { %v2183_v34 = vmul.f32 %v2151_v49, %v4757_v56 }
 0x8d4   :  { %v5900_v9 = vadd.f32 1e-06, %v2183_v34 }
 0x8d6   :  { %4062 = vrsqrt.f32 %v5900_v9  ;;  %vm2284_vm1 = vweird.f32 %v5900_v9 }
 0x8d9   :  { %v2076_v42 = vpop.xlane.xlu1 %2075  ;;  %v2154_v3 = vpop.xlane.xlu2 %2153 }
 0x8da   :  { %v2094_v17 = vmul.f32 %v2076_v42, %v4757_v56  ;;  %v2184_v1 = vmul.f32 %v2154_v3, %v4757_v56  ;;  %v2904_v42 = vld [vmem:[%s6849_s15] sm:$0xff] }
 0x8db   :  { %2955 = vmatpush.msra.mxu1 %v2904_v42 }
 0x8dc   :  { %v4063_v16 = vpop.eup %4062  ;;  %v5930_v48 = vsub.f32 %v5713_v0, %v2094_v17  ;;  %v5932_v11 = vadd.f32 1e-06, %v2184_v1 }
 0x8dd   :  { %v2279_v43 = vmul.f32 %v4063_v16, %v5900_v9  ;;  %vm2285_vm0 = vweird.f32 %v4063_v16  ;;  %v3719_v9 = vld [vmem:[%s6843_s4 + $0x238] sm:$0xff] }
 0x8de   :  { %4064 = vrsqrt.f32 %v5932_v11  ;;  %v2126_v58 = vmul.f32 %v5930_v48, %v5930_v48  ;;  %vm2286_vm2 = vmor %vm2284_vm1, %vm2285_vm0  ;;  %vm2294_vm4 = vweird.f32 %v5932_v11 }
 0x8df   :  { %v2280_v5 = vmul.f32 %v4063_v16, %v2279_v43 }
 0x8e0   :  { %v2170_v47 = vsel %vm601_vm5, %v2126_v58, 0.0 }
 0x8e1   :  { %v2281_v23 = vmul.f32 0.5, %v2280_v5  ;;  %2171 = vadd.xlane.f32.xlu0 %v2170_v47  ;;  %v2157_v52 = vpop.xlane.xlu0 %2156  ;;  %v2079_v21 = vpop.xlane.xlu2 %2078 }
 0x8e2   :  { %v2185_v32 = vmul.f32 %v2157_v52, %v4757_v56  ;;  %v2095_v22 = vmul.f32 %v2079_v21, %v4757_v56 }
 0x8e3   :  { %v2282_v57 = vsub.f32 1.5, %v2281_v23 }
 0x8e4   :  { %v4065_v37 = vpop.eup %4064  ;;  %v5965_v49 = vadd.f32 1e-06, %v2185_v32  ;;  %v5968_v46 = vsub.f32 %v5740_v61, %v2095_v22 }
 0x8e5   :  { %v2283_v34 = vmul.f32 %v4063_v16, %v2282_v57  ;;  %v2289_v41 = vmul.f32 %v4065_v37, %v5932_v11  ;;  %vm2295_vm3 = vweird.f32 %v4065_v37  ;;  %v3720_v11 = vld [vmem:[%s6843_s4 + $0x240] sm:$0xff] }
 0x8e6   :  { %4066 = vrsqrt.f32 %v5965_v49  ;;  %v2127_v4 = vmul.f32 %v5968_v46, %v5968_v46  ;;  %vm2296_vm6 = vmor %vm2294_vm4, %vm2295_vm3  ;;  %vm2304_vm8 = vweird.f32 %v5965_v49 }
 0x8e7   :  { %v2287_v25 = vsel %vm2286_vm2, %v4063_v16, %v2283_v34  ;;  %v2290_v19 = vmul.f32 %v4065_v37, %v2289_v41 }
 0x8e8   :  { %v2568_v3 = vpop.f32.mrf.mxu0  ;;  %v2173_v18 = vsel %vm601_vm5, %v2127_v4, 0.0  ;;  %v2375_v20 = vmul.f32 %v2287_v25, %v5702_v8  ;;  %v5997_v8 = vperm.slane %v2432_v14, 0 }
 0x8e9   :  { %v2291_v17 = vmul.f32 0.5, %v2290_v19  ;;  %v5989_v1 = vadd.f32 %v2568_v3, %v5972_v60  ;;  %v2160_v51 = vpop.xlane.xlu1 %2159  ;;  %2174 = vadd.xlane.f32.xlu2 %v2173_v18 }
 0x8ea   :  { %v2186_v16 = vmul.f32 %v2160_v51, %v4757_v56  ;;  %v2391_v43 = vmul.f32 %v3719_v9, %v2375_v20 }
 0x8eb   :  { %v2292_v39 = vsub.f32 1.5, %v2291_v17  ;;  %v2617_v35 = vmul.f32 %v5989_v1, %v5989_v1 }
 0x8ec   :  { %v4067_v58 = vpop.eup %4066  ;;  %v5999_v5 = vadd.f32 1e-06, %v2186_v16  ;;  %v2407_v27 = vadd.f32 %v3703_v12, %v2391_v43 }
 0x8ed   :  { %v2293_v55 = vmul.f32 %v4065_v37, %v2292_v39  ;;  %v2299_v47 = vmul.f32 %v4067_v58, %v5965_v49  ;;  %v2649_v23 = vmul.f32 %v2617_v35, %v5989_v1  ;;  %vm2305_vm7 = vweird.f32 %v4067_v58  ;;  %v3721_v49 = vld [vmem:[%s6843_s4 + $0x248] sm:$0xff] }
 0x8ee   :  { %4068 = vrsqrt.f32 %v5999_v5  ;;  %v2503_v52 = vpop.f32.mrf.mxu3  ;;  %3863 = vmatmul.msk.f32.gmra.mxu3 %vm601_vm5, %v2407_v27  ;;  %3879 = vmatmul.msk.f32.gmra.mxu0 %vm601_vm5, %v2407_v27  ;;  %vm2306_vm9 = vmor %vm2304_vm8, %vm2305_vm7  ;;  %vm2314_vm11 = vweird.f32 %v5999_v5 }
 0x8ef   :  { %v2297_v21 = vsel %vm2296_vm6, %v4065_v37, %v2293_v55  ;;  %v2300_v24 = vmul.f32 %v4067_v58, %v2299_v47  ;;  %v2681_v40 = vmul.f32 0.044715, %v2649_v23  ;;  %v6008_v32 = vadd.f32 %v2503_v52, %v5997_v8 }
 0x8f0   :  { %v2376_v22 = vmul.f32 %v2297_v21, %v5717_v6  ;;  %v2571_v14 = vpop.f32.mrf.mxu0 }
 0x8f1   :  { %v2301_v57 = vmul.f32 0.5, %v2300_v24  ;;  %v2713_v36 = vadd.f32 %v2681_v40, %v5989_v1  ;;  %v2616_v34 = vmul.f32 %v6008_v32, %v6008_v32  ;;  %v6018_v37 = vadd.f32 %v2571_v14, %v5972_v60  ;;  %v2163_v41 = vpop.xlane.xlu0 %2162 }
 0x8f2   :  { %v2187_v4 = vmul.f32 %v2163_v41, %v4757_v56  ;;  %v2392_v25 = vmul.f32 %v3720_v11, %v2376_v22  ;;  %v3705_v11 = vld [vmem:[%s6843_s4 + $0x1c8] sm:$0xff] }
 0x8f3   :  { %v2302_v6 = vsub.f32 1.5, %v2301_v57  ;;  %v2745_v19 = vmul.f32 0.7978846, %v2713_v36  ;;  %v2648_v9 = vmul.f32 %v2616_v34, %v6008_v32  ;;  %v2619_v42 = vmul.f32 %v6018_v37, %v6018_v37 }
 0x8f4   :  { %v4069_v3 = vpop.eup %4068  ;;  %v6027_v18 = vadd.f32 1e-06, %v2187_v4  ;;  %v2408_v20 = vadd.f32 %v3704_v53, %v2392_v25 }
 0x8f5   :  { %v2303_v17 = vmul.f32 %v4067_v58, %v2302_v6  ;;  %4070 = vtanh.f32 %v2745_v19  ;;  %v2309_v51 = vmul.f32 %v4069_v3, %v5999_v5  ;;  %v2680_v12 = vmul.f32 0.044715, %v2648_v9 }
 0x8f6   :  { %v2651_v16 = vmul.f32 %v2619_v42, %v6018_v37  ;;  %4072 = vrsqrt.f32 %v6027_v18  ;;  %v2506_v43 = vpop.f32.mrf.mxu3  ;;  %3864 = vmatmul.msk.f32.gmra.mxu3 %vm601_vm5, %v2408_v20  ;;  %3880 = vmatmul.msk.f32.gmra.mxu0 %vm601_vm5, %v2408_v20  ;;  %vm2315_vm10 = vweird.f32 %v4069_v3  ;;  %vm2324_vm14 = vweird.f32 %v6027_v18 }
 0x8f7   :  { %v2307_v39 = vsel %vm2306_vm9, %v4067_v58, %v2303_v17  ;;  %v2310_v35 = vmul.f32 %v4069_v3, %v2309_v51  ;;  %v6036_v27 = vadd.f32 %v2506_v43, %v5997_v8  ;;  %v2712_v47 = vadd.f32 %v2680_v12, %v6008_v32  ;;  %vm2316_vm12 = vmor %vm2314_vm11, %vm2315_vm10 }
 0x8f8   :  { %v2377_v55 = vmul.f32 %v2307_v39, %v5745_v59  ;;  %v2683_v23 = vmul.f32 0.044715, %v2651_v16  ;;  %v2574_v52 = vpop.f32.mrf.mxu0  ;;  %v3722_v39 = vld [vmem:[%s6843_s4 + $0x250] sm:$0xff] }
 0x8f9   :  { %v2311_v21 = vmul.f32 0.5, %v2310_v35  ;;  %v2618_v24 = vmul.f32 %v6036_v27, %v6036_v27  ;;  %v6046_v58 = vadd.f32 %v2574_v52, %v5972_v60  ;;  %v2166_v40 = vpop.xlane.xlu2 %2165  ;;  %v2744_v22 = vmul.f32 0.7978846, %v2712_v47 }
 0x8fa   :  { %v2188_v59 = vmul.f32 %v2166_v40, %v4757_v56  ;;  %v2393_v14 = vmul.f32 %v3721_v49, %v2377_v55  ;;  %v2715_v34 = vadd.f32 %v2683_v23, %v6018_v37 }
 0x8fb   :  { %v4071_v57 = vpop.eup %4070  ;;  %v2312_v36 = vsub.f32 1.5, %v2311_v21  ;;  %v2650_v41 = vmul.f32 %v2618_v24, %v6036_v27  ;;  %v2621_v53 = vmul.f32 %v6046_v58, %v6046_v58  ;;  %4074 = vtanh.f32 %v2744_v22 }
 0x8fc   :  { %v6056_v4 = vpop.eup %4072  ;;  %v2809_v25 = vadd.f32 1.0, %v4071_v57  ;;  %v6058_v6 = vadd.f32 1e-06, %v2188_v59  ;;  %v2409_v19 = vadd.f32 %v3705_v11, %v2393_v14  ;;  %v2747_v35 = vmul.f32 0.7978846, %v2715_v34  ;;  %v3706_v11 = vld [vmem:[%s6843_s4 + $0x1d0] sm:$0xff] }
 0x8fd   :  { %v2313_v9 = vmul.f32 %v4069_v3, %v2312_v36  ;;  %v2319_v42 = vmul.f32 %v6056_v4, %v6027_v18  ;;  %v2682_v20 = vmul.f32 0.044715, %v2650_v41  ;;  %vm2325_vm13 = vweird.f32 %v6056_v4 }
 0x8fe   :  { %v2841_v17 = vmul.f32 0.5, %v2809_v25  ;;  %v2653_v51 = vmul.f32 %v2621_v53, %v6046_v58  ;;  %4076 = vrsqrt.f32 %v6058_v6  ;;  %v2509_v12 = vpop.f32.mrf.mxu3  ;;  %3865 = vmatmul.msk.f32.gmra.mxu3 %vm601_vm5, %v2409_v19  ;;  %3881 = vmatmul.msk.f32.gmra.mxu0 %vm601_vm5, %v2409_v19  ;;  %vm2326_vm15 = vmor %vm2324_vm14, %vm2325_vm13  ;;  %vm2334_vm1 = vweird.f32 %v6058_v6 }
 0x8ff   :  { %v2317_v16 = vsel %vm2316_vm12, %v4069_v3, %v2313_v9  ;;  %v2320_v5 = vmul.f32 %v6056_v4, %v2319_v42  ;;  %v6071_v43 = vadd.f32 %v2509_v12, %v5997_v8  ;;  %v2714_v52 = vadd.f32 %v2682_v20, %v6036_v27 }
 0x900   :  { %v2873_v49 = vmul.f32 %v2841_v17, %v5989_v1  ;;  %v2378_v55 = vmul.f32 %v2317_v16, %v5766_v45  ;;  %v2685_v47 = vmul.f32 0.044715, %v2653_v51  ;;  %v2577_v23 = vpop.f32.mrf.mxu0  ;;  %4078 = vtanh.f32 %v2747_v35 }
 0x901   :  { %v2321_v21 = vmul.f32 0.5, %v2320_v5  ;;  %v2620_v3 = vmul.f32 %v6071_v43, %v6071_v43  ;;  %v6082_v24 = vadd.f32 %v2577_v23, %v5972_v60  ;;  %v2169_v40 = vpop.xlane.xlu1 %2168  ;;  %v4075_v1 = vpop.eup %4074  ;;  %v2746_v14 = vmul.f32 0.7978846, %v2714_v52 }
 0x902   :  { %v2717_v45 = vadd.f32 %v2685_v47, %v6046_v58  ;;  %v2189_v22 = vmul.f32 %v2169_v40, %v4757_v56  ;;  %3021 = vmatmul.f32.vlgmr.msra.gmra.mxu2 %v2873_v49  ;;  %v2394_v59 = vmul.f32 %v3722_v39, %v2378_v55  ;;  %v2808_v57 = vadd.f32 1.0, %v4075_v1  ;;  %v3723_v55 = vld [vmem:[%s6843_s4 + $0x258] sm:$0xff] }
 0x903   :  { %v2322_v36 = vsub.f32 1.5, %v2321_v21  ;;  %v2652_v34 = vmul.f32 %v2620_v3, %v6071_v43  ;;  %v2623_v41 = vmul.f32 %v6082_v24, %v6082_v24  ;;  %4080 = vtanh.f32 %v2746_v14  ;;  %v3707_v40 = vld [vmem:[%s6843_s4 + $0x1d8] sm:$0xff] }
 0x904   :  { %v6092_v53 = vpop.eup %4076  ;;  %v6094_v25 = vadd.f32 1e-06, %v2189_v22  ;;  %v2410_v19 = vadd.f32 %v3706_v11, %v2394_v59  ;;  %v2749_v9 = vmul.f32 0.7978846, %v2717_v45  ;;  %v2840_v42 = vmul.f32 0.5, %v2808_v57 }
 0x905   :  { %v2323_v20 = vmul.f32 %v6056_v4, %v2322_v36  ;;  %v2329_v17 = vmul.f32 %v6092_v53, %v6058_v6  ;;  %v2684_v51 = vmul.f32 0.044715, %v2652_v34  ;;  %v2655_v12 = vmul.f32 %v2623_v41, %v6082_v24 }
 0x906   :  { %4082 = vrsqrt.f32 %v6094_v25  ;;  %v2512_v16 = vpop.f32.mrf.mxu3  ;;  %3866 = vmatmul.msk.f32.gmra.mxu3 %vm601_vm5, %v2410_v19  ;;  %3882 = vmatmul.msk.f32.gmra.mxu0 %vm601_vm5, %v2410_v19  ;;  %v4079_v5 = vpop.eup %4078  ;;  %v2872_v39 = vmul.f32 %v2840_v42, %v6008_v32  ;;  %vm2335_vm0 = vweird.f32 %v6092_v53  ;;  %vm2344_vm4 = vweird.f32 %v6094_v25 }
 0x907   :  { %v2327_v18 = vsel %vm2326_vm15, %v6056_v4, %v2323_v20  ;;  %v2330_v35 = vmul.f32 %v6092_v53, %v2329_v17  ;;  %v6110_v49 = vadd.f32 %v2512_v16, %v5997_v8  ;;  %v2687_v23 = vmul.f32 0.044715, %v2655_v12  ;;  %vm2336_vm2 = vmor %vm2334_vm1, %vm2335_vm0 }
 0x908   :  { %v2379_v47 = vmul.f32 %v2327_v18, %v5788_v31  ;;  %v2580_v52 = vpop.f32.mrf.mxu0  ;;  %v2811_v21 = vadd.f32 1.0, %v4079_v5  ;;  %4084 = vtanh.f32 %v2749_v9  ;;  %2956 = vmatmul.f32.vlgmr.msra.gmra.mxu1 %v2872_v39  ;;  %v2716_v11 = vadd.f32 %v2684_v51, %v6071_v43 }
 0x909   :  { %v2331_v3 = vmul.f32 0.5, %v2330_v35  ;;  %v2622_v32 = vmul.f32 %v6110_v49, %v6110_v49  ;;  %v6119_v4 = vadd.f32 %v2580_v52, %v5972_v60  ;;  %v4081_v1 = vpop.eup %4080  ;;  %v2719_v31 = vadd.f32 %v2687_v23, %v6082_v24 }
 0x90a   :  { %v2843_v45 = vmul.f32 0.5, %v2811_v21  ;;  %v2395_v22 = vmul.f32 %v3723_v55, %v2379_v47  ;;  %v2810_v36 = vadd.f32 1.0, %v4081_v1  ;;  %v2748_v9 = vmul.f32 0.7978846, %v2716_v11  ;;  %v3724_v55 = vld [vmem:[%s6843_s4 + $0x260] sm:$0xff] }
 0x90b   :  { %v2332_v59 = vsub.f32 1.5, %v2331_v3  ;;  %v2654_v14 = vmul.f32 %v2622_v32, %v6110_v49  ;;  %v2625_v57 = vmul.f32 %v6119_v4, %v6119_v4  ;;  %v2751_v42 = vmul.f32 0.7978846, %v2719_v31  ;;  %v3708_v11 = vld [vmem:[%s6843_s4 + $0x1e0] sm:$0xff] }
 0x90c   :  { %v6130_v34 = vpop.eup %4082  ;;  %v2875_v41 = vmul.f32 %v2843_v45, %v6018_v37  ;;  %v2411_v19 = vadd.f32 %v3707_v40, %v2395_v22  ;;  %v2842_v37 = vmul.f32 0.5, %v2810_v36  ;;  %4086 = vtanh.f32 %v2748_v9 }
 0x90d   :  { %v2333_v20 = vmul.f32 %v6092_v53, %v2332_v59  ;;  %v2339_v17 = vmul.f32 %v6130_v34, %v6094_v25  ;;  %v2686_v12 = vmul.f32 0.044715, %v2654_v14  ;;  %v2657_v16 = vmul.f32 %v2625_v57, %v6119_v4 }
 0x90e   :  { %v4085_v51 = vpop.eup %4084  ;;  %3024 = vmatmul.f32.gmra.mxu2 %v2875_v41  ;;  %v2515_v5 = vpop.f32.mrf.mxu3  ;;  %3867 = vmatmul.msk.f32.gmra.mxu3 %vm601_vm5, %v2411_v19  ;;  %v2874_v21 = vmul.f32 %v2842_v37, %v6036_v27  ;;  %4088 = vtanh.f32 %v2751_v42  ;;  %vm2345_vm3 = vweird.f32 %v6130_v34 }
 0x90f   :  { %v2337_v39 = vsel %vm2336_vm2, %v6092_v53, %v2333_v20  ;;  %v2340_v6 = vmul.f32 %v6130_v34, %v2339_v17  ;;  %v6144_v18 = vadd.f32 %v2515_v5, %v5997_v8  ;;  %3883 = vmatmul.msk.f32.gmra.mxu0 %vm601_vm5, %v2411_v19  ;;  %v2813_v35 = vadd.f32 1.0, %v4085_v51  ;;  %vm2346_vm6 = vmor %vm2344_vm4, %vm2345_vm3  ;;  %v3725_v5 = vld [vmem:[%s6843_s4 + $0x268] sm:$0xff] }
 0x910   :  { %v2380_v47 = vmul.f32 %v2337_v39, %v5825_v38  ;;  %v2689_v23 = vmul.f32 0.044715, %v2657_v16  ;;  %v2583_v52 = vpop.f32.mrf.mxu0  ;;  %2959 = vmatmul.f32.gmra.mxu1 %v2874_v21  ;;  %v2718_v27 = vadd.f32 %v2686_v12, %v6110_v49 }
 0x911   :  { %v2341_v53 = vmul.f32 0.5, %v2340_v6  ;;  %v2624_v3 = vmul.f32 %v6144_v18, %v6144_v18  ;;  %v6155_v32 = vadd.f32 %v2583_v52, %v5972_v60  ;;  %v2845_v40 = vmul.f32 0.5, %v2813_v35  ;;  %v3709_v52 = vld [vmem:[%s6843_s4 + $0x1e8] sm:$0xff] }
 0x912   :  { %v2721_v38 = vadd.f32 %v2689_v23, %v6119_v4  ;;  %v2396_v1 = vmul.f32 %v3724_v55, %v2380_v47  ;;  %v4087_v14 = vpop.eup %4086  ;;  %v2750_v36 = vmul.f32 0.7978846, %v2718_v27 }
 0x913   :  { %v2342_v31 = vsub.f32 1.5, %v2341_v53  ;;  %v2656_v45 = vmul.f32 %v2624_v3, %v6144_v18  ;;  %v2627_v22 = vmul.f32 %v6155_v32, %v6155_v32  ;;  %v2877_v59 = vmul.f32 %v2845_v40, %v6046_v58 }
 0x914   :  { %v2412_v57 = vadd.f32 %v3708_v11, %v2396_v1  ;;  %v2753_v41 = vmul.f32 0.7978846, %v2721_v38  ;;  %v2812_v20 = vadd.f32 1.0, %v4087_v14  ;;  %v4089_v17 = vpop.eup %4088  ;;  %4090 = vtanh.f32 %v2750_v36 }
 0x915   :  { %v2343_v19 = vmul.f32 %v6130_v34, %v2342_v31  ;;  %v2688_v9 = vmul.f32 0.044715, %v2656_v45  ;;  %v2659_v42 = vmul.f32 %v2627_v22, %v6155_v32  ;;  %v2815_v6 = vadd.f32 1.0, %v4089_v17 }
 0x916   :  { %3027 = vmatmul.f32.gmra.mxu2 %v2877_v59  ;;  %v2518_v51 = vpop.f32.mrf.mxu3  ;;  %3868 = vmatmul.msk.f32.gmra.mxu3 %vm601_vm5, %v2412_v57  ;;  %v2844_v16 = vmul.f32 0.5, %v2812_v20  ;;  %4092 = vtanh.f32 %v2753_v41 }
 0x917   :  { %v2347_v58 = vsel %vm2346_vm6, %v6130_v34, %v2343_v19  ;;  %v2691_v25 = vmul.f32 0.044715, %v2659_v42  ;;  %v6175_v12 = vadd.f32 %v2518_v51, %v5997_v8  ;;  %3884 = vmatmul.msk.f32.gmra.mxu0 %vm601_vm5, %v2412_v57  ;;  %v2720_v35 = vadd.f32 %v2688_v9, %v6144_v18 }
 0x918   :  { %v2381_v37 = vmul.f32 %v2347_v58, %v5843_v7  ;;  %v2586_v39 = vpop.f32.mrf.mxu0  ;;  %v2876_v23 = vmul.f32 %v2844_v16, %v6071_v43  ;;  %v2847_v21 = vmul.f32 0.5, %v2815_v6 }
 0x919   :  { %v2723_v34 = vadd.f32 %v2691_v25, %v6155_v32  ;;  %v2626_v55 = vmul.f32 %v6175_v12, %v6175_v12  ;;  %v2587_v47 = vadd.f32 %v2586_v39, %v5972_v60  ;;  %v2752_v53 = vmul.f32 0.7978846, %v2720_v35 }
 0x91a   :  { %v2397_v7 = vmul.f32 %v3725_v5, %v2381_v37  ;;  %2962 = vmatmul.f32.gmra.mxu1 %v2876_v23  ;;  %v4091_v38 = vpop.eup %4090  ;;  %v2879_v1 = vmul.f32 %v2847_v21, %v6082_v24 }
 0x91b   :  { %v2658_v3 = vmul.f32 %v2626_v55, %v6175_v12  ;;  %v2629_v40 = vmul.f32 %v2587_v47, %v2587_v47  ;;  %v2755_v11 = vmul.f32 0.7978846, %v2723_v34  ;;  %4094 = vtanh.f32 %v2752_v53 }
 0x91c   :  { %v2413_v27 = vadd.f32 %v3709_v52, %v2397_v7  ;;  %v2814_v43 = vadd.f32 1.0, %v4091_v38  ;;  %v4093_v22 = vpop.eup %4092 }
 0x91d   :  { %v2690_v31 = vmul.f32 0.044715, %v2658_v3  ;;  %v2661_v45 = vmul.f32 %v2629_v40, %v2587_v47  ;;  %4096 = vtanh.f32 %v2755_v11  ;;  %v2817_v41 = vadd.f32 1.0, %v4093_v22 }
 0x91e   :  { %3030 = vmatmul.f32.gmra.mxu2 %v2879_v1  ;;  %v2521_v59 = vpop.f32.mrf.mxu3  ;;  %3869 = vmatmul.msk.f32.gmra.mxu3 %vm601_vm5, %v2413_v27  ;;  %v2846_v36 = vmul.f32 0.5, %v2814_v43 }
 0x91f   :  { %v2693_v14 = vmul.f32 0.044715, %v2661_v45  ;;  %v2522_v57 = vadd.f32 %v2521_v59, %v5997_v8  ;;  %3885 = vmatmul.msk.f32.gmra.mxu0 %vm601_vm5, %v2413_v27  ;;  %v2722_v24 = vadd.f32 %v2690_v31, %v6175_v12  ;;  %v2849_v20 = vmul.f32 0.5, %v2817_v41 }
 0x920   :  { %v2878_v42 = vmul.f32 %v2846_v36, %v6110_v49 }
 0x921   :  { %v2725_v19 = vadd.f32 %v2693_v14, %v2587_v47  ;;  %v2628_v9 = vmul.f32 %v2522_v57, %v2522_v57  ;;  %v4095_v17 = vpop.eup %4094  ;;  %v2754_v51 = vmul.f32 0.7978846, %v2722_v24  ;;  %v2881_v16 = vmul.f32 %v2849_v20, %v6119_v4 }
 0x922   :  { %2965 = vmatmul.f32.gmra.mxu1 %v2878_v42  ;;  %v2816_v5 = vadd.f32 1.0, %v4095_v17  ;;  %v3726_v17 = vld [vmem:[%s6843_s4 + $0x270] sm:$0xff] }
 0x923   :  { %v4097_v58 = vpop.eup %4096  ;;  %v2660_v25 = vmul.f32 %v2628_v9, %v2522_v57  ;;  %v2757_v37 = vmul.f32 0.7978846, %v2725_v19  ;;  %4098 = vtanh.f32 %v2754_v51 }
 0x924   :  { %v2819_v39 = vadd.f32 1.0, %v4097_v58  ;;  %v2848_v35 = vmul.f32 0.5, %v2816_v5  ;;  %v3710_v5 = vld [vmem:[%s6843_s4 + $0x1f0] sm:$0xff] }
 0x925   :  { %v2692_v6 = vmul.f32 0.044715, %v2660_v25  ;;  %4100 = vtanh.f32 %v2757_v37 }
 0x926   :  { %3033 = vmatmul.f32.gmra.mxu2 %v2881_v16  ;;  %v2851_v34 = vmul.f32 0.5, %v2819_v39  ;;  %v2880_v55 = vmul.f32 %v2848_v35, %v6144_v18 }
 0x927   :  { %v2724_v49 = vadd.f32 %v2692_v6, %v2522_v57 }
 0x928   :  { %v2883_v21 = vmul.f32 %v2851_v34, %v6155_v32 }
 0x929   :  { %v2756_v23 = vmul.f32 0.7978846, %v2724_v49  ;;  %v4099_v52 = vpop.eup %4098 }
 0x92a   :  { %2968 = vmatmul.f32.gmra.mxu1 %v2880_v55  ;;  %v2818_v53 = vadd.f32 1.0, %v4099_v52 }
 0x92b   :  { %v4101_v7 = vpop.eup %4100  ;;  %4102 = vtanh.f32 %v2756_v23 }
 0x92c   :  { %v2821_v4 = vadd.f32 1.0, %v4101_v7  ;;  %v2850_v3 = vmul.f32 0.5, %v2818_v53 }
 0x92e   :  { %3036 = vmatmul.f32.gmra.mxu2 %v2883_v21  ;;  %v2853_v40 = vmul.f32 0.5, %v2821_v4  ;;  %v2882_v11 = vmul.f32 %v2850_v3, %v6175_v12  ;;  %v3727_v21 = vld [vmem:[%s6843_s4 + $0x278] sm:$0xff] }
 0x930   :  { %v2885_v1 = vmul.f32 %v2853_v40, %v2587_v47 }
 0x931   :  { %v4103_v38 = vpop.eup %4102 }
 0x932   :  { %v2820_v27 = vadd.f32 1.0, %v4103_v38  ;;  %2971 = vmatmul.f32.gmra.mxu1 %v2882_v11  ;;  %v3711_v11 = vld [vmem:[%s6843_s4 + $0x1f8] sm:$0xff] }
 0x934   :  { %v2852_v18 = vmul.f32 0.5, %v2820_v27 }
 0x936   :  { %3039 = vmatmul.f32.gmra.mxu2 %v2885_v1  ;;  %v2884_v31 = vmul.f32 %v2852_v18, %v2522_v57 }
 0x93a   :  { %2974 = vmatmul.f32.gmra.mxu1 %v2884_v31 }
 0x954   :  { %v2172_v45 = vpop.xlane.xlu0 %2171 }
 0x955   :  { %v2190_v32 = vmul.f32 %v2172_v45, %v4757_v56 }
 0x957   :  { %v2206_v43 = vadd.f32 1e-06, %v2190_v32 }
 0x959   :  { %4104 = vrsqrt.f32 %v2206_v43  ;;  %vm2354_vm8 = vweird.f32 %v2206_v43 }
 0x95c   :  { %v2175_v22 = vpop.xlane.xlu2 %2174 }
 0x95d   :  { %v2191_v59 = vmul.f32 %v2175_v22, %v4757_v56 }
 0x95f   :  { %v4105_v14 = vpop.eup %4104  ;;  %v2207_v36 = vadd.f32 1e-06, %v2191_v59 }
 0x960   :  { %v2349_v41 = vmul.f32 %v4105_v14, %v2206_v43  ;;  %vm2355_vm7 = vweird.f32 %v4105_v14 }
 0x961   :  { %4106 = vrsqrt.f32 %v2207_v36  ;;  %vm2356_vm9 = vmor %vm2354_vm8, %vm2355_vm7  ;;  %vm2364_vm11 = vweird.f32 %v2207_v36 }
 0x962   :  { %v2350_v12 = vmul.f32 %v4105_v14, %v2349_v41 }
 0x964   :  { %v2351_v47 = vmul.f32 0.5, %v2350_v12 }
 0x966   :  { %v2352_v24 = vsub.f32 1.5, %v2351_v47 }
 0x967   :  { %v4107_v19 = vpop.eup %4106 }
 0x968   :  { %v2353_v9 = vmul.f32 %v4105_v14, %v2352_v24  ;;  %v2359_v57 = vmul.f32 %v4107_v19, %v2207_v36  ;;  %vm2365_vm10 = vweird.f32 %v4107_v19 }
 0x969   :  { %vm2366_vm12 = vmor %vm2364_vm11, %vm2365_vm10 }
 0x96a   :  { %v2357_v42 = vsel %vm2356_vm9, %v4105_v14, %v2353_v9  ;;  %v2360_v20 = vmul.f32 %v4107_v19, %v2359_v57 }
 0x96b   :  { %v2382_v51 = vmul.f32 %v2357_v42, %v5930_v48  ;;  %v2589_v58 = vpop.f32.mrf.mxu0 }
 0x96c   :  { %v2361_v25 = vmul.f32 0.5, %v2360_v20  ;;  %v2590_v16 = vadd.f32 %v2589_v58, %v5972_v60 }
 0x96d   :  { %v2398_v37 = vmul.f32 %v3726_v17, %v2382_v51 }
 0x96e   :  { %v2362_v39 = vsub.f32 1.5, %v2361_v25  ;;  %v2631_v6 = vmul.f32 %v2590_v16, %v2590_v16 }
 0x96f   :  { %v2414_v35 = vadd.f32 %v3710_v5, %v2398_v37 }
 0x970   :  { %v2363_v34 = vmul.f32 %v4107_v19, %v2362_v39  ;;  %v2663_v55 = vmul.f32 %v2631_v6, %v2590_v16  ;;  %v6256_v6 = vld [vmem:[%s6851_s16] ss:$0 sm:$0xff] }
 0x971   :  { %v2524_v49 = vpop.f32.mrf.mxu3  ;;  %3870 = vmatmul.msk.f32.gmra.mxu3 %vm601_vm5, %v2414_v35  ;;  %3886 = vmatmul.msk.f32.gmra.mxu0 %vm601_vm5, %v2414_v35 }
 0x972   :  { %v2367_v48 = vsel %vm2366_vm12, %v4107_v19, %v2363_v34  ;;  %v2695_v23 = vmul.f32 0.044715, %v2663_v55  ;;  %v6215_v52 = vadd.f32 %v2524_v49, %v5997_v8 }
 0x973   :  { %v2383_v7 = vmul.f32 %v2367_v48, %v5968_v46  ;;  %v2592_v53 = vpop.f32.mrf.mxu0 }
 0x974   :  { %v2727_v4 = vadd.f32 %v2695_v23, %v2590_v16  ;;  %v2630_v3 = vmul.f32 %v6215_v52, %v6215_v52  ;;  %v6224_v40 = vadd.f32 %v2592_v53, %v5972_v60 }
 0x975   :  { %v2399_v38 = vmul.f32 %v3727_v21, %v2383_v7 }
 0x976   :  { %v2662_v1 = vmul.f32 %v2630_v3, %v6215_v52  ;;  %v2633_v27 = vmul.f32 %v6224_v40, %v6224_v40  ;;  %v2759_v18 = vmul.f32 0.7978846, %v2727_v4 }
 0x977   :  { %v2415_v46 = vadd.f32 %v3711_v11, %v2399_v38 }
 0x978   :  { %v2694_v31 = vmul.f32 0.044715, %v2662_v1  ;;  %v2665_v45 = vmul.f32 %v2633_v27, %v6224_v40  ;;  %4108 = vtanh.f32 %v2759_v18 }
 0x979   :  { %v2527_v32 = vpop.f32.mrf.mxu3  ;;  %3871 = vmatmul.msk.f32.gmra.mxu3 %vm601_vm5, %v2415_v46  ;;  %3887 = vmatmul.msk.f32.gmra.mxu0 %vm601_vm5, %v2415_v46 }
 0x97a   :  { %v2697_v43 = vmul.f32 0.044715, %v2665_v45  ;;  %v6236_v22 = vadd.f32 %v2527_v32, %v5997_v8  ;;  %v2726_v59 = vadd.f32 %v2694_v31, %v6215_v52  ;;  %v3728_v31 = vld [vmem:[%s6843_s4 + $0x280] sm:$0xff] }
 0x97b   :  { %v2595_v14 = vpop.f32.mrf.mxu0 }
 0x97c   :  { %v2729_v36 = vadd.f32 %v2697_v43, %v6224_v40  ;;  %v2632_v41 = vmul.f32 %v6236_v22, %v6236_v22  ;;  %v6243_v12 = vadd.f32 %v2595_v14, %v5972_v60  ;;  %v2758_v47 = vmul.f32 0.7978846, %v2726_v59 }
 0x97e   :  { %v4109_v24 = vpop.eup %4108  ;;  %v2664_v19 = vmul.f32 %v2632_v41, %v6236_v22  ;;  %v2635_v9 = vmul.f32 %v6243_v12, %v6243_v12  ;;  %4110 = vtanh.f32 %v2758_v47  ;;  %v2761_v57 = vmul.f32 0.7978846, %v2729_v36 }
 0x97f   :  { %v2823_v42 = vadd.f32 1.0, %v4109_v24 }
 0x980   :  { %v2696_v20 = vmul.f32 0.044715, %v2664_v19  ;;  %v2667_v17 = vmul.f32 %v2635_v9, %v6243_v12  ;;  %4112 = vtanh.f32 %v2761_v57 }
 0x981   :  { %v2530_v51 = vpop.f32.mrf.mxu3  ;;  %v2855_v58 = vmul.f32 0.5, %v2823_v42 }
 0x982   :  { %v2728_v25 = vadd.f32 %v2696_v20, %v6236_v22  ;;  %v2699_v5 = vmul.f32 0.044715, %v2667_v17  ;;  %v6251_v37 = vadd.f32 %v2530_v51, %v5997_v8 }
 0x983   :  { %v2598_v39 = vpop.f32.mrf.mxu0  ;;  %v2887_v35 = vmul.f32 %v2855_v58, %v2590_v16 }
 0x984   :  { %v4111_v34 = vpop.eup %4110  ;;  %v2731_v55 = vadd.f32 %v2699_v5, %v6243_v12  ;;  %v2634_v49 = vmul.f32 %v6251_v37, %v6251_v37  ;;  %v6262_v48 = vadd.f32 %v2598_v39, %v5972_v60  ;;  %v2760_v23 = vmul.f32 0.7978846, %v2728_v25 }
 0x985   :  { %3042 = vmatmul.f32.gmra.mxu2 %v2887_v35  ;;  %v2822_v21 = vadd.f32 1.0, %v4111_v34  ;;  %v2957_v3 = vpop.f32.mrf.mxu1  ;;  %v3022_v38 = vpop.f32.mrf.mxu2 }
 0x986   :  { %v4113_v7 = vpop.eup %4112  ;;  %v2666_v53 = vmul.f32 %v2634_v49, %v6251_v37  ;;  %v2637_v4 = vmul.f32 %v6262_v48, %v6262_v48  ;;  %4114 = vtanh.f32 %v2760_v23  ;;  %v2763_v16 = vmul.f32 0.7978846, %v2731_v55 }
 0x987   :  { %v2958_v11 = vadd.f32 %v6256_v6, %v2957_v3  ;;  %v2854_v1 = vmul.f32 0.5, %v2822_v21  ;;  %v2825_v27 = vadd.f32 1.0, %v4113_v7  ;;  %v3729_v21 = vld [vmem:[%s6843_s4 + $0x288] sm:$0xff] }
 0x988   :  { %v2698_v18 = vmul.f32 0.044715, %v2666_v53  ;;  %v2669_v46 = vmul.f32 %v2637_v4, %v6262_v48  ;;  %4116 = vtanh.f32 %v2763_v16 }
 0x989   :  { %v3023_v45 = vadd.f32 %v3022_v38, %v2958_v11  ;;  %v2533_v32 = vpop.f32.mrf.mxu3  ;;  %v2886_v43 = vmul.f32 %v2854_v1, %v6215_v52  ;;  %v2857_v59 = vmul.f32 0.5, %v2825_v27 }
 0x98a   :  { %v2730_v14 = vadd.f32 %v2698_v18, %v6251_v37  ;;  %v2701_v36 = vmul.f32 0.044715, %v2669_v46  ;;  %v6275_v41 = vadd.f32 %v2533_v32, %v5997_v8 }
 0x98b   :  { %v3070_v47 = vmul.f32 %v3728_v31, %v3023_v45  ;;  %2977 = vmatmul.f32.gmra.mxu1 %v2886_v43  ;;  %v2889_v24 = vmul.f32 %v2857_v59, %v6224_v40 }
 0x98c   :  { %v4115_v19 = vpop.eup %4114  ;;  %v2733_v9 = vadd.f32 %v2701_v36, %v6262_v48  ;;  %v2636_v57 = vmul.f32 %v6275_v41, %v6275_v41  ;;  %v2601_v42 = vpop.f32.mrf.mxu0  ;;  %v2762_v20 = vmul.f32 0.7978846, %v2730_v14 }
 0x98d   :  { %v6282_v52 = vadd.f32 %v2601_v42, %v5972_v60  ;;  %3045 = vmatmul.f32.gmra.mxu2 %v2889_v24  ;;  %v6285_v17 = vadd.f32 %v3070_v47, %v5472_v50  ;;  %v2824_v51 = vadd.f32 1.0, %v4115_v19  ;;  %v2960_v39 = vpop.f32.mrf.mxu1 }
 0x98e   :  { %v4117_v58 = vpop.eup %4116  ;;  %v2668_v25 = vmul.f32 %v2636_v57, %v6275_v41  ;;  %4118 = vtanh.f32 %v2762_v20  ;;  %v2765_v40 = vmul.f32 0.7978846, %v2733_v9  ;;  %v2961_v23 = vadd.f32 %v6256_v6, %v2960_v39 }
 0x98f   :  { %v2639_v5 = vmul.f32 %v6282_v52, %v6282_v52  ;;  %v3102_v35 = vsel %vm601_vm5, %v6285_v17, 0.0  ;;  %v2856_v34 = vmul.f32 0.5, %v2824_v51  ;;  %v2827_v55 = vadd.f32 1.0, %v4117_v58 }
 0x990   :  { %v2700_v49 = vmul.f32 0.044715, %v2668_v25  ;;  %3103 = vadd.xlane.f32.xlu1 %v3102_v35  ;;  %4120 = vtanh.f32 %v2765_v40  ;;  %v3730_v35 = vld [vmem:[%s6843_s4 + $0x290] sm:$0xff] }
 0x991   :  { %v2671_v50 = vmul.f32 %v2639_v5, %v6282_v52  ;;  %v3025_v7 = vpop.f32.mrf.mxu2  ;;  %v2536_v53 = vpop.f32.mrf.mxu3  ;;  %v2888_v4 = vmul.f32 %v2856_v34, %v6236_v22  ;;  %v2859_v3 = vmul.f32 0.5, %v2827_v55 }
 0x992   :  { %v2732_v16 = vadd.f32 %v2700_v49, %v6275_v41  ;;  %v3026_v11 = vadd.f32 %v3025_v7, %v2961_v23  ;;  %v6300_v38 = vadd.f32 %v2536_v53, %v5997_v8 }
 0x993   :  { %v2703_v1 = vmul.f32 0.044715, %v2671_v50  ;;  %2980 = vmatmul.f32.gmra.mxu1 %v2888_v4  ;;  %v2891_v27 = vmul.f32 %v2859_v3, %v6243_v12 }
 0x994   :  { %v4119_v18 = vpop.eup %4118  ;;  %v3071_v46 = vmul.f32 %v3729_v21, %v3026_v11  ;;  %v2638_v31 = vmul.f32 %v6300_v38, %v6300_v38  ;;  %v2604_v45 = vpop.f32.mrf.mxu0  ;;  %v2764_v32 = vmul.f32 0.7978846, %v2732_v16 }
 0x995   :  { %v2735_v22 = vadd.f32 %v2703_v1, %v6282_v52  ;;  %v6307_v43 = vadd.f32 %v2604_v45, %v5972_v60  ;;  %3048 = vmatmul.f32.gmra.mxu2 %v2891_v27  ;;  %v2826_v59 = vadd.f32 1.0, %v4119_v18 }
 0x996   :  { %v4121_v14 = vpop.eup %4120  ;;  %v2670_v36 = vmul.f32 %v2638_v31, %v6300_v38  ;;  %v6311_v47 = vadd.f32 %v3071_v46, %v5482_v13  ;;  %4122 = vtanh.f32 %v2764_v32 }
 0x997   :  { %v2641_v12 = vmul.f32 %v6307_v43, %v6307_v43  ;;  %v2858_v24 = vmul.f32 0.5, %v2826_v59  ;;  %v2829_v19 = vadd.f32 1.0, %v4121_v14  ;;  %v2767_v9 = vmul.f32 0.7978846, %v2735_v22  ;;  %v2963_v42 = vpop.f32.mrf.mxu1 }
 0x998   :  { %v2702_v57 = vmul.f32 0.044715, %v2670_v36  ;;  %v3105_v20 = vsel %vm601_vm5, %v6311_v47, 0.0  ;;  %v2964_v58 = vadd.f32 %v6256_v6, %v2963_v42 }
 0x999   :  { %v2673_v51 = vmul.f32 %v2641_v12, %v6307_v43  ;;  %v3028_v25 = vpop.f32.mrf.mxu2  ;;  %3106 = vadd.xlane.f32.xlu0 %v3105_v20  ;;  %v2539_v13 = vpop.f32.mrf.mxu3  ;;  %v2890_v40 = vmul.f32 %v2858_v24, %v6251_v37  ;;  %v2861_v5 = vmul.f32 0.5, %v2829_v19  ;;  %4124 = vtanh.f32 %v2767_v9 }
 0x99a   :  { %v2734_v39 = vadd.f32 %v2702_v57, %v6300_v38  ;;  %v6325_v34 = vadd.f32 %v2539_v13, %v5997_v8  ;;  %v3029_v49 = vadd.f32 %v3028_v25, %v2964_v58 }
 0x99b   :  { %v2705_v55 = vmul.f32 0.044715, %v2673_v51  ;;  %2983 = vmatmul.f32.gmra.mxu1 %v2890_v40  ;;  %v2893_v23 = vmul.f32 %v2861_v5, %v6262_v48 }
 0x99c   :  { %v4123_v50 = vpop.eup %4122  ;;  %v2640_v37 = vmul.f32 %v6325_v34, %v6325_v34  ;;  %v2607_v21 = vpop.f32.mrf.mxu0  ;;  %v2766_v7 = vmul.f32 0.7978846, %v2734_v39  ;;  %v3072_v4 = vmul.f32 %v3730_v35, %v3029_v49 }
 0x99d   :  { %v2737_v53 = vadd.f32 %v2705_v55, %v6307_v43  ;;  %v6332_v3 = vadd.f32 %v2607_v21, %v5972_v60  ;;  %3051 = vmatmul.f32.gmra.mxu2 %v2893_v23  ;;  %v2828_v16 = vadd.f32 1.0, %v4123_v50 }
 0x99e   :  { %v2672_v11 = vmul.f32 %v2640_v37, %v6325_v34  ;;  %4126 = vtanh.f32 %v2766_v7  ;;  %v6338_v1 = vadd.f32 %v3072_v4, %v5492_v2  ;;  %v3731_v2 = vld [vmem:[%s6843_s4 + $0x298] sm:$0xff] }
 0x99f   :  { %v2643_v48 = vmul.f32 %v6332_v3, %v6332_v3  ;;  %v2860_v27 = vmul.f32 0.5, %v2828_v16  ;;  %v2769_v18 = vmul.f32 0.7978846, %v2737_v53  ;;  %v4125_v46 = vpop.eup %4124  ;;  %v2966_v45 = vpop.f32.mrf.mxu1 }
 0x9a0   :  { %v2704_v31 = vmul.f32 0.044715, %v2672_v11  ;;  %v2967_v22 = vadd.f32 %v6256_v6, %v2966_v45  ;;  %v3108_v14 = vsel %vm601_vm5, %v6338_v1, 0.0  ;;  %v2831_v9 = vadd.f32 1.0, %v4125_v46 }
 0x9a1   :  { %v2675_v32 = vmul.f32 %v2643_v48, %v6332_v3  ;;  %v3031_v59 = vpop.f32.mrf.mxu2  ;;  %v2542_v36 = vpop.f32.mrf.mxu3  ;;  %v2892_v12 = vmul.f32 %v2860_v27, %v6275_v41  ;;  %3109 = vadd.xlane.f32.xlu2 %v3108_v14  ;;  %4128 = vtanh.f32 %v2769_v18 }
 0x9a2   :  { %v2736_v24 = vadd.f32 %v2704_v31, %v6325_v34  ;;  %v6350_v19 = vadd.f32 %v2542_v36, %v5997_v8  ;;  %v3032_v42 = vadd.f32 %v3031_v59, %v2967_v22  ;;  %v2863_v41 = vmul.f32 0.5, %v2831_v9 }
 0x9a3   :  { %v2707_v57 = vmul.f32 0.044715, %v2675_v32  ;;  %2986 = vmatmul.f32.gmra.mxu1 %v2892_v12 }
 0x9a4   :  { %v4127_v20 = vpop.eup %4126  ;;  %v2642_v51 = vmul.f32 %v6350_v19, %v6350_v19  ;;  %v2768_v58 = vmul.f32 0.7978846, %v2736_v24  ;;  %v3073_v13 = vmul.f32 %v3731_v2, %v3032_v42  ;;  %v2895_v39 = vmul.f32 %v2863_v41, %v6282_v52 }
 0x9a5   :  { %v2739_v25 = vadd.f32 %v2707_v57, %v6332_v3  ;;  %v2830_v40 = vadd.f32 1.0, %v4127_v20 }
 0x9a6   :  { %v2674_v5 = vmul.f32 %v2642_v51, %v6350_v19  ;;  %4130 = vtanh.f32 %v2768_v58  ;;  %v6358_v35 = vadd.f32 %v3073_v13, %v5502_v10  ;;  %3054 = vmatmul.f32.gmra.mxu2 %v2895_v39  ;;  %v3732_v10 = vld [vmem:[%s6843_s4 + $0x2a0] sm:$0xff] }
 0x9a7   :  { %v2862_v55 = vmul.f32 0.5, %v2830_v40  ;;  %v2771_v49 = vmul.f32 0.7978846, %v2739_v25  ;;  %v4129_v23 = vpop.eup %4128  ;;  %v2969_v37 = vpop.f32.mrf.mxu1 }
 0x9a8   :  { %v2706_v50 = vmul.f32 0.044715, %v2674_v5  ;;  %v2970_v21 = vadd.f32 %v6256_v6, %v2969_v37  ;;  %v3111_v53 = vsel %vm601_vm5, %v6358_v35, 0.0  ;;  %v2833_v16 = vadd.f32 1.0, %v4129_v23  ;;  %v3734_v5 = vld [vmem:[%s6843_s4 + $0x2b0] sm:$0xff] }
 0x9a9   :  { %v3034_v7 = vpop.f32.mrf.mxu2  ;;  %v2894_v4 = vmul.f32 %v2862_v55, %v6300_v38  ;;  %3112 = vadd.xlane.f32.xlu1 %v3111_v53  ;;  %4132 = vtanh.f32 %v2771_v49 }
 0x9aa   :  { %v2738_v52 = vadd.f32 %v2706_v50, %v6350_v19  ;;  %v3035_v11 = vadd.f32 %v3034_v7, %v2970_v21  ;;  %v2865_v48 = vmul.f32 0.5, %v2833_v16 }
 0x9ab   :  { %2989 = vmatmul.f32.gmra.mxu1 %v2894_v4 }
 0x9ac   :  { %v4131_v27 = vpop.eup %4130  ;;  %v2770_v18 = vmul.f32 0.7978846, %v2738_v52  ;;  %v3074_v46 = vmul.f32 %v3732_v10, %v3035_v11  ;;  %v2897_v31 = vmul.f32 %v2865_v48, %v6307_v43  ;;  %v3733_v43 = vld [vmem:[%s6843_s4 + $0x2a8] sm:$0xff] }
 0x9ad   :  { %v2832_v45 = vadd.f32 1.0, %v4131_v27 }
 0x9ae   :  { %4134 = vtanh.f32 %v2770_v18  ;;  %v6370_v38 = vadd.f32 %v3074_v46, %v5512_v62  ;;  %3057 = vmatmul.f32.gmra.mxu2 %v2897_v31 }
 0x9af   :  { %v2864_v32 = vmul.f32 0.5, %v2832_v45  ;;  %v4133_v22 = vpop.eup %4132  ;;  %v2972_v59 = vpop.f32.mrf.mxu1 }
 0x9b0   :  { %v2973_v14 = vadd.f32 %v6256_v6, %v2972_v59  ;;  %v3114_v12 = vsel %vm601_vm5, %v6370_v38, 0.0  ;;  %v2835_v2 = vadd.f32 1.0, %v4133_v22 }
 0x9b1   :  { %v3037_v36 = vpop.f32.mrf.mxu2  ;;  %v2896_v24 = vmul.f32 %v2864_v32, %v6325_v34  ;;  %3115 = vadd.xlane.f32.xlu0 %v3114_v12 }
 0x9b2   :  { %v3038_v62 = vadd.f32 %v3037_v36, %v2973_v14  ;;  %v2867_v9 = vmul.f32 0.5, %v2835_v2 }
 0x9b3   :  { %2992 = vmatmul.f32.gmra.mxu1 %v2896_v24 }
 0x9b4   :  { %v4135_v57 = vpop.eup %4134  ;;  %v3075_v42 = vmul.f32 %v3733_v43, %v3038_v62  ;;  %v2899_v20 = vmul.f32 %v2867_v9, %v6332_v3 }
 0x9b5   :  { %v2834_v51 = vadd.f32 1.0, %v4135_v57 }
 0x9b6   :  { %v6381_v41 = vadd.f32 %v3075_v42, %v5522_v29  ;;  %3060 = vmatmul.f32.gmra.mxu2 %v2899_v20 }
 0x9b7   :  { %v2866_v58 = vmul.f32 0.5, %v2834_v51  ;;  %v2975_v25 = vpop.f32.mrf.mxu1 }
 0x9b8   :  { %v2976_v34 = vadd.f32 %v6256_v6, %v2975_v25  ;;  %v3117_v13 = vsel %vm601_vm5, %v6381_v41, 0.0 }
 0x9b9   :  { %v2898_v40 = vmul.f32 %v2866_v58, %v6350_v19  ;;  %v3040_v39 = vpop.f32.mrf.mxu2  ;;  %3118 = vadd.xlane.f32.xlu2 %v3117_v13 }
 0x9ba   :  { %v3041_v3 = vadd.f32 %v3040_v39, %v2976_v34  ;;  %v3735_v39 = vld [vmem:[%s6843_s4 + $0x2b8] sm:$0xff] }
 0x9bb   :  { %2995 = vmatmul.f32.gmra.mxu1 %v2898_v40 }
 0x9bc   :  { %v3076_v29 = vmul.f32 %v3734_v5, %v3041_v3 }
 0x9be   :  { %v6391_v55 = vadd.f32 %v3076_v29, %v5532_v15 }
 0x9c0   :  { %v3120_v49 = vsel %vm601_vm5, %v6391_v55, 0.0 }
 0x9c1   :  { %3121 = vadd.xlane.f32.xlu0 %v3120_v49 }
 0x9ee   :  { %v2610_v23 = vpop.f32.mrf.mxu0 }
 0x9ef   :  { %v2611_v50 = vadd.f32 %v2610_v23, %v5972_v60 }
 0x9f1   :  { %v2645_v19 = vmul.f32 %v2611_v50, %v2611_v50 }
 0x9f3   :  { %v2677_v37 = vmul.f32 %v2645_v19, %v2611_v50 }
 0x9f4   :  { %v2545_v21 = vpop.f32.mrf.mxu3 }
 0x9f5   :  { %v2709_v7 = vmul.f32 0.044715, %v2677_v37  ;;  %v2546_v53 = vadd.f32 %v2545_v21, %v5997_v8 }
 0x9f6   :  { %v2613_v4 = vpop.f32.mrf.mxu0 }
 0x9f7   :  { %v2741_v16 = vadd.f32 %v2709_v7, %v2611_v50  ;;  %v2644_v52 = vmul.f32 %v2546_v53, %v2546_v53  ;;  %v2614_v10 = vadd.f32 %v2613_v4, %v5972_v60 }
 0x9f9   :  { %v2676_v15 = vmul.f32 %v2644_v52, %v2546_v53  ;;  %v2647_v11 = vmul.f32 %v2614_v10, %v2614_v10  ;;  %v2773_v48 = vmul.f32 0.7978846, %v2741_v16 }
 0x9fb   :  { %v2708_v27 = vmul.f32 0.044715, %v2676_v15  ;;  %v2679_v18 = vmul.f32 %v2647_v11, %v2614_v10  ;;  %4136 = vtanh.f32 %v2773_v48 }
 0x9fc   :  { %v2548_v46 = vpop.f32.mrf.mxu3 }
 0x9fd   :  { %v2740_v31 = vadd.f32 %v2708_v27, %v2546_v53  ;;  %v2711_v45 = vmul.f32 0.044715, %v2679_v18  ;;  %v2549_v32 = vadd.f32 %v2548_v46, %v5997_v8 }
 0x9ff   :  { %v2743_v22 = vadd.f32 %v2711_v45, %v2614_v10  ;;  %v2646_v59 = vmul.f32 %v2549_v32, %v2549_v32  ;;  %v2772_v14 = vmul.f32 0.7978846, %v2740_v31 }
 0xa01   :  { %v4137_v36 = vpop.eup %4136  ;;  %v2678_v12 = vmul.f32 %v2646_v59, %v2549_v32  ;;  %4138 = vtanh.f32 %v2772_v14  ;;  %v2775_v24 = vmul.f32 0.7978846, %v2743_v22 }
 0xa02   :  { %v2837_v2 = vadd.f32 1.0, %v4137_v36 }
 0xa03   :  { %v2710_v60 = vmul.f32 0.044715, %v2678_v12  ;;  %v3104_v43 = vpop.xlane.xlu1 %3103  ;;  %4140 = vtanh.f32 %v2775_v24 }
 0xa04   :  { %v3150_v62 = vmul.f32 %v3104_v43, %v4757_v56  ;;  %v2869_v9 = vmul.f32 0.5, %v2837_v2 }
 0xa05   :  { %v2742_v57 = vadd.f32 %v2710_v60, %v2549_v32 }
 0xa06   :  { %v6401_v42 = vsub.f32 %v6285_v17, %v3150_v62  ;;  %v2901_v20 = vmul.f32 %v2869_v9, %v2611_v50 }
 0xa07   :  { %v4139_v8 = vpop.eup %4138  ;;  %v2774_v51 = vmul.f32 0.7978846, %v2742_v57 }
 0xa08   :  { %v2978_v58 = vpop.f32.mrf.mxu1  ;;  %v3043_v25 = vpop.f32.mrf.mxu2  ;;  %3063 = vmatmul.f32.gmra.mxu2 %v2901_v20  ;;  %v3182_v34 = vmul.f32 %v6401_v42, %v6401_v42  ;;  %v2836_v13 = vadd.f32 1.0, %v4139_v8 }
 0xa09   :  { %v4141_v40 = vpop.eup %4140  ;;  %v2979_v5 = vadd.f32 %v6256_v6, %v2978_v58  ;;  %4142 = vtanh.f32 %v2774_v51 }
 0xa0a   :  { %v3198_v17 = vsel %vm601_vm5, %v3182_v34, 0.0  ;;  %v2868_v3 = vmul.f32 0.5, %v2836_v13  ;;  %v2839_v29 = vadd.f32 1.0, %v4141_v40  ;;  %v3738_v34 = vld [vmem:[%s6843_s4 + $0x2d0] sm:$0xff] }
 0xa0b   :  { %v3044_v49 = vadd.f32 %v3043_v25, %v2979_v5  ;;  %3199 = vadd.xlane.f32.xlu1 %v3198_v17 }
 0xa0c   :  { %v3107_v23 = vpop.xlane.xlu0 %3106  ;;  %v2900_v50 = vmul.f32 %v2868_v3, %v2546_v53  ;;  %v2871_v19 = vmul.f32 0.5, %v2839_v29 }
 0xa0d   :  { %v3077_v37 = vmul.f32 %v3735_v39, %v3044_v49  ;;  %v3151_v21 = vmul.f32 %v3107_v23, %v4757_v56 }
 0xa0e   :  { %2998 = vmatmul.f32.gmra.mxu1 %v2900_v50  ;;  %v2903_v7 = vmul.f32 %v2871_v19, %v2614_v10 }
 0xa0f   :  { %v4143_v4 = vpop.eup %4142  ;;  %v6412_v16 = vsub.f32 %v6311_v47, %v3151_v21  ;;  %v6415_v52 = vadd.f32 %v3077_v37, %v5550_v28  ;;  %v3736_v47 = vld [vmem:[%s6843_s4 + $0x2c0] sm:$0xff]  ;;  %v3739_v37 = vld [vmem:[%s6843_s4 + $0x2d8] sm:$0xff] }
 0xa10   :  { %v2981_v15 = vpop.f32.mrf.mxu1  ;;  %v3046_v11 = vpop.f32.mrf.mxu2  ;;  %3066 = vmatmul.f32.gmra.mxu2 %v2903_v7  ;;  %v2838_v48 = vadd.f32 1.0, %v4143_v4 }
 0xa11   :  { %v2982_v27 = vadd.f32 %v6256_v6, %v2981_v15  ;;  %v3123_v53 = vsel %vm601_vm5, %v6415_v52, 0.0  ;;  %v3183_v18 = vmul.f32 %v6412_v16, %v6412_v16 }
 0xa12   :  { %v2870_v10 = vmul.f32 0.5, %v2838_v48 }
 0xa13   :  { %v3047_v46 = vadd.f32 %v3046_v11, %v2982_v27  ;;  %3124 = vadd.xlane.f32.xlu1 %v3123_v53  ;;  %v3201_v28 = vsel %vm601_vm5, %v3183_v18, 0.0 }
 0xa14   :  { %3202 = vadd.xlane.f32.xlu2 %v3201_v28  ;;  %v2902_v31 = vmul.f32 %v2870_v10, %v2549_v32  ;;  %v3110_v22 = vpop.xlane.xlu2 %3109  ;;  %v3737_v32 = vld [vmem:[%s6843_s4 + $0x2c8] sm:$0xff]  ;;  %v3740_v10 = vld [vmem:[%s6843_s4 + $0x2e0] sm:$0xff] }
 0xa15   :  { %v3078_v45 = vmul.f32 %v3736_v47, %v3047_v46  ;;  %v3152_v59 = vmul.f32 %v3110_v22, %v4757_v56 }
 0xa16   :  { %3001 = vmatmul.f32.gmra.mxu1 %v2902_v31 }
 0xa17   :  { %v6428_v14 = vadd.f32 %v3078_v45, %v5566_v33  ;;  %v6431_v36 = vsub.f32 %v6338_v1, %v3152_v59 }
 0xa18   :  { %v2984_v12 = vpop.f32.mrf.mxu1  ;;  %v3049_v24 = vpop.f32.mrf.mxu2 }
 0xa19   :  { %v2985_v2 = vadd.f32 %v6256_v6, %v2984_v12  ;;  %v3126_v60 = vsel %vm601_vm5, %v6428_v14, 0.0  ;;  %v3184_v43 = vmul.f32 %v6431_v36, %v6431_v36 }
 0xa1b   :  { %v3050_v62 = vadd.f32 %v3049_v24, %v2985_v2  ;;  %v3204_v33 = vsel %vm601_vm5, %v3184_v43, 0.0 }
 0xa1c   :  { %3127 = vadd.xlane.f32.xlu2 %v3126_v60  ;;  %v3113_v9 = vpop.xlane.xlu1 %3112  ;;  %3205 = vadd.xlane.f32.xlu0 %v3204_v33 }
 0xa1d   :  { %v3079_v1 = vmul.f32 %v3737_v32, %v3050_v62  ;;  %v3153_v57 = vmul.f32 %v3113_v9, %v4757_v56  ;;  %v3741_v32 = vld [vmem:[%s6843_s4 + $0x2e8] sm:$0xff]  ;;  %v3493_v9 = vld [vmem:[%s6852_s17 + $0x38] sm:$0xff] }
 0xa1e   :  { %3554 = vmatpush.msra.mxu3 %v3493_v9 }
 0xa1f   :  { %v6444_v20 = vadd.f32 %v3079_v1, %v5582_v54  ;;  %v6447_v8 = vsub.f32 %v6358_v35, %v3153_v57  ;;  %v3492_v57 = vld [vmem:[%s6852_s17 + $0x30] sm:$0xff] }
 0xa20   :  { %v2987_v51 = vpop.f32.mrf.mxu1  ;;  %v3052_v25 = vpop.f32.mrf.mxu2  ;;  %3555 = vmatpush.msra.mxu3 %v3492_v57 }
 0xa21   :  { %v2988_v58 = vadd.f32 %v6256_v6, %v2987_v51  ;;  %v3185_v13 = vmul.f32 %v6447_v8, %v6447_v8  ;;  %v3129_v40 = vsel %vm601_vm5, %v6444_v20, 0.0  ;;  %v3491_v51 = vld [vmem:[%s6852_s17 + $0x28] sm:$0xff] }
 0xa22   :  { %3556 = vmatpush.msra.mxu3 %v3491_v51 }
 0xa23   :  { %v3053_v5 = vadd.f32 %v3052_v25, %v2988_v58  ;;  %v3207_v54 = vsel %vm601_vm5, %v3185_v13, 0.0  ;;  %v3489_v58 = vld [vmem:[%s6852_s17 + $0x18] sm:$0xff]  ;;  %v3488_v25 = vld [vmem:[%s6852_s17 + $0x10] sm:$0xff]  ;;  %v3486_v13 = vld [vmem:[%s6852_s17] sm:$0xff] }
 0xa24   :  { %v3116_v35 = vpop.xlane.xlu0 %3115  ;;  %3208 = vadd.xlane.f32.xlu1 %v3207_v54  ;;  %3130 = vadd.xlane.f32.xlu0 %v3129_v40 }
 0xa25   :  { %v3080_v39 = vmul.f32 %v3738_v34, %v3053_v5  ;;  %v3154_v17 = vmul.f32 %v3116_v35, %v4757_v56  ;;  %v3487_v34 = vld [vmem:[%s6852_s17 + $0x8] sm:$0xff] }
 0xa27   :  { %v6460_v3 = vadd.f32 %v3080_v39, %v5598_v30  ;;  %v6463_v29 = vsub.f32 %v6370_v38, %v3154_v17 }
 0xa28   :  { %v2990_v49 = vpop.f32.mrf.mxu1 }
 0xa29   :  { %v2991_v23 = vadd.f32 %v6256_v6, %v2990_v49  ;;  %v3132_v50 = vsel %vm601_vm5, %v6460_v3, 0.0  ;;  %v3186_v19 = vmul.f32 %v6463_v29, %v6463_v29  ;;  %v3055_v21 = vpop.f32.mrf.mxu2 }
 0xa2b   :  { %v3056_v7 = vadd.f32 %v3055_v21, %v2991_v23  ;;  %v3210_v30 = vsel %vm601_vm5, %v3186_v19, 0.0 }
 0xa2c   :  { %3133 = vadd.xlane.f32.xlu1 %v3132_v50  ;;  %3211 = vadd.xlane.f32.xlu2 %v3210_v30  ;;  %v3119_v38 = vpop.xlane.xlu2 %3118 }
 0xa2d   :  { %v3081_v4 = vmul.f32 %v3739_v37, %v3056_v7  ;;  %v3155_v15 = vmul.f32 %v3119_v38, %v4757_v56 }
 0xa2f   :  { %v6476_v11 = vsub.f32 %v6381_v41, %v3155_v15  ;;  %v6479_v27 = vadd.f32 %v3081_v4, %v5626_v26  ;;  %v3742_v15 = vld [vmem:[%s6843_s4 + $0x2f0] sm:$0xff] }
 0xa30   :  { %v2993_v48 = vpop.f32.mrf.mxu1 }
 0xa31   :  { %v2994_v53 = vadd.f32 %v6256_v6, %v2993_v48  ;;  %v3135_v18 = vsel %vm601_vm5, %v6479_v27, 0.0  ;;  %v3187_v47 = vmul.f32 %v6476_v11, %v6476_v11  ;;  %v3058_v46 = vpop.f32.mrf.mxu2 }
 0xa33   :  { %v3059_v28 = vadd.f32 %v3058_v46, %v2994_v53  ;;  %v3213_v41 = vsel %vm601_vm5, %v3187_v47, 0.0 }
 0xa34   :  { %v3122_v31 = vpop.xlane.xlu0 %3121  ;;  %3136 = vadd.xlane.f32.xlu2 %v3135_v18  ;;  %3214 = vadd.xlane.f32.xlu0 %v3213_v41 }
 0xa35   :  { %v3082_v26 = vmul.f32 %v3740_v10, %v3059_v28  ;;  %v3156_v45 = vmul.f32 %v3122_v31, %v4757_v56 }
 0xa37   :  { %v6492_v22 = vsub.f32 %v6391_v55, %v3156_v45  ;;  %v6495_v12 = vadd.f32 %v3082_v26, %v5648_v44 }
 0xa38   :  { %v2996_v59 = vpop.f32.mrf.mxu1 }
 0xa39   :  { %v2997_v24 = vadd.f32 %v6256_v6, %v2996_v59  ;;  %v3188_v2 = vmul.f32 %v6492_v22, %v6492_v22  ;;  %v3138_v60 = vsel %vm601_vm5, %v6495_v12, 0.0  ;;  %v3061_v43 = vpop.f32.mrf.mxu2 }
 0xa3b   :  { %v3062_v62 = vadd.f32 %v3061_v43, %v2997_v24  ;;  %v3216_v55 = vsel %vm601_vm5, %v3188_v2, 0.0 }
 0xa3c   :  { %3217 = vadd.xlane.f32.xlu1 %v3216_v55  ;;  %3139 = vadd.xlane.f32.xlu0 %v3138_v60 }
 0xa3d   :  { %v3083_v44 = vmul.f32 %v3741_v32, %v3062_v62  ;;  %v3760_v32 = vld [vmem:[%s6843_s4 + $0x380] sm:$0xff] }
 0xa3f   :  { %v6507_v33 = vadd.f32 %v3083_v44, %v5663_v63  ;;  %v3490_v63 = vld [vmem:[%s6852_s17 + $0x20] sm:$0xff] }
 0xa40   :  { %3557 = vmatpush.msra.mxu3 %v3490_v63 }
 0xa41   :  { %v3141_v1 = vsel %vm601_vm5, %v6507_v33, 0.0 }
 0xa42   :  { %3558 = vmatpush.msra.mxu3 %v3489_v58 }
 0xa44   :  { %3142 = vadd.xlane.f32.xlu1 %v3141_v1  ;;  %3559 = vmatpush.msra.mxu3 %v3488_v25  ;;  %v3743_v1 = vld [vmem:[%s6843_s4 + $0x2f8] sm:$0xff] }
 0xa46   :  { %3560 = vmatpush.msra.mxu3 %v3487_v34 }
 0xa48   :  { %3561 = vmatpush.msra.mxu3 %v3486_v13 }
 0xa7e   :  { %v3200_v40 = vpop.xlane.xlu1 %3199 }
 0xa7f   :  { %v3246_v5 = vmul.f32 %v3200_v40, %v4757_v56 }
 0xa81   :  { %v3262_v54 = vadd.f32 1e-06, %v3246_v5 }
 0xa83   :  { %4144 = vrsqrt.f32 %v3262_v54  ;;  %vm3284_vm14 = vweird.f32 %v3262_v54 }
 0xa86   :  { %v3125_v39 = vpop.xlane.xlu1 %3124 }
 0xa87   :  { %v3157_v35 = vmul.f32 %v3125_v39, %v4757_v56  ;;  %v3203_v17 = vpop.xlane.xlu2 %3202 }
 0xa88   :  { %v3247_v49 = vmul.f32 %v3203_v17, %v4757_v56 }
 0xa89   :  { %v4145_v23 = vpop.eup %4144  ;;  %v6539_v50 = vsub.f32 %v6415_v52, %v3157_v35 }
 0xa8a   :  { %v3279_v19 = vmul.f32 %v4145_v23, %v3262_v54  ;;  %v3263_v37 = vadd.f32 1e-06, %v3247_v49  ;;  %vm3285_vm13 = vweird.f32 %v4145_v23 }
 0xa8b   :  { %v2999_v21 = vpop.f32.mrf.mxu1  ;;  %v3064_v7 = vpop.f32.mrf.mxu2  ;;  %v3189_v30 = vmul.f32 %v6539_v50, %v6539_v50  ;;  %vm3286_vm15 = vmor %vm3284_vm14, %vm3285_vm13 }
 0xa8c   :  { %v3280_v38 = vmul.f32 %v4145_v23, %v3279_v19  ;;  %4146 = vrsqrt.f32 %v3263_v37  ;;  %v3000_v4 = vadd.f32 %v6256_v6, %v2999_v21  ;;  %vm3294_vm1 = vweird.f32 %v3263_v37 }
 0xa8d   :  { %v3219_v48 = vsel %vm601_vm5, %v3189_v30, 0.0 }
 0xa8e   :  { %v3281_v53 = vmul.f32 0.5, %v3280_v38  ;;  %v3065_v52 = vadd.f32 %v3064_v7, %v3000_v4  ;;  %3220 = vadd.xlane.f32.xlu2 %v3219_v48  ;;  %v3745_v4 = vld [vmem:[%s6843_s4 + $0x308] sm:$0xff] }
 0xa8f   :  { %v3128_v18 = vpop.xlane.xlu2 %3127  ;;  %v3206_v46 = vpop.xlane.xlu0 %3205 }
 0xa90   :  { %v3282_v47 = vsub.f32 1.5, %v3281_v53  ;;  %v3084_v10 = vmul.f32 %v3742_v15, %v3065_v52  ;;  %v3158_v28 = vmul.f32 %v3128_v18, %v4757_v56  ;;  %v3248_v41 = vmul.f32 %v3206_v46, %v4757_v56 }
 0xa92   :  { %v4147_v31 = vpop.eup %4146  ;;  %v3283_v26 = vmul.f32 %v4145_v23, %v3282_v47  ;;  %v6551_v45 = vsub.f32 %v6428_v14, %v3158_v28  ;;  %v6554_v59 = vadd.f32 %v3084_v10, %v5713_v0  ;;  %v6556_v2 = vadd.f32 1e-06, %v3248_v41 }
 0xa93   :  { %v3289_v24 = vmul.f32 %v4147_v31, %v3263_v37  ;;  %v3002_v60 = vpop.f32.mrf.mxu1  ;;  %v3067_v9 = vpop.f32.mrf.mxu2  ;;  %vm3295_vm0 = vweird.f32 %v4147_v31  ;;  %v3761_v37 = vld [vmem:[%s6843_s4 + $0x388] sm:$0xff] }
 0xa94   :  { %v3287_v43 = vsel %vm3286_vm15, %v4145_v23, %v3283_v26  ;;  %v3003_v62 = vadd.f32 %v6256_v6, %v3002_v60  ;;  %v3144_v55 = vsel %vm601_vm5, %v6554_v59, 0.0  ;;  %v3190_v14 = vmul.f32 %v6551_v45, %v6551_v45  ;;  %v3744_v6 = vld [vmem:[%s6843_s4 + $0x300] sm:$0xff]  ;;  %vm3296_vm2 = vmor %vm3294_vm1, %vm3295_vm0 }
 0xa95   :  { %v3438_v0 = vmul.f32 %v3287_v43, %v6401_v42  ;;  %v3290_v44 = vmul.f32 %v4147_v31, %v3289_v24  ;;  %4148 = vrsqrt.f32 %v6556_v2  ;;  %vm3304_vm4 = vweird.f32 %v6556_v2  ;;  %v3762_v43 = vld [vmem:[%s6843_s4 + $0x390] sm:$0xff] }
 0xa96   :  { %v3068_v57 = vadd.f32 %v3067_v9, %v3003_v62  ;;  %3145 = vadd.xlane.f32.xlu2 %v3144_v55  ;;  %v3222_v51 = vsel %vm601_vm5, %v3190_v14, 0.0 }
 0xa97   :  { %v3454_v63 = vmul.f32 %v3760_v32, %v3438_v0  ;;  %v3291_v58 = vmul.f32 0.5, %v3290_v44  ;;  %3223 = vadd.xlane.f32.xlu0 %v3222_v51  ;;  %v3209_v25 = vpop.xlane.xlu1 %3208  ;;  %v3131_v34 = vpop.xlane.xlu0 %3130  ;;  %v3746_v0 = vld [vmem:[%s6843_s4 + $0x310] sm:$0xff] }
 0xa98   :  { %v3085_v42 = vmul.f32 %v3743_v1, %v3068_v57  ;;  %v3249_v5 = vmul.f32 %v3209_v25, %v4757_v56  ;;  %v3159_v54 = vmul.f32 %v3131_v34, %v4757_v56 }
 0xa99   :  { %v3470_v13 = vadd.f32 %v3744_v6, %v3454_v63  ;;  %v3292_v40 = vsub.f32 1.5, %v3291_v58 }
 0xa9a   :  { %v6578_v39 = vadd.f32 %v3085_v42, %v5740_v61  ;;  %v3265_v49 = vadd.f32 1e-06, %v3249_v5  ;;  %v6581_v23 = vsub.f32 %v6444_v20, %v3159_v54 }
 0xa9b   :  { %v4149_v35 = vpop.eup %4148  ;;  %v3293_v17 = vmul.f32 %v4147_v31, %v3292_v40  ;;  %3888 = vmatmul.msk.f32.vlgmr.msra.gmra.mxu3 %vm601_vm5, %v3470_v13  ;;  %v3763_v40 = vld [vmem:[%s6843_s4 + $0x398] sm:$0xff] }
 0xa9c   :  { %v3299_v19 = vmul.f32 %v4149_v35, %v6556_v2  ;;  %v3147_v21 = vsel %vm601_vm5, %v6578_v39, 0.0  ;;  %4150 = vrsqrt.f32 %v3265_v49  ;;  %v3191_v61 = vmul.f32 %v6581_v23, %v6581_v23 }
 0xa9d   :  { %v3297_v7 = vsel %vm3296_vm2, %v4147_v31, %v3293_v17  ;;  %vm3305_vm3 = vweird.f32 %v4149_v35  ;;  %vm3314_vm8 = vweird.f32 %v3265_v49 }
 0xa9e   :  { %v3439_v20 = vmul.f32 %v3297_v7, %v6412_v16  ;;  %v3300_v30 = vmul.f32 %v4149_v35, %v3299_v19  ;;  %v3225_v38 = vsel %vm601_vm5, %v3191_v61, 0.0  ;;  %vm3306_vm6 = vmor %vm3304_vm4, %vm3305_vm3 }
 0xa9f   :  { %3148 = vadd.xlane.f32.xlu0 %v3147_v21  ;;  %v3134_v48 = vpop.xlane.xlu1 %3133  ;;  %3226 = vadd.xlane.f32.xlu1 %v3225_v38  ;;  %v3212_v53 = vpop.xlane.xlu2 %3211 }
 0xaa0   :  { %v3301_v15 = vmul.f32 0.5, %v3300_v30  ;;  %v3455_v52 = vmul.f32 %v3761_v37, %v3439_v20  ;;  %v3160_v18 = vmul.f32 %v3134_v48, %v4757_v56  ;;  %v3250_v47 = vmul.f32 %v3212_v53, %v4757_v56 }
 0xaa2   :  { %v3302_v10 = vsub.f32 1.5, %v3301_v15  ;;  %v3471_v16 = vadd.f32 %v3745_v4, %v3455_v52  ;;  %v4151_v46 = vpop.eup %4150  ;;  %v6601_v28 = vsub.f32 %v6460_v3, %v3160_v18  ;;  %v3266_v41 = vadd.f32 1e-06, %v3250_v47  ;;  %v3764_v52 = vld [vmem:[%s6843_s4 + $0x3a0] sm:$0xff] }
 0xaa3   :  { %v3309_v26 = vmul.f32 %v4151_v46, %v3265_v49  ;;  %vm3315_vm7 = vweird.f32 %v4151_v46  ;;  %v3747_v49 = vld [vmem:[%s6843_s4 + $0x318] sm:$0xff] }
 0xaa4   :  { %v3303_v31 = vmul.f32 %v4149_v35, %v3302_v10  ;;  %3889 = vmatmul.msk.f32.gmra.mxu3 %vm601_vm5, %v3471_v16  ;;  %4152 = vrsqrt.f32 %v3266_v41  ;;  %v3192_v24 = vmul.f32 %v6601_v28, %v6601_v28  ;;  %vm3316_vm9 = vmor %vm3314_vm8, %vm3315_vm7  ;;  %vm3324_vm11 = vweird.f32 %v3266_v41  ;;  %v3748_v16 = vld [vmem:[%s6843_s4 + $0x320] sm:$0xff] }
 0xaa5   :  { %v3310_v32 = vmul.f32 %v4151_v46, %v3309_v26 }
 0xaa6   :  { %v3307_v60 = vsel %vm3306_vm6, %v4149_v35, %v3303_v31  ;;  %v3228_v62 = vsel %vm601_vm5, %v3192_v24, 0.0 }
 0xaa7   :  { %v3440_v3 = vmul.f32 %v3307_v60, %v6431_v36  ;;  %v3311_v55 = vmul.f32 0.5, %v3310_v32  ;;  %3229 = vadd.xlane.f32.xlu2 %v3228_v62  ;;  %v3215_v2 = vpop.xlane.xlu0 %3214  ;;  %v3137_v14 = vpop.xlane.xlu2 %3136 }
 0xaa8   :  { %v3251_v44 = vmul.f32 %v3215_v2, %v4757_v56  ;;  %v3161_v1 = vmul.f32 %v3137_v14, %v4757_v56 }
 0xaa9   :  { %v3456_v9 = vmul.f32 %v3762_v43, %v3440_v3  ;;  %v3312_v6 = vsub.f32 1.5, %v3311_v55  ;;  %v3765_v55 = vld [vmem:[%s6843_s4 + $0x3a8] sm:$0xff] }
 0xaaa   :  { %v4153_v57 = vpop.eup %4152  ;;  %v3267_v51 = vadd.f32 1e-06, %v3251_v44  ;;  %v6618_v36 = vsub.f32 %v6479_v27, %v3161_v1 }
 0xaab   :  { %v3472_v63 = vadd.f32 %v3746_v0, %v3456_v9  ;;  %v3313_v58 = vmul.f32 %v4151_v46, %v3312_v6  ;;  %v3319_v42 = vmul.f32 %v4153_v57, %v3266_v41  ;;  %vm3325_vm10 = vweird.f32 %v4153_v57  ;;  %v3749_v0 = vld [vmem:[%s6843_s4 + $0x328] sm:$0xff] }
 0xaac   :  { %4154 = vrsqrt.f32 %v3267_v51  ;;  %v3193_v25 = vmul.f32 %v6618_v36, %v6618_v36  ;;  %vm3326_vm12 = vmor %vm3324_vm11, %vm3325_vm10  ;;  %vm3334_vm14 = vweird.f32 %v3267_v51 }
 0xaad   :  { %3890 = vmatmul.msk.f32.gmra.mxu3 %vm601_vm5, %v3472_v63  ;;  %v3317_v34 = vsel %vm3316_vm9, %v4151_v46, %v3313_v58  ;;  %v3320_v13 = vmul.f32 %v4153_v57, %v3319_v42  ;;  %v3750_v63 = vld [vmem:[%s6843_s4 + $0x330] sm:$0xff] }
 0xaae   :  { %v3441_v27 = vmul.f32 %v3317_v34, %v6447_v8  ;;  %v3231_v5 = vsel %vm601_vm5, %v3193_v25, 0.0 }
 0xaaf   :  { %v3321_v54 = vmul.f32 0.5, %v3320_v13  ;;  %v3218_v35 = vpop.xlane.xlu1 %3217  ;;  %v3140_v17 = vpop.xlane.xlu0 %3139  ;;  %3232 = vadd.xlane.f32.xlu1 %v3231_v5 }
 0xab0   :  { %v3252_v19 = vmul.f32 %v3218_v35, %v4757_v56  ;;  %v3162_v21 = vmul.f32 %v3140_v17, %v4757_v56  ;;  %v3457_v7 = vmul.f32 %v3763_v40, %v3441_v27 }
 0xab1   :  { %v3322_v61 = vsub.f32 1.5, %v3321_v54 }
 0xab2   :  { %v4155_v37 = vpop.eup %4154  ;;  %v3268_v20 = vadd.f32 1e-06, %v3252_v19  ;;  %v6634_v8 = vsub.f32 %v6495_v12, %v3162_v21  ;;  %v3473_v30 = vadd.f32 %v3747_v49, %v3457_v7 }
 0xab3   :  { %v3323_v38 = vmul.f32 %v4153_v57, %v3322_v61  ;;  %v3329_v4 = vmul.f32 %v4155_v37, %v3267_v51  ;;  %vm3335_vm13 = vweird.f32 %v4155_v37 }
 0xab4   :  { %4156 = vrsqrt.f32 %v3268_v20  ;;  %v3194_v15 = vmul.f32 %v6634_v8, %v6634_v8  ;;  %vm3336_vm15 = vmor %vm3334_vm14, %vm3335_vm13  ;;  %vm3344_vm1 = vweird.f32 %v3268_v20 }
 0xab5   :  { %3891 = vmatmul.msk.f32.gmra.mxu3 %vm601_vm5, %v3473_v30  ;;  %v3327_v48 = vsel %vm3326_vm12, %v4153_v57, %v3323_v38  ;;  %v3330_v53 = vmul.f32 %v4155_v37, %v3329_v4 }
 0xab6   :  { %v3442_v12 = vmul.f32 %v3327_v48, %v6463_v29  ;;  %v3234_v18 = vsel %vm601_vm5, %v3194_v15, 0.0 }
 0xab7   :  { %v3331_v47 = vmul.f32 0.5, %v3330_v53  ;;  %v3143_v10 = vpop.xlane.xlu1 %3142  ;;  %3235 = vadd.xlane.f32.xlu0 %v3234_v18 }
 0xab8   :  { %v3163_v46 = vmul.f32 %v3143_v10, %v4757_v56  ;;  %v3458_v41 = vmul.f32 %v3764_v52, %v3442_v12 }
 0xab9   :  { %v3332_v31 = vsub.f32 1.5, %v3331_v47  ;;  %v3767_v47 = vld [vmem:[%s6843_s4 + $0x3b8] sm:$0xff] }
 0xaba   :  { %v4157_v26 = vpop.eup %4156  ;;  %v6649_v24 = vsub.f32 %v6507_v33, %v3163_v46  ;;  %v3474_v60 = vadd.f32 %v3748_v16, %v3458_v41 }
 0xabb   :  { %v3333_v29 = vmul.f32 %v4155_v37, %v3332_v31  ;;  %v3339_v32 = vmul.f32 %v4157_v26, %v3268_v20  ;;  %vm3345_vm0 = vweird.f32 %v4157_v26 }
 0xabc   :  { %v3195_v43 = vmul.f32 %v6649_v24, %v6649_v24  ;;  %vm3346_vm2 = vmor %vm3344_vm1, %vm3345_vm0 }
 0xabd   :  { %3892 = vmatmul.msk.f32.gmra.mxu3 %vm601_vm5, %v3474_v60  ;;  %v3337_v3 = vsel %vm3336_vm15, %v4155_v37, %v3333_v29  ;;  %v3340_v62 = vmul.f32 %v4157_v26, %v3339_v32  ;;  %v6698_v60 = vld [vmem:[%s6853_s18] ss:$0 sm:$0xff] }
 0xabe   :  { %v3443_v2 = vmul.f32 %v3337_v3, %v6476_v11  ;;  %v3237_v33 = vsel %vm601_vm5, %v3195_v43, 0.0  ;;  %v3766_v11 = vld [vmem:[%s6843_s4 + $0x3b0] sm:$0xff] }
 0xabf   :  { %v3341_v14 = vmul.f32 0.5, %v3340_v62  ;;  %3238 = vadd.xlane.f32.xlu2 %v3237_v33 }
 0xac0   :  { %v3459_v44 = vmul.f32 %v3765_v55, %v3443_v2 }
 0xac1   :  { %v3342_v1 = vsub.f32 1.5, %v3341_v14 }
 0xac2   :  { %v3475_v9 = vadd.f32 %v3749_v0, %v3459_v44  ;;  %v3768_v0 = vld [vmem:[%s6843_s4 + $0x3c0] sm:$0xff] }
 0xac3   :  { %v3343_v6 = vmul.f32 %v4157_v26, %v3342_v1 }
 0xac5   :  { %3893 = vmatmul.msk.f32.gmra.mxu3 %vm601_vm5, %v3475_v9  ;;  %v3347_v57 = vsel %vm3346_vm2, %v4157_v26, %v3343_v6  ;;  %v3752_v9 = vld [vmem:[%s6843_s4 + $0x340] sm:$0xff] }
 0xac6   :  { %v3444_v51 = vmul.f32 %v3347_v57, %v6492_v22 }
 0xac8   :  { %v3460_v58 = vmul.f32 %v3766_v11, %v3444_v51 }
 0xaca   :  { %v3476_v42 = vadd.f32 %v3750_v63, %v3460_v58 }
 0xacd   :  { %3894 = vmatmul.msk.f32.gmra.mxu3 %vm601_vm5, %v3476_v42 }
 0xb01   :  { %v3221_v25 = vpop.xlane.xlu2 %3220 }
 0xb02   :  { %v3253_v34 = vmul.f32 %v3221_v25, %v4757_v56 }
 0xb04   :  { %v3269_v13 = vadd.f32 1e-06, %v3253_v34 }
 0xb06   :  { %4158 = vrsqrt.f32 %v3269_v13  ;;  %vm3354_vm4 = vweird.f32 %v3269_v13 }
 0xb09   :  { %v3146_v40 = vpop.xlane.xlu2 %3145 }
 0xb0a   :  { %v3224_v27 = vpop.xlane.xlu0 %3223  ;;  %v3164_v5 = vmul.f32 %v3146_v40, %v4757_v56 }
 0xb0b   :  { %v3254_v54 = vmul.f32 %v3224_v27, %v4757_v56 }
 0xb0c   :  { %v4159_v22 = vpop.eup %4158  ;;  %v6675_v35 = vsub.f32 %v6554_v59, %v3164_v5 }
 0xb0d   :  { %v3349_v17 = vmul.f32 %v4159_v22, %v3269_v13  ;;  %v3270_v49 = vadd.f32 1e-06, %v3254_v54  ;;  %vm3355_vm3 = vweird.f32 %v4159_v22  ;;  %v3769_v54 = vld [vmem:[%s6843_s4 + $0x3c8] sm:$0xff] }
 0xb0e   :  { %v3196_v19 = vmul.f32 %v6675_v35, %v6675_v35  ;;  %vm3356_vm6 = vmor %vm3354_vm4, %vm3355_vm3 }
 0xb0f   :  { %v3350_v21 = vmul.f32 %v4159_v22, %v3349_v17  ;;  %4160 = vrsqrt.f32 %v3270_v49  ;;  %vm3364_vm8 = vweird.f32 %v3270_v49 }
 0xb10   :  { %v3240_v7 = vsel %vm601_vm5, %v3196_v19, 0.0  ;;  %v3753_v19 = vld [vmem:[%s6843_s4 + $0x348] sm:$0xff] }
 0xb11   :  { %v3351_v61 = vmul.f32 0.5, %v3350_v21  ;;  %3241 = vadd.xlane.f32.xlu1 %v3240_v7 }
 0xb12   :  { %v3149_v37 = vpop.xlane.xlu0 %3148  ;;  %v3227_v30 = vpop.xlane.xlu1 %3226 }
 0xb13   :  { %v3352_v20 = vsub.f32 1.5, %v3351_v61  ;;  %v3165_v38 = vmul.f32 %v3149_v37, %v4757_v56  ;;  %v3255_v59 = vmul.f32 %v3227_v30, %v4757_v56 }
 0xb15   :  { %v4161_v4 = vpop.eup %4160  ;;  %v3353_v15 = vmul.f32 %v4159_v22, %v3352_v20  ;;  %v6683_v48 = vsub.f32 %v6578_v39, %v3165_v38  ;;  %v3271_v52 = vadd.f32 1e-06, %v3255_v59  ;;  %v3751_v39 = vld [vmem:[%s6843_s4 + $0x338] sm:$0xff] }
 0xb16   :  { %v3359_v53 = vmul.f32 %v4161_v4, %v3270_v49  ;;  %vm3365_vm7 = vweird.f32 %v4161_v4 }
 0xb17   :  { %v3357_v12 = vsel %vm3356_vm6, %v4159_v22, %v3353_v15  ;;  %v3197_v18 = vmul.f32 %v6683_v48, %v6683_v48  ;;  %4162 = vrsqrt.f32 %v3271_v52  ;;  %vm3366_vm9 = vmor %vm3364_vm8, %vm3365_vm7  ;;  %vm3374_vm11 = vweird.f32 %v3271_v52 }
 0xb18   :  { %v3445_v10 = vmul.f32 %v3357_v12, %v6539_v50  ;;  %v3360_v16 = vmul.f32 %v4161_v4, %v3359_v53 }
 0xb19   :  { %v3243_v46 = vsel %vm601_vm5, %v3197_v18, 0.0 }
 0xb1a   :  { %v3361_v41 = vmul.f32 0.5, %v3360_v16  ;;  %3244 = vadd.xlane.f32.xlu0 %v3243_v46  ;;  %v3461_v31 = vmul.f32 %v3767_v47, %v3445_v10  ;;  %v3230_v26 = vpop.xlane.xlu2 %3229  ;;  %v3754_v10 = vld [vmem:[%s6843_s4 + $0x350] sm:$0xff] }
 0xb1b   :  { %v3256_v50 = vmul.f32 %v3230_v26, %v4757_v56 }
 0xb1c   :  { %v3362_v29 = vsub.f32 1.5, %v3361_v41  ;;  %v3477_v32 = vadd.f32 %v3751_v39, %v3461_v31 }
 0xb1d   :  { %v4163_v43 = vpop.eup %4162  ;;  %v3272_v62 = vadd.f32 1e-06, %v3256_v50 }
 0xb1e   :  { %v3363_v3 = vmul.f32 %v4161_v4, %v3362_v29  ;;  %v3563_v55 = vpop.f32.mrf.mxu3  ;;  %3895 = vmatmul.msk.f32.gmra.mxu3 %vm601_vm5, %v3477_v32  ;;  %v3369_v2 = vmul.f32 %v4163_v43, %v3271_v52  ;;  %vm3375_vm10 = vweird.f32 %v4163_v43  ;;  %v3770_v52 = vld [vmem:[%s6843_s4 + $0x3d0] sm:$0xff] }
 0xb1f   :  { %v3564_v33 = vadd.f32 %v6698_v60, %v3563_v55  ;;  %4164 = vrsqrt.f32 %v3272_v62  ;;  %vm3376_vm12 = vmor %vm3374_vm11, %vm3375_vm10  ;;  %vm3384_vm14 = vweird.f32 %v3272_v62 }
 0xb20   :  { %v3367_v14 = vsel %vm3366_vm9, %v4161_v4, %v3363_v3  ;;  %v3370_v1 = vmul.f32 %v4163_v43, %v3369_v2 }
 0xb21   :  { %v3446_v44 = vmul.f32 %v3367_v14, %v6551_v45  ;;  %3611 = vst [vmem:[%s6854_s19] sm:$0xff] %v3564_v33  ;;  %v3755_v33 = vld [vmem:[%s6843_s4 + $0x358] sm:$0xff] }
 0xb22   :  { %v3371_v6 = vmul.f32 0.5, %v3370_v1  ;;  %v3233_v57 = vpop.xlane.xlu1 %3232 }
 0xb23   :  { %v3462_v11 = vmul.f32 %v3768_v0, %v3446_v44  ;;  %v3257_v51 = vmul.f32 %v3233_v57, %v4757_v56 }
 0xb24   :  { %v3372_v63 = vsub.f32 1.5, %v3371_v6 }
 0xb25   :  { %v3478_v58 = vadd.f32 %v3752_v9, %v3462_v11  ;;  %v4165_v42 = vpop.eup %4164  ;;  %v3273_v25 = vadd.f32 1e-06, %v3257_v51 }
 0xb26   :  { %v3373_v45 = vmul.f32 %v4163_v43, %v3372_v63  ;;  %v3379_v34 = vmul.f32 %v4165_v42, %v3272_v62  ;;  %vm3385_vm13 = vweird.f32 %v4165_v42  ;;  %v3771_v62 = vld [vmem:[%s6843_s4 + $0x3d8] sm:$0xff]  ;;  %v3772_v63 = vld [vmem:[%s6843_s4 + $0x3e0] sm:$0xff] }
 0xb27   :  { %v3566_v13 = vpop.f32.mrf.mxu3  ;;  %3896 = vmatmul.msk.f32.gmra.mxu3 %vm601_vm5, %v3478_v58  ;;  %4166 = vrsqrt.f32 %v3273_v25  ;;  %vm3386_vm15 = vmor %vm3384_vm14, %vm3385_vm13  ;;  %vm3394_vm1 = vweird.f32 %v3273_v25 }
 0xb28   :  { %v3567_v40 = vadd.f32 %v6698_v60, %v3566_v13  ;;  %v3377_v27 = vsel %vm3376_vm12, %v4163_v43, %v3373_v45  ;;  %v3380_v5 = vmul.f32 %v4165_v42, %v3379_v34 }
 0xb29   :  { %v3447_v22 = vmul.f32 %v3377_v27, %v6581_v23 }
 0xb2a   :  { %3612 = vst [vmem:[%s6854_s19 + $0x8] sm:$0xff] %v3567_v40  ;;  %v3381_v17 = vmul.f32 0.5, %v3380_v5  ;;  %v3236_v49 = vpop.xlane.xlu0 %3235 }
 0xb2b   :  { %v3258_v21 = vmul.f32 %v3236_v49, %v4757_v56  ;;  %v3463_v7 = vmul.f32 %v3769_v54, %v3447_v22  ;;  %v3773_v54 = vld [vmem:[%s6843_s4 + $0x3e8] sm:$0xff] }
 0xb2c   :  { %v3382_v61 = vsub.f32 1.5, %v3381_v17  ;;  %v3757_v17 = vld [vmem:[%s6843_s4 + $0x368] sm:$0xff] }
 0xb2d   :  { %v4167_v37 = vpop.eup %4166  ;;  %v3274_v20 = vadd.f32 1e-06, %v3258_v21  ;;  %v3479_v30 = vadd.f32 %v3753_v19, %v3463_v7 }
 0xb2e   :  { %v3383_v38 = vmul.f32 %v4165_v42, %v3382_v61  ;;  %v3389_v23 = vmul.f32 %v4167_v37, %v3273_v25  ;;  %vm3395_vm0 = vweird.f32 %v4167_v37  ;;  %v3756_v25 = vld [vmem:[%s6843_s4 + $0x360] sm:$0xff] }
 0xb2f   :  { %4168 = vrsqrt.f32 %v3274_v20  ;;  %3897 = vmatmul.msk.f32.gmra.mxu3 %vm601_vm5, %v3479_v30  ;;  %vm3396_vm2 = vmor %vm3394_vm1, %vm3395_vm0  ;;  %vm3404_vm4 = vweird.f32 %v3274_v20 }
 0xb30   :  { %v3569_v59 = vpop.f32.mrf.mxu3  ;;  %v3387_v4 = vsel %vm3386_vm15, %v4165_v42, %v3383_v38  ;;  %v3390_v15 = vmul.f32 %v4167_v37, %v3389_v23 }
 0xb31   :  { %v3570_v53 = vadd.f32 %v6698_v60, %v3569_v59  ;;  %v3448_v12 = vmul.f32 %v3387_v4, %v6601_v28 }
 0xb32   :  { %v3391_v18 = vmul.f32 0.5, %v3390_v15  ;;  %v3239_v47 = vpop.xlane.xlu2 %3238 }
 0xb33   :  { %3613 = vst [vmem:[%s6854_s19 + $0x10] sm:$0xff] %v3570_v53  ;;  %v3259_v16 = vmul.f32 %v3239_v47, %v4757_v56  ;;  %v3464_v46 = vmul.f32 %v3770_v52, %v3448_v12 }
 0xb34   :  { %v3392_v39 = vsub.f32 1.5, %v3391_v18 }
 0xb35   :  { %v4169_v41 = vpop.eup %4168  ;;  %v3275_v31 = vadd.f32 1e-06, %v3259_v16  ;;  %v3480_v26 = vadd.f32 %v3754_v10, %v3464_v46  ;;  %v3774_v10 = vld [vmem:[%s6843_s4 + $0x3f0] sm:$0xff] }
 0xb36   :  { %v3393_v29 = vmul.f32 %v4167_v37, %v3392_v39  ;;  %v3399_v28 = vmul.f32 %v4169_v41, %v3274_v20  ;;  %vm3405_vm3 = vweird.f32 %v4169_v41  ;;  %v3758_v46 = vld [vmem:[%s6843_s4 + $0x370] sm:$0xff] }
 0xb37   :  { %4170 = vrsqrt.f32 %v3275_v31  ;;  %3898 = vmatmul.msk.f32.gmra.mxu3 %vm601_vm5, %v3480_v26  ;;  %vm3406_vm6 = vmor %vm3404_vm4, %vm3405_vm3  ;;  %vm3414_vm8 = vweird.f32 %v3275_v31 }
 0xb38   :  { %v3572_v50 = vpop.f32.mrf.mxu3  ;;  %v3397_v32 = vsel %vm3396_vm2, %v4167_v37, %v3393_v29  ;;  %v3400_v43 = vmul.f32 %v4169_v41, %v3399_v28 }
 0xb39   :  { %v3573_v3 = vadd.f32 %v6698_v60, %v3572_v50  ;;  %v3449_v55 = vmul.f32 %v3397_v32, %v6618_v36 }
 0xb3a   :  { %v3401_v2 = vmul.f32 0.5, %v3400_v43 }
 0xb3b   :  { %3614 = vst [vmem:[%s6854_s19 + $0x18] sm:$0xff] %v3573_v3  ;;  %v3465_v14 = vmul.f32 %v3771_v62, %v3449_v55  ;;  %v3759_v3 = vld [vmem:[%s6843_s4 + $0x378] sm:$0xff] }
 0xb3c   :  { %v3402_v0 = vsub.f32 1.5, %v3401_v2 }
 0xb3d   :  { %v4171_v44 = vpop.eup %4170  ;;  %v3481_v1 = vadd.f32 %v3755_v33, %v3465_v14 }
 0xb3e   :  { %v3403_v9 = vmul.f32 %v4169_v41, %v3402_v0  ;;  %v3409_v6 = vmul.f32 %v4171_v44, %v3275_v31  ;;  %vm3415_vm7 = vweird.f32 %v4171_v44 }
 0xb3f   :  { %3899 = vmatmul.msk.f32.gmra.mxu3 %vm601_vm5, %v3481_v1  ;;  %vm3416_vm9 = vmor %vm3414_vm8, %vm3415_vm7 }
 0xb40   :  { %v3575_v57 = vpop.f32.mrf.mxu3  ;;  %v3407_v36 = vsel %vm3406_vm6, %v4169_v41, %v3403_v9  ;;  %v3410_v11 = vmul.f32 %v4171_v44, %v3409_v6 }
 0xb41   :  { %v3576_v51 = vadd.f32 %v6698_v60, %v3575_v57  ;;  %v3450_v58 = vmul.f32 %v3407_v36, %v6634_v8 }
 0xb42   :  { %v3411_v42 = vmul.f32 0.5, %v3410_v11 }
 0xb43   :  { %3615 = vst [vmem:[%s6854_s19 + $0x20] sm:$0xff] %v3576_v51  ;;  %v3466_v45 = vmul.f32 %v3772_v63, %v3450_v58 }
 0xb44   :  { %v3412_v34 = vsub.f32 1.5, %v3411_v42 }
 0xb45   :  { %v3482_v13 = vadd.f32 %v3756_v25, %v3466_v45 }
 0xb46   :  { %v3413_v40 = vmul.f32 %v4171_v44, %v3412_v34 }
 0xb47   :  { %3900 = vmatmul.msk.f32.gmra.mxu3 %vm601_vm5, %v3482_v13 }
 0xb48   :  { %v3578_v27 = vpop.f32.mrf.mxu3  ;;  %v3417_v8 = vsel %vm3416_vm9, %v4171_v44, %v3413_v40 }
 0xb49   :  { %v3579_v5 = vadd.f32 %v6698_v60, %v3578_v27  ;;  %v3451_v22 = vmul.f32 %v3417_v8, %v6649_v24 }
 0xb4b   :  { %3616 = vst [vmem:[%s6854_s19 + $0x28] sm:$0xff] %v3579_v5  ;;  %v3467_v49 = vmul.f32 %v3773_v54, %v3451_v22 }
 0xb4d   :  { %v3483_v19 = vadd.f32 %v3757_v17, %v3467_v49 }
 0xb4f   :  { %3901 = vmatmul.msk.f32.gmra.mxu3 %vm601_vm5, %v3483_v19 }
 0xb50   :  { %v3581_v21 = vpop.f32.mrf.mxu3 }
 0xb51   :  { %v3582_v7 = vadd.f32 %v6698_v60, %v3581_v21 }
 0xb53   :  { %3617 = vst [vmem:[%s6854_s19 + $0x30] sm:$0xff] %v3582_v7 }
 0xb84   :  { %v3242_v24 = vpop.xlane.xlu1 %3241 }
 0xb85   :  { %v3260_v61 = vmul.f32 %v3242_v24, %v4757_v56 }
 0xb87   :  { %v3276_v37 = vadd.f32 1e-06, %v3260_v61 }
 0xb89   :  { %4172 = vrsqrt.f32 %v3276_v37  ;;  %vm3424_vm11 = vweird.f32 %v3276_v37 }
 0xb8d   :  { %v3245_v20 = vpop.xlane.xlu0 %3244 }
 0xb8e   :  { %v3261_v30 = vmul.f32 %v3245_v20, %v4757_v56 }
 0xb8f   :  { %v4173_v38 = vpop.eup %4172 }
 0xb90   :  { %v3419_v23 = vmul.f32 %v4173_v38, %v3276_v37  ;;  %v3277_v59 = vadd.f32 1e-06, %v3261_v30  ;;  %vm3425_vm10 = vweird.f32 %v4173_v38 }
 0xb91   :  { %vm3426_vm12 = vmor %vm3424_vm11, %vm3425_vm10 }
 0xb92   :  { %v3420_v4 = vmul.f32 %v4173_v38, %v3419_v23  ;;  %4174 = vrsqrt.f32 %v3277_v59  ;;  %vm3434_vm14 = vweird.f32 %v3277_v59 }
 0xb94   :  { %v3421_v15 = vmul.f32 0.5, %v3420_v4 }
 0xb96   :  { %v3422_v53 = vsub.f32 1.5, %v3421_v15 }
 0xb98   :  { %v4175_v52 = vpop.eup %4174  ;;  %v3423_v12 = vmul.f32 %v4173_v38, %v3422_v53 }
 0xb99   :  { %v3429_v18 = vmul.f32 %v4175_v52, %v3277_v59  ;;  %vm3435_vm13 = vweird.f32 %v4175_v52 }
 0xb9a   :  { %v3427_v47 = vsel %vm3426_vm12, %v4173_v38, %v3423_v12  ;;  %vm3436_vm15 = vmor %vm3434_vm14, %vm3435_vm13 }
 0xb9b   :  { %v3452_v56 = vmul.f32 %v3427_v47, %v6675_v35  ;;  %v3430_v16 = vmul.f32 %v4175_v52, %v3429_v18  ;;  %v3775_v35 = vld [vmem:[%s6843_s4 + $0x3f8] sm:$0xff] }
 0xb9d   :  { %v3431_v39 = vmul.f32 0.5, %v3430_v16  ;;  %v3468_v41 = vmul.f32 %v3774_v10, %v3452_v56 }
 0xb9f   :  { %v3432_v31 = vsub.f32 1.5, %v3431_v39  ;;  %v3484_v26 = vadd.f32 %v3758_v46, %v3468_v41 }
 0xba1   :  { %v3433_v29 = vmul.f32 %v4175_v52, %v3432_v31  ;;  %v3584_v28 = vpop.f32.mrf.mxu3  ;;  %3902 = vmatmul.msk.f32.gmra.mxu3 %vm601_vm5, %v3484_v26 }
 0xba2   :  { %v3585_v50 = vadd.f32 %v6698_v60, %v3584_v28 }
 0xba3   :  { %v3437_v32 = vsel %vm3436_vm15, %v4175_v52, %v3433_v29 }
 0xba4   :  { %v3453_v43 = vmul.f32 %v3437_v32, %v6683_v48  ;;  %3618 = vst [vmem:[%s6854_s19 + $0x38] sm:$0xff] %v3585_v50 }
 0xba6   :  { %v3469_v62 = vmul.f32 %v3775_v35, %v3453_v43 }
 0xba8   :  { %v3485_v55 = vadd.f32 %v3759_v3, %v3469_v62 }
 0xbaa   :  { %v3587_v2 = vpop.f32.mrf.mxu3  ;;  %3903 = vmatmul.msk.f32.gmra.mxu3 %vm601_vm5, %v3485_v55 }
 0xbab   :  { %v3588_v33 = vadd.f32 %v6698_v60, %v3587_v2 }
 0xbad   :  { %3619 = vst [vmem:[%s6854_s19 + $0x40] sm:$0xff] %v3588_v33 }
 0xbb2   :  { %v3590_v48 = vpop.f32.mrf.mxu3 }
 0xbb3   :  { %v3591_v14 = vadd.f32 %v6698_v60, %v3590_v48 }
 0xbb5   :  { %3620 = vst [vmem:[%s6854_s19 + $0x48] sm:$0xff] %v3591_v14 }
 0xbba   :  { %v3593_v0 = vpop.f32.mrf.mxu3 }
 0xbbb   :  { %v3594_v44 = vadd.f32 %v6698_v60, %v3593_v0 }
 0xbbd   :  { %3621 = vst [vmem:[%s6854_s19 + $0x50] sm:$0xff] %v3594_v44 }
 0xbc2   :  { %v3596_v1 = vpop.f32.mrf.mxu3 }
 0xbc3   :  { %v3597_v9 = vadd.f32 %v6698_v60, %v3596_v1 }
 0xbc5   :  { %3622 = vst [vmem:[%s6854_s19 + $0x58] sm:$0xff] %v3597_v9 }
 0xbca   :  { %v3599_v6 = vpop.f32.mrf.mxu3 }
 0xbcb   :  { %v3600_v57 = vadd.f32 %v6698_v60, %v3599_v6 }
 0xbcd   :  { %3623 = vst [vmem:[%s6854_s19 + $0x60] sm:$0xff] %v3600_v57 }
 0xbd2   :  { %v3602_v36 = vpop.f32.mrf.mxu3 }
 0xbd3   :  { %v3603_v11 = vadd.f32 %v6698_v60, %v3602_v36 }
 0xbd5   :  { %3624 = vst [vmem:[%s6854_s19 + $0x68] sm:$0xff] %v3603_v11 }
 0xc24   :  { %v3605_v51 = vpop.f32.mrf.mxu3 }
 0xc25   :  { %v3606_v63 = vadd.f32 %v6698_v60, %v3605_v51 }
 0xc27   :  { %3625 = vst [vmem:[%s6854_s19 + $0x70] sm:$0xff] %v3606_v63 }
 0xc2d   :  { %v3608_v58 = vpop.f32.mrf.mxu3 }
 0xc2e   :  { %v3609_v42 = vadd.f32 %v6698_v60, %v3608_v58 }
 0xc30   :  { %3626 = vst [vmem:[%s6854_s19 + $0x78] sm:$0xff] %v3609_v42 }

</bundles_post_ra>
